<compile_context>
chip_gen: v7x
topology: tpu7x:2x2x1
jax: 0.10.0
libtpu: 0.0.40
codegen_flags: <defaults>
</compile_context>

<pallas_src>
import functools

import jax
import jax.numpy as jnp
from jax.experimental import pallas as pl
from jax.experimental.pallas import tpu as pltpu


def _lstm_cell(gates, c, hidden):
    """gates: (B, 4H) with columns packed as [i, f, o, g]; c: (B, H)."""
    sig = jax.nn.sigmoid(gates[:, : 3 * hidden])   # one wide sigmoid (i, f, o)
    g = jnp.tanh(gates[:, 3 * hidden:])            # one tanh (g)
    i = sig[:, :hidden]
    f = sig[:, hidden: 2 * hidden]
    o = sig[:, 2 * hidden: 3 * hidden]
    c_new = f * c + i * g
    h_new = o * jnp.tanh(c_new)
    return h_new, c_new


def _bilstm_kernel(*refs, T, B, H, L):
    # refs = [lens, x, (wih, whh, b) * L, w_out, b_out, o_ref, act_scr]
    lens_ref = refs[0]                                   # SMEM (B,) int32
    x_ref = refs[1]                                      # VMEM (T*B, E)
    layer_refs = [refs[2 + 3 * l: 2 + 3 * (l + 1)] for l in range(L)]
    w_out_ref = refs[2 + 3 * L]                          # (2H, O)
    b_out_ref = refs[3 + 3 * L]                          # (1, O)
    o_ref = refs[4 + 3 * L]                              # (B, O) output
    act_scr = refs[5 + 3 * L]                            # VMEM scratch (T*B, 2H)

    H2, H4 = 2 * H, 4 * H

    x_in = x_ref[...]                                    # (T*B, Din) layer-0 input
    for l in range(L):
        wih_ref, whh_ref, b_ref = layer_refs[l]

        # Hoisted input projection for BOTH directions: one matmul per layer.
        xp = (jnp.dot(x_in, wih_ref[...], preferred_element_type=jnp.float32)
              + b_ref[...])                              # (T*B, 8H): [fwd 4H | bwd 4H]
        whh = whh_ref[...]                               # (2H, 8H) block-diag fwd/bwd

        h2 = jnp.zeros((B, H2), jnp.float32)             # [h_fwd | h_bwd]
        c_f = jnp.zeros((B, H), jnp.float32)
        c_b = jnp.zeros((B, H), jnp.float32)

        # Static unroll over time; one iteration advances fwd time s and bwd time T-1-s.
        for s in range(T):
            tf = s
            tb = T - 1 - s
            # One MXU op for both recurrent projections (block-diagonal W_hh).
            gh = jnp.dot(h2, whh, preferred_element_type=jnp.float32)     # (B, 8H)
            gates_f = xp[tf * B:(tf + 1) * B, :H4] + gh[:, :H4]
            gates_b = xp[tb * B:(tb + 1) * B, H4:] + gh[:, H4:]
            h_f, c_f = _lstm_cell(gates_f, c_f, H)
            h_b, c_b = _lstm_cell(gates_b, c_b, H)
            act_scr[tf * B:(tf + 1) * B, 0:H] = h_f
            act_scr[tb * B:(tb + 1) * B, H:H2] = h_b
            h2 = jnp.concatenate([h_f, h_b], axis=1)

        if l + 1 < L:
            x_in = act_scr[...]                          # (T*B, 2H) next-layer input

    # Gather per-example state at t = seq_len - 1 and apply the classifier in-kernel.
    rows = []
    for b in range(B):
        idx = (lens_ref[b] - 1) * B + b                  # row index into (T*B, 2H)
        rows.append(act_scr[pl.ds(idx, 1), :])           # (1, 2H)
    state = jnp.concatenate(rows, axis=0)                # (B, 2H)

    logits = (jnp.dot(state, w_out_ref[...], preferred_element_type=jnp.float32)
              + b_out_ref[...])
    o_ref[...] = logits.astype(o_ref.dtype)


def bilstm_forward(params, input_seq, seq_lens):
    """input_seq: (B, T) int32 token ids; seq_lens: (B,) int32 -> (B, output) logits."""
    B, T = input_seq.shape
    emb_table = params["embedding"]
    E = emb_table.shape[1]
    lstm = params["lstm"]
    L = len(lstm)
    H = lstm[0][1].shape[0] // 2                         # whh_comb is (2H, 8H)
    O = params["out_w"].shape[1]

    # Embedding lookup + time-major flatten (glue; gather stays in XLA).
    emb = jnp.take(emb_table, input_seq, axis=0)         # (B, T, E)
    x = jnp.transpose(emb, (1, 0, 2)).reshape(T * B, E)  # row layout: t * B + b
    # embedding_dropout / lstm_dropout layers: identity in eval mode.

    flat_w = []
    for l in range(L):
        flat_w.extend(lstm[l])                           # (wih_comb, whh_comb, b_comb)

    kernel = functools.partial(_bilstm_kernel, T=T, B=B, H=H, L=L)
    n_vmem_inputs = 1 + 3 * L + 2                        # x, layer params, w_out, b_out
    return pl.pallas_call(
        kernel,
        out_shape=jax.ShapeDtypeStruct((B, O), jnp.float32),
        in_specs=[pl.BlockSpec(memory_space=pltpu.MemorySpace.SMEM)]
        + [pl.BlockSpec(memory_space=pltpu.MemorySpace.VMEM)] * n_vmem_inputs,
        out_specs=pl.BlockSpec(memory_space=pltpu.MemorySpace.VMEM),
        scratch_shapes=[pltpu.VMEM((T * B, 2 * H), jnp.float32)],
    )(seq_lens.astype(jnp.int32), x, *flat_w, params["out_w"], params["out_b"])


# ----------------------------------------------------------------------------
# Parameter init: PyTorch-layout random weights, repacked for the kernel.
#   per direction:  W_ih (4H, Din) rows [i,f,g,o]  ->  (Din, 4H) cols [i,f,o,g]
#   per layer:      W_ih_comb = [fwd | bwd]          (Din, 8H)
#                   W_hh_comb = block-diag(fwd, bwd) (2H, 8H)
#                   b_comb    = (b_ih + b_hh) fused  (1, 8H)
# ----------------------------------------------------------------------------
def init_params(key, vocab, emb_dim, hidden, num_layers, out_dim):
    keys = iter(jax.random.split(key, 64))
    H = hidden
    params = {"embedding": jax.random.normal(next(keys), (vocab, emb_dim), jnp.float32)}

    # gate-row permutation: PyTorch [i, f, g, o] -> packed [i, f, o, g]
    perm = jnp.concatenate([jnp.arange(0, H), jnp.arange(H, 2 * H),
                            jnp.arange(3 * H, 4 * H), jnp.arange(2 * H, 3 * H)])

    bound = 1.0 / float(H) ** 0.5
    lstm = []
    for layer in range(num_layers):
        in_dim = emb_dim if layer == 0 else 2 * H
        packed = []
        for _direction in range(2):                      # fwd, bwd
            w_ih = jax.random.uniform(next(keys), (4 * H, in_dim), jnp.float32, -bound, bound)
            w_hh = jax.random.uniform(next(keys), (4 * H, H), jnp.float32, -bound, bound)
            b_ih = jax.random.uniform(next(keys), (4 * H,), jnp.float32, -bound, bound)
            b_hh = jax.random.uniform(next(keys), (4 * H,), jnp.float32, -bound, bound)
            packed.append((w_ih[perm].T, w_hh[perm].T, (b_ih + b_hh)[perm]))
        (wih_f, whh_f, b_f), (wih_b, whh_b, b_b) = packed

        wih_comb = jnp.concatenate([wih_f, wih_b], axis=1)           # (Din, 8H)
        b_comb = jnp.concatenate([b_f, b_b]).reshape(1, 8 * H)       # (1, 8H)
        whh_comb = jnp.zeros((2 * H, 8 * H), jnp.float32)
        whh_comb = whh_comb.at[:H, : 4 * H].set(whh_f)               # fwd block
        whh_comb = whh_comb.at[H:, 4 * H:].set(whh_b)                # bwd block
        lstm.append((wih_comb, whh_comb, b_comb))
    params["lstm"] = lstm

    out_bound = 1.0 / float(2 * H) ** 0.5
    params["out_w"] = jax.random.uniform(next(keys), (2 * H, out_dim), jnp.float32,
                                         -out_bound, out_bound)
    params["out_b"] = jax.random.uniform(next(keys), (1, out_dim), jnp.float32,
                                         -out_bound, out_bound)
    return params


if __name__ == "__main__":
    # Small shapes consistent with the module.
    input_size = 50          # vocab
    embedding_length = 16
    hidden_size = 32
    num_layers = 2
    output_size = 4
    batch = 2
    seq = 8

    key = jax.random.PRNGKey(0)
    k_params, k_tokens = jax.random.split(key)

    params = init_params(k_params, input_size, embedding_length, hidden_size,
                         num_layers, output_size)
    input_seq = jax.random.randint(k_tokens, (batch, seq), 0, input_size, dtype=jnp.int32)
    seq_lens = jnp.array([seq, 5], dtype=jnp.int32)

    logits = jax.jit(bilstm_forward)(params, input_seq, seq_lens)
    logits = jax.block_until_ready(logits)
    assert logits.shape == (batch, output_size)
    print("KERNEL_OK")
</pallas_src>

<mosaic_0001>
module attributes {stable_mosaic.version = 11 : i64} {
  func.func @_bilstm_kernel(%arg0: memref<2xi32, #tpu.memory_space<smem>>, %arg1: memref<16x16xf32, #tpu.memory_space<vmem>>, %arg2: memref<16x256xf32, #tpu.memory_space<vmem>>, %arg3: memref<64x256xf32, #tpu.memory_space<vmem>>, %arg4: memref<1x256xf32, #tpu.memory_space<vmem>>, %arg5: memref<64x256xf32, #tpu.memory_space<vmem>>, %arg6: memref<64x256xf32, #tpu.memory_space<vmem>>, %arg7: memref<1x256xf32, #tpu.memory_space<vmem>>, %arg8: memref<64x4xf32, #tpu.memory_space<vmem>>, %arg9: memref<1x4xf32, #tpu.memory_space<vmem>>, %arg10: memref<2x4xf32, #tpu.memory_space<vmem>>, %arg11: memref<16x64xf32, #tpu.memory_space<vmem>>) attributes {dimension_semantics = [], scalar_prefetch = 0 : i64, scratch_operands = 1 : i64, tpu.core_type = #tpu.core_type<tc>} {
    %c0 = arith.constant 0 : index
    %c0_0 = arith.constant 0 : index
    %0 = vector.load %arg1[%c0, %c0_0] : memref<16x16xf32, #tpu.memory_space<vmem>>, vector<16x16xf32>
    %c0_1 = arith.constant 0 : index
    %c0_2 = arith.constant 0 : index
    %1 = vector.load %arg2[%c0_1, %c0_2] : memref<16x256xf32, #tpu.memory_space<vmem>>, vector<16x256xf32>
    %cst = arith.constant dense<0.000000e+00> : vector<16x256xf32>
    %2 = tpu.matmul %0, %1, %cst {dimension_numbers = #tpu.dot_dimension_numbers<[1], [0], [0], [1], [0, 0, 1, 1], [], []>} : vector<16x16xf32>, vector<16x256xf32>, vector<16x256xf32> -> vector<16x256xf32>
    %c0_3 = arith.constant 0 : index
    %c0_4 = arith.constant 0 : index
    %3 = vector.load %arg4[%c0_3, %c0_4] : memref<1x256xf32, #tpu.memory_space<vmem>>, vector<1x256xf32>
    %4 = vector.broadcast %3 : vector<1x256xf32> to vector<16x256xf32>
    %5 = arith.addf %2, %4 : vector<16x256xf32>
    %c0_5 = arith.constant 0 : index
    %c0_6 = arith.constant 0 : index
    %6 = vector.load %arg3[%c0_5, %c0_6] : memref<64x256xf32, #tpu.memory_space<vmem>>, vector<64x256xf32>
    %cst_7 = arith.constant 0.000000e+00 : f32
    %7 = vector.broadcast %cst_7 : f32 to vector<2x64xf32>
    %cst_8 = arith.constant 0.000000e+00 : f32
    %8 = vector.broadcast %cst_8 : f32 to vector<2x32xf32>
    %cst_9 = arith.constant 0.000000e+00 : f32
    %9 = vector.broadcast %cst_9 : f32 to vector<2x32xf32>
    %cst_10 = arith.constant dense<0.000000e+00> : vector<2x256xf32>
    %10 = tpu.matmul %7, %6, %cst_10 {dimension_numbers = #tpu.dot_dimension_numbers<[1], [0], [0], [1], [0, 0, 1, 1], [], []>} : vector<2x64xf32>, vector<64x256xf32>, vector<2x256xf32> -> vector<2x256xf32>
    %11 = vector.extract_strided_slice %5 {offsets = [0, 0], sizes = [2, 128], strides = [1, 1]} : vector<16x256xf32> to vector<2x128xf32>
    %12 = vector.extract_strided_slice %10 {offsets = [0, 0], sizes = [2, 128], strides = [1, 1]} : vector<2x256xf32> to vector<2x128xf32>
    %13 = arith.addf %11, %12 : vector<2x128xf32>
    %14 = vector.extract_strided_slice %5 {offsets = [14, 128], sizes = [2, 128], strides = [1, 1]} : vector<16x256xf32> to vector<2x128xf32>
    %15 = vector.extract_strided_slice %10 {offsets = [0, 128], sizes = [2, 128], strides = [1, 1]} : vector<2x256xf32> to vector<2x128xf32>
    %16 = arith.addf %14, %15 : vector<2x128xf32>
    %17 = vector.extract_strided_slice %13 {offsets = [0, 0], sizes = [2, 96], strides = [1, 1]} : vector<2x128xf32> to vector<2x96xf32>
    %18 = arith.negf %17 : vector<2x96xf32>
    %19 = math.exp %18 : vector<2x96xf32>
    %cst_11 = arith.constant 1.000000e+00 : f32
    %20 = vector.broadcast %cst_11 : f32 to vector<2x96xf32>
    %21 = arith.addf %20, %19 : vector<2x96xf32>
    %22 = arith.divf %20, %21 : vector<2x96xf32>
    %23 = vector.extract_strided_slice %13 {offsets = [0, 96], sizes = [2, 32], strides = [1, 1]} : vector<2x128xf32> to vector<2x32xf32>
    %24 = math.tanh %23 : vector<2x32xf32>
    %25 = vector.extract_strided_slice %22 {offsets = [0, 0], sizes = [2, 32], strides = [1, 1]} : vector<2x96xf32> to vector<2x32xf32>
    %26 = vector.extract_strided_slice %22 {offsets = [0, 32], sizes = [2, 32], strides = [1, 1]} : vector<2x96xf32> to vector<2x32xf32>
    %27 = vector.extract_strided_slice %22 {offsets = [0, 64], sizes = [2, 32], strides = [1, 1]} : vector<2x96xf32> to vector<2x32xf32>
    %28 = arith.mulf %26, %8 : vector<2x32xf32>
    %29 = arith.mulf %25, %24 : vector<2x32xf32>
    %30 = arith.addf %28, %29 : vector<2x32xf32>
    %31 = math.tanh %30 : vector<2x32xf32>
    %32 = arith.mulf %27, %31 : vector<2x32xf32>
    %33 = vector.extract_strided_slice %16 {offsets = [0, 0], sizes = [2, 96], strides = [1, 1]} : vector<2x128xf32> to vector<2x96xf32>
    %34 = arith.negf %33 : vector<2x96xf32>
    %35 = math.exp %34 : vector<2x96xf32>
    %cst_12 = arith.constant 1.000000e+00 : f32
    %36 = vector.broadcast %cst_12 : f32 to vector<2x96xf32>
    %37 = arith.addf %36, %35 : vector<2x96xf32>
    %38 = arith.divf %36, %37 : vector<2x96xf32>
    %39 = vector.extract_strided_slice %16 {offsets = [0, 96], sizes = [2, 32], strides = [1, 1]} : vector<2x128xf32> to vector<2x32xf32>
    %40 = math.tanh %39 : vector<2x32xf32>
    %41 = vector.extract_strided_slice %38 {offsets = [0, 0], sizes = [2, 32], strides = [1, 1]} : vector<2x96xf32> to vector<2x32xf32>
    %42 = vector.extract_strided_slice %38 {offsets = [0, 32], sizes = [2, 32], strides = [1, 1]} : vector<2x96xf32> to vector<2x32xf32>
    %43 = vector.extract_strided_slice %38 {offsets = [0, 64], sizes = [2, 32], strides = [1, 1]} : vector<2x96xf32> to vector<2x32xf32>
    %44 = arith.mulf %42, %9 : vector<2x32xf32>
    %45 = arith.mulf %41, %40 : vector<2x32xf32>
    %46 = arith.addf %44, %45 : vector<2x32xf32>
    %47 = math.tanh %46 : vector<2x32xf32>
    %48 = arith.mulf %43, %47 : vector<2x32xf32>
    %c0_13 = arith.constant 0 : index
    %c0_14 = arith.constant 0 : index
    %49 = vector.load %arg11[%c0_13, %c0_14] : memref<16x64xf32, #tpu.memory_space<vmem>>, vector<2x32xf32>
    tpu.vector_store %arg11[%c0_13, %c0_14], %32 {strides = array<i32>} : memref<16x64xf32, #tpu.memory_space<vmem>>, vector<2x32xf32>,
    %c14 = arith.constant 14 : index
    %c32 = arith.constant 32 : index
    %50 = vector.load %arg11[%c14, %c32] : memref<16x64xf32, #tpu.memory_space<vmem>>, vector<2x32xf32>
    tpu.vector_store %arg11[%c14, %c32], %48 {strides = array<i32>} : memref<16x64xf32, #tpu.memory_space<vmem>>, vector<2x32xf32>,
    %51 = tpu.concatenate %32, %48 in 1 : vector<2x32xf32>, vector<2x32xf32> -> vector<2x64xf32>
    %cst_15 = arith.constant dense<0.000000e+00> : vector<2x256xf32>
    %52 = tpu.matmul %51, %6, %cst_15 {dimension_numbers = #tpu.dot_dimension_numbers<[1], [0], [0], [1], [0, 0, 1, 1], [], []>} : vector<2x64xf32>, vector<64x256xf32>, vector<2x256xf32> -> vector<2x256xf32>
    %53 = vector.extract_strided_slice %5 {offsets = [2, 0], sizes = [2, 128], strides = [1, 1]} : vector<16x256xf32> to vector<2x128xf32>
    %54 = vector.extract_strided_slice %52 {offsets = [0, 0], sizes = [2, 128], strides = [1, 1]} : vector<2x256xf32> to vector<2x128xf32>
    %55 = arith.addf %53, %54 : vector<2x128xf32>
    %56 = vector.extract_strided_slice %5 {offsets = [12, 128], sizes = [2, 128], strides = [1, 1]} : vector<16x256xf32> to vector<2x128xf32>
    %57 = vector.extract_strided_slice %52 {offsets = [0, 128], sizes = [2, 128], strides = [1, 1]} : vector<2x256xf32> to vector<2x128xf32>
    %58 = arith.addf %56, %57 : vector<2x128xf32>
    %59 = vector.extract_strided_slice %55 {offsets = [0, 0], sizes = [2, 96], strides = [1, 1]} : vector<2x128xf32> to vector<2x96xf32>
    %60 = arith.negf %59 : vector<2x96xf32>
    %61 = math.exp %60 : vector<2x96xf32>
    %cst_16 = arith.constant 1.000000e+00 : f32
    %62 = vector.broadcast %cst_16 : f32 to vector<2x96xf32>
    %63 = arith.addf %62, %61 : vector<2x96xf32>
    %64 = arith.divf %62, %63 : vector<2x96xf32>
    %65 = vector.extract_strided_slice %55 {offsets = [0, 96], sizes = [2, 32], strides = [1, 1]} : vector<2x128xf32> to vector<2x32xf32>
    %66 = math.tanh %65 : vector<2x32xf32>
    %67 = vector.extract_strided_slice %64 {offsets = [0, 0], sizes = [2, 32], strides = [1, 1]} : vector<2x96xf32> to vector<2x32xf32>
    %68 = vector.extract_strided_slice %64 {offsets = [0, 32], sizes = [2, 32], strides = [1, 1]} : vector<2x96xf32> to vector<2x32xf32>
    %69 = vector.extract_strided_slice %64 {offsets = [0, 64], sizes = [2, 32], strides = [1, 1]} : vector<2x96xf32> to vector<2x32xf32>
    %70 = arith.mulf %68, %30 : vector<2x32xf32>
    %71 = arith.mulf %67, %66 : vector<2x32xf32>
    %72 = arith.addf %70, %71 : vector<2x32xf32>
    %73 = math.tanh %72 : vector<2x32xf32>
    %74 = arith.mulf %69, %73 : vector<2x32xf32>
    %75 = vector.extract_strided_slice %58 {offsets = [0, 0], sizes = [2, 96], strides = [1, 1]} : vector<2x128xf32> to vector<2x96xf32>
    %76 = arith.negf %75 : vector<2x96xf32>
    %77 = math.exp %76 : vector<2x96xf32>
    %cst_17 = arith.constant 1.000000e+00 : f32
    %78 = vector.broadcast %cst_17 : f32 to vector<2x96xf32>
    %79 = arith.addf %78, %77 : vector<2x96xf32>
    %80 = arith.divf %78, %79 : vector<2x96xf32>
    %81 = vector.extract_strided_slice %58 {offsets = [0, 96], sizes = [2, 32], strides = [1, 1]} : vector<2x128xf32> to vector<2x32xf32>
    %82 = math.tanh %81 : vector<2x32xf32>
    %83 = vector.extract_strided_slice %80 {offsets = [0, 0], sizes = [2, 32], strides = [1, 1]} : vector<2x96xf32> to vector<2x32xf32>
    %84 = vector.extract_strided_slice %80 {offsets = [0, 32], sizes = [2, 32], strides = [1, 1]} : vector<2x96xf32> to vector<2x32xf32>
    %85 = vector.extract_strided_slice %80 {offsets = [0, 64], sizes = [2, 32], strides = [1, 1]} : vector<2x96xf32> to vector<2x32xf32>
    %86 = arith.mulf %84, %46 : vector<2x32xf32>
    %87 = arith.mulf %83, %82 : vector<2x32xf32>
    %88 = arith.addf %86, %87 : vector<2x32xf32>
    %89 = math.tanh %88 : vector<2x32xf32>
    %90 = arith.mulf %85, %89 : vector<2x32xf32>
    %c2 = arith.constant 2 : index
    %c0_18 = arith.constant 0 : index
    %91 = vector.load %arg11[%c2, %c0_18] : memref<16x64xf32, #tpu.memory_space<vmem>>, vector<2x32xf32>
    tpu.vector_store %arg11[%c2, %c0_18], %74 {strides = array<i32>} : memref<16x64xf32, #tpu.memory_space<vmem>>, vector<2x32xf32>,
    %c12 = arith.constant 12 : index
    %c32_19 = arith.constant 32 : index
    %92 = vector.load %arg11[%c12, %c32_19] : memref<16x64xf32, #tpu.memory_space<vmem>>, vector<2x32xf32>
    tpu.vector_store %arg11[%c12, %c32_19], %90 {strides = array<i32>} : memref<16x64xf32, #tpu.memory_space<vmem>>, vector<2x32xf32>,
    %93 = tpu.concatenate %74, %90 in 1 : vector<2x32xf32>, vector<2x32xf32> -> vector<2x64xf32>
    %cst_20 = arith.constant dense<0.000000e+00> : vector<2x256xf32>
    %94 = tpu.matmul %93, %6, %cst_20 {dimension_numbers = #tpu.dot_dimension_numbers<[1], [0], [0], [1], [0, 0, 1, 1], [], []>} : vector<2x64xf32>, vector<64x256xf32>, vector<2x256xf32> -> vector<2x256xf32>
    %95 = vector.extract_strided_slice %5 {offsets = [4, 0], sizes = [2, 128], strides = [1, 1]} : vector<16x256xf32> to vector<2x128xf32>
    %96 = vector.extract_strided_slice %94 {offsets = [0, 0], sizes = [2, 128], strides = [1, 1]} : vector<2x256xf32> to vector<2x128xf32>
    %97 = arith.addf %95, %96 : vector<2x128xf32>
    %98 = vector.extract_strided_slice %5 {offsets = [10, 128], sizes = [2, 128], strides = [1, 1]} : vector<16x256xf32> to vector<2x128xf32>
    %99 = vector.extract_strided_slice %94 {offsets = [0, 128], sizes = [2, 128], strides = [1, 1]} : vector<2x256xf32> to vector<2x128xf32>
    %100 = arith.addf %98, %99 : vector<2x128xf32>
    %101 = vector.extract_strided_slice %97 {offsets = [0, 0], sizes = [2, 96], strides = [1, 1]} : vector<2x128xf32> to vector<2x96xf32>
    %102 = arith.negf %101 : vector<2x96xf32>
    %103 = math.exp %102 : vector<2x96xf32>
    %cst_21 = arith.constant 1.000000e+00 : f32
    %104 = vector.broadcast %cst_21 : f32 to vector<2x96xf32>
    %105 = arith.addf %104, %103 : vector<2x96xf32>
    %106 = arith.divf %104, %105 : vector<2x96xf32>
    %107 = vector.extract_strided_slice %97 {offsets = [0, 96], sizes = [2, 32], strides = [1, 1]} : vector<2x128xf32> to vector<2x32xf32>
    %108 = math.tanh %107 : vector<2x32xf32>
    %109 = vector.extract_strided_slice %106 {offsets = [0, 0], sizes = [2, 32], strides = [1, 1]} : vector<2x96xf32> to vector<2x32xf32>
    %110 = vector.extract_strided_slice %106 {offsets = [0, 32], sizes = [2, 32], strides = [1, 1]} : vector<2x96xf32> to vector<2x32xf32>
    %111 = vector.extract_strided_slice %106 {offsets = [0, 64], sizes = [2, 32], strides = [1, 1]} : vector<2x96xf32> to vector<2x32xf32>
    %112 = arith.mulf %110, %72 : vector<2x32xf32>
    %113 = arith.mulf %109, %108 : vector<2x32xf32>
    %114 = arith.addf %112, %113 : vector<2x32xf32>
    %115 = math.tanh %114 : vector<2x32xf32>
    %116 = arith.mulf %111, %115 : vector<2x32xf32>
    %117 = vector.extract_strided_slice %100 {offsets = [0, 0], sizes = [2, 96], strides = [1, 1]} : vector<2x128xf32> to vector<2x96xf32>
    %118 = arith.negf %117 : vector<2x96xf32>
    %119 = math.exp %118 : vector<2x96xf32>
    %cst_22 = arith.constant 1.000000e+00 : f32
    %120 = vector.broadcast %cst_22 : f32 to vector<2x96xf32>
    %121 = arith.addf %120, %119 : vector<2x96xf32>
    %122 = arith.divf %120, %121 : vector<2x96xf32>
    %123 = vector.extract_strided_slice %100 {offsets = [0, 96], sizes = [2, 32], strides = [1, 1]} : vector<2x128xf32> to vector<2x32xf32>
    %124 = math.tanh %123 : vector<2x32xf32>
    %125 = vector.extract_strided_slice %122 {offsets = [0, 0], sizes = [2, 32], strides = [1, 1]} : vector<2x96xf32> to vector<2x32xf32>
    %126 = vector.extract_strided_slice %122 {offsets = [0, 32], sizes = [2, 32], strides = [1, 1]} : vector<2x96xf32> to vector<2x32xf32>
    %127 = vector.extract_strided_slice %122 {offsets = [0, 64], sizes = [2, 32], strides = [1, 1]} : vector<2x96xf32> to vector<2x32xf32>
    %128 = arith.mulf %126, %88 : vector<2x32xf32>
    %129 = arith.mulf %125, %124 : vector<2x32xf32>
    %130 = arith.addf %128, %129 : vector<2x32xf32>
    %131 = math.tanh %130 : vector<2x32xf32>
    %132 = arith.mulf %127, %131 : vector<2x32xf32>
    %c4 = arith.constant 4 : index
    %c0_23 = arith.constant 0 : index
    %133 = vector.load %arg11[%c4, %c0_23] : memref<16x64xf32, #tpu.memory_space<vmem>>, vector<2x32xf32>
    tpu.vector_store %arg11[%c4, %c0_23], %116 {strides = array<i32>} : memref<16x64xf32, #tpu.memory_space<vmem>>, vector<2x32xf32>,
    %c10 = arith.constant 10 : index
    %c32_24 = arith.constant 32 : index
    %134 = vector.load %arg11[%c10, %c32_24] : memref<16x64xf32, #tpu.memory_space<vmem>>, vector<2x32xf32>
    tpu.vector_store %arg11[%c10, %c32_24], %132 {strides = array<i32>} : memref<16x64xf32, #tpu.memory_space<vmem>>, vector<2x32xf32>,
    %135 = tpu.concatenate %116, %132 in 1 : vector<2x32xf32>, vector<2x32xf32> -> vector<2x64xf32>
    %cst_25 = arith.constant dense<0.000000e+00> : vector<2x256xf32>
    %136 = tpu.matmul %135, %6, %cst_25 {dimension_numbers = #tpu.dot_dimension_numbers<[1], [0], [0], [1], [0, 0, 1, 1], [], []>} : vector<2x64xf32>, vector<64x256xf32>, vector<2x256xf32> -> vector<2x256xf32>
    %137 = vector.extract_strided_slice %5 {offsets = [6, 0], sizes = [2, 128], strides = [1, 1]} : vector<16x256xf32> to vector<2x128xf32>
    %138 = vector.extract_strided_slice %136 {offsets = [0, 0], sizes = [2, 128], strides = [1, 1]} : vector<2x256xf32> to vector<2x128xf32>
    %139 = arith.addf %137, %138 : vector<2x128xf32>
    %140 = vector.extract_strided_slice %5 {offsets = [8, 128], sizes = [2, 128], strides = [1, 1]} : vector<16x256xf32> to vector<2x128xf32>
    %141 = vector.extract_strided_slice %136 {offsets = [0, 128], sizes = [2, 128], strides = [1, 1]} : vector<2x256xf32> to vector<2x128xf32>
    %142 = arith.addf %140, %141 : vector<2x128xf32>
    %143 = vector.extract_strided_slice %139 {offsets = [0, 0], sizes = [2, 96], strides = [1, 1]} : vector<2x128xf32> to vector<2x96xf32>
    %144 = arith.negf %143 : vector<2x96xf32>
    %145 = math.exp %144 : vector<2x96xf32>
    %cst_26 = arith.constant 1.000000e+00 : f32
    %146 = vector.broadcast %cst_26 : f32 to vector<2x96xf32>
    %147 = arith.addf %146, %145 : vector<2x96xf32>
    %148 = arith.divf %146, %147 : vector<2x96xf32>
    %149 = vector.extract_strided_slice %139 {offsets = [0, 96], sizes = [2, 32], strides = [1, 1]} : vector<2x128xf32> to vector<2x32xf32>
    %150 = math.tanh %149 : vector<2x32xf32>
    %151 = vector.extract_strided_slice %148 {offsets = [0, 0], sizes = [2, 32], strides = [1, 1]} : vector<2x96xf32> to vector<2x32xf32>
    %152 = vector.extract_strided_slice %148 {offsets = [0, 32], sizes = [2, 32], strides = [1, 1]} : vector<2x96xf32> to vector<2x32xf32>
    %153 = vector.extract_strided_slice %148 {offsets = [0, 64], sizes = [2, 32], strides = [1, 1]} : vector<2x96xf32> to vector<2x32xf32>
    %154 = arith.mulf %152, %114 : vector<2x32xf32>
    %155 = arith.mulf %151, %150 : vector<2x32xf32>
    %156 = arith.addf %154, %155 : vector<2x32xf32>
    %157 = math.tanh %156 : vector<2x32xf32>
    %158 = arith.mulf %153, %157 : vector<2x32xf32>
    %159 = vector.extract_strided_slice %142 {offsets = [0, 0], sizes = [2, 96], strides = [1, 1]} : vector<2x128xf32> to vector<2x96xf32>
    %160 = arith.negf %159 : vector<2x96xf32>
    %161 = math.exp %160 : vector<2x96xf32>
    %cst_27 = arith.constant 1.000000e+00 : f32
    %162 = vector.broadcast %cst_27 : f32 to vector<2x96xf32>
    %163 = arith.addf %162, %161 : vector<2x96xf32>
    %164 = arith.divf %162, %163 : vector<2x96xf32>
    %165 = vector.extract_strided_slice %142 {offsets = [0, 96], sizes = [2, 32], strides = [1, 1]} : vector<2x128xf32> to vector<2x32xf32>
    %166 = math.tanh %165 : vector<2x32xf32>
    %167 = vector.extract_strided_slice %164 {offsets = [0, 0], sizes = [2, 32], strides = [1, 1]} : vector<2x96xf32> to vector<2x32xf32>
    %168 = vector.extract_strided_slice %164 {offsets = [0, 32], sizes = [2, 32], strides = [1, 1]} : vector<2x96xf32> to vector<2x32xf32>
    %169 = vector.extract_strided_slice %164 {offsets = [0, 64], sizes = [2, 32], strides = [1, 1]} : vector<2x96xf32> to vector<2x32xf32>
    %170 = arith.mulf %168, %130 : vector<2x32xf32>
    %171 = arith.mulf %167, %166 : vector<2x32xf32>
    %172 = arith.addf %170, %171 : vector<2x32xf32>
    %173 = math.tanh %172 : vector<2x32xf32>
    %174 = arith.mulf %169, %173 : vector<2x32xf32>
    %c6 = arith.constant 6 : index
    %c0_28 = arith.constant 0 : index
    %175 = vector.load %arg11[%c6, %c0_28] : memref<16x64xf32, #tpu.memory_space<vmem>>, vector<2x32xf32>
    tpu.vector_store %arg11[%c6, %c0_28], %158 {strides = array<i32>} : memref<16x64xf32, #tpu.memory_space<vmem>>, vector<2x32xf32>,
    %c8 = arith.constant 8 : index
    %c32_29 = arith.constant 32 : index
    %176 = vector.load %arg11[%c8, %c32_29] : memref<16x64xf32, #tpu.memory_space<vmem>>, vector<2x32xf32>
    tpu.vector_store %arg11[%c8, %c32_29], %174 {strides = array<i32>} : memref<16x64xf32, #tpu.memory_space<vmem>>, vector<2x32xf32>,
    %177 = tpu.concatenate %158, %174 in 1 : vector<2x32xf32>, vector<2x32xf32> -> vector<2x64xf32>
    %cst_30 = arith.constant dense<0.000000e+00> : vector<2x256xf32>
    %178 = tpu.matmul %177, %6, %cst_30 {dimension_numbers = #tpu.dot_dimension_numbers<[1], [0], [0], [1], [0, 0, 1, 1], [], []>} : vector<2x64xf32>, vector<64x256xf32>, vector<2x256xf32> -> vector<2x256xf32>
    %179 = vector.extract_strided_slice %5 {offsets = [8, 0], sizes = [2, 128], strides = [1, 1]} : vector<16x256xf32> to vector<2x128xf32>
    %180 = vector.extract_strided_slice %178 {offsets = [0, 0], sizes = [2, 128], strides = [1, 1]} : vector<2x256xf32> to vector<2x128xf32>
    %181 = arith.addf %179, %180 : vector<2x128xf32>
    %182 = vector.extract_strided_slice %5 {offsets = [6, 128], sizes = [2, 128], strides = [1, 1]} : vector<16x256xf32> to vector<2x128xf32>
    %183 = vector.extract_strided_slice %178 {offsets = [0, 128], sizes = [2, 128], strides = [1, 1]} : vector<2x256xf32> to vector<2x128xf32>
    %184 = arith.addf %182, %183 : vector<2x128xf32>
    %185 = vector.extract_strided_slice %181 {offsets = [0, 0], sizes = [2, 96], strides = [1, 1]} : vector<2x128xf32> to vector<2x96xf32>
    %186 = arith.negf %185 : vector<2x96xf32>
    %187 = math.exp %186 : vector<2x96xf32>
    %cst_31 = arith.constant 1.000000e+00 : f32
    %188 = vector.broadcast %cst_31 : f32 to vector<2x96xf32>
    %189 = arith.addf %188, %187 : vector<2x96xf32>
    %190 = arith.divf %188, %189 : vector<2x96xf32>
    %191 = vector.extract_strided_slice %181 {offsets = [0, 96], sizes = [2, 32], strides = [1, 1]} : vector<2x128xf32> to vector<2x32xf32>
    %192 = math.tanh %191 : vector<2x32xf32>
    %193 = vector.extract_strided_slice %190 {offsets = [0, 0], sizes = [2, 32], strides = [1, 1]} : vector<2x96xf32> to vector<2x32xf32>
    %194 = vector.extract_strided_slice %190 {offsets = [0, 32], sizes = [2, 32], strides = [1, 1]} : vector<2x96xf32> to vector<2x32xf32>
    %195 = vector.extract_strided_slice %190 {offsets = [0, 64], sizes = [2, 32], strides = [1, 1]} : vector<2x96xf32> to vector<2x32xf32>
    %196 = arith.mulf %194, %156 : vector<2x32xf32>
    %197 = arith.mulf %193, %192 : vector<2x32xf32>
    %198 = arith.addf %196, %197 : vector<2x32xf32>
    %199 = math.tanh %198 : vector<2x32xf32>
    %200 = arith.mulf %195, %199 : vector<2x32xf32>
    %201 = vector.extract_strided_slice %184 {offsets = [0, 0], sizes = [2, 96], strides = [1, 1]} : vector<2x128xf32> to vector<2x96xf32>
    %202 = arith.negf %201 : vector<2x96xf32>
    %203 = math.exp %202 : vector<2x96xf32>
    %cst_32 = arith.constant 1.000000e+00 : f32
    %204 = vector.broadcast %cst_32 : f32 to vector<2x96xf32>
    %205 = arith.addf %204, %203 : vector<2x96xf32>
    %206 = arith.divf %204, %205 : vector<2x96xf32>
    %207 = vector.extract_strided_slice %184 {offsets = [0, 96], sizes = [2, 32], strides = [1, 1]} : vector<2x128xf32> to vector<2x32xf32>
    %208 = math.tanh %207 : vector<2x32xf32>
    %209 = vector.extract_strided_slice %206 {offsets = [0, 0], sizes = [2, 32], strides = [1, 1]} : vector<2x96xf32> to vector<2x32xf32>
    %210 = vector.extract_strided_slice %206 {offsets = [0, 32], sizes = [2, 32], strides = [1, 1]} : vector<2x96xf32> to vector<2x32xf32>
    %211 = vector.extract_strided_slice %206 {offsets = [0, 64], sizes = [2, 32], strides = [1, 1]} : vector<2x96xf32> to vector<2x32xf32>
    %212 = arith.mulf %210, %172 : vector<2x32xf32>
    %213 = arith.mulf %209, %208 : vector<2x32xf32>
    %214 = arith.addf %212, %213 : vector<2x32xf32>
    %215 = math.tanh %214 : vector<2x32xf32>
    %216 = arith.mulf %211, %215 : vector<2x32xf32>
    %c8_33 = arith.constant 8 : index
    %c0_34 = arith.constant 0 : index
    %217 = vector.load %arg11[%c8_33, %c0_34] : memref<16x64xf32, #tpu.memory_space<vmem>>, vector<2x32xf32>
    tpu.vector_store %arg11[%c8_33, %c0_34], %200 {strides = array<i32>} : memref<16x64xf32, #tpu.memory_space<vmem>>, vector<2x32xf32>,
    %c6_35 = arith.constant 6 : index
    %c32_36 = arith.constant 32 : index
    %218 = vector.load %arg11[%c6_35, %c32_36] : memref<16x64xf32, #tpu.memory_space<vmem>>, vector<2x32xf32>
    tpu.vector_store %arg11[%c6_35, %c32_36], %216 {strides = array<i32>} : memref<16x64xf32, #tpu.memory_space<vmem>>, vector<2x32xf32>,
    %219 = tpu.concatenate %200, %216 in 1 : vector<2x32xf32>, vector<2x32xf32> -> vector<2x64xf32>
    %cst_37 = arith.constant dense<0.000000e+00> : vector<2x256xf32>
    %220 = tpu.matmul %219, %6, %cst_37 {dimension_numbers = #tpu.dot_dimension_numbers<[1], [0], [0], [1], [0, 0, 1, 1], [], []>} : vector<2x64xf32>, vector<64x256xf32>, vector<2x256xf32> -> vector<2x256xf32>
    %221 = vector.extract_strided_slice %5 {offsets = [10, 0], sizes = [2, 128], strides = [1, 1]} : vector<16x256xf32> to vector<2x128xf32>
    %222 = vector.extract_strided_slice %220 {offsets = [0, 0], sizes = [2, 128], strides = [1, 1]} : vector<2x256xf32> to vector<2x128xf32>
    %223 = arith.addf %221, %222 : vector<2x128xf32>
    %224 = vector.extract_strided_slice %5 {offsets = [4, 128], sizes = [2, 128], strides = [1, 1]} : vector<16x256xf32> to vector<2x128xf32>
    %225 = vector.extract_strided_slice %220 {offsets = [0, 128], sizes = [2, 128], strides = [1, 1]} : vector<2x256xf32> to vector<2x128xf32>
    %226 = arith.addf %224, %225 : vector<2x128xf32>
    %227 = vector.extract_strided_slice %223 {offsets = [0, 0], sizes = [2, 96], strides = [1, 1]} : vector<2x128xf32> to vector<2x96xf32>
    %228 = arith.negf %227 : vector<2x96xf32>
    %229 = math.exp %228 : vector<2x96xf32>
    %cst_38 = arith.constant 1.000000e+00 : f32
    %230 = vector.broadcast %cst_38 : f32 to vector<2x96xf32>
    %231 = arith.addf %230, %229 : vector<2x96xf32>
    %232 = arith.divf %230, %231 : vector<2x96xf32>
    %233 = vector.extract_strided_slice %223 {offsets = [0, 96], sizes = [2, 32], strides = [1, 1]} : vector<2x128xf32> to vector<2x32xf32>
    %234 = math.tanh %233 : vector<2x32xf32>
    %235 = vector.extract_strided_slice %232 {offsets = [0, 0], sizes = [2, 32], strides = [1, 1]} : vector<2x96xf32> to vector<2x32xf32>
    %236 = vector.extract_strided_slice %232 {offsets = [0, 32], sizes = [2, 32], strides = [1, 1]} : vector<2x96xf32> to vector<2x32xf32>
    %237 = vector.extract_strided_slice %232 {offsets = [0, 64], sizes = [2, 32], strides = [1, 1]} : vector<2x96xf32> to vector<2x32xf32>
    %238 = arith.mulf %236, %198 : vector<2x32xf32>
    %239 = arith.mulf %235, %234 : vector<2x32xf32>
    %240 = arith.addf %238, %239 : vector<2x32xf32>
    %241 = math.tanh %240 : vector<2x32xf32>
    %242 = arith.mulf %237, %241 : vector<2x32xf32>
    %243 = vector.extract_strided_slice %226 {offsets = [0, 0], sizes = [2, 96], strides = [1, 1]} : vector<2x128xf32> to vector<2x96xf32>
    %244 = arith.negf %243 : vector<2x96xf32>
    %245 = math.exp %244 : vector<2x96xf32>
    %cst_39 = arith.constant 1.000000e+00 : f32
    %246 = vector.broadcast %cst_39 : f32 to vector<2x96xf32>
    %247 = arith.addf %246, %245 : vector<2x96xf32>
    %248 = arith.divf %246, %247 : vector<2x96xf32>
    %249 = vector.extract_strided_slice %226 {offsets = [0, 96], sizes = [2, 32], strides = [1, 1]} : vector<2x128xf32> to vector<2x32xf32>
    %250 = math.tanh %249 : vector<2x32xf32>
    %251 = vector.extract_strided_slice %248 {offsets = [0, 0], sizes = [2, 32], strides = [1, 1]} : vector<2x96xf32> to vector<2x32xf32>
    %252 = vector.extract_strided_slice %248 {offsets = [0, 32], sizes = [2, 32], strides = [1, 1]} : vector<2x96xf32> to vector<2x32xf32>
    %253 = vector.extract_strided_slice %248 {offsets = [0, 64], sizes = [2, 32], strides = [1, 1]} : vector<2x96xf32> to vector<2x32xf32>
    %254 = arith.mulf %252, %214 : vector<2x32xf32>
    %255 = arith.mulf %251, %250 : vector<2x32xf32>
    %256 = arith.addf %254, %255 : vector<2x32xf32>
    %257 = math.tanh %256 : vector<2x32xf32>
    %258 = arith.mulf %253, %257 : vector<2x32xf32>
    %c10_40 = arith.constant 10 : index
    %c0_41 = arith.constant 0 : index
    %259 = vector.load %arg11[%c10_40, %c0_41] : memref<16x64xf32, #tpu.memory_space<vmem>>, vector<2x32xf32>
    tpu.vector_store %arg11[%c10_40, %c0_41], %242 {strides = array<i32>} : memref<16x64xf32, #tpu.memory_space<vmem>>, vector<2x32xf32>,
    %c4_42 = arith.constant 4 : index
    %c32_43 = arith.constant 32 : index
    %260 = vector.load %arg11[%c4_42, %c32_43] : memref<16x64xf32, #tpu.memory_space<vmem>>, vector<2x32xf32>
    tpu.vector_store %arg11[%c4_42, %c32_43], %258 {strides = array<i32>} : memref<16x64xf32, #tpu.memory_space<vmem>>, vector<2x32xf32>,
    %261 = tpu.concatenate %242, %258 in 1 : vector<2x32xf32>, vector<2x32xf32> -> vector<2x64xf32>
    %cst_44 = arith.constant dense<0.000000e+00> : vector<2x256xf32>
    %262 = tpu.matmul %261, %6, %cst_44 {dimension_numbers = #tpu.dot_dimension_numbers<[1], [0], [0], [1], [0, 0, 1, 1], [], []>} : vector<2x64xf32>, vector<64x256xf32>, vector<2x256xf32> -> vector<2x256xf32>
    %263 = vector.extract_strided_slice %5 {offsets = [12, 0], sizes = [2, 128], strides = [1, 1]} : vector<16x256xf32> to vector<2x128xf32>
    %264 = vector.extract_strided_slice %262 {offsets = [0, 0], sizes = [2, 128], strides = [1, 1]} : vector<2x256xf32> to vector<2x128xf32>
    %265 = arith.addf %263, %264 : vector<2x128xf32>
    %266 = vector.extract_strided_slice %5 {offsets = [2, 128], sizes = [2, 128], strides = [1, 1]} : vector<16x256xf32> to vector<2x128xf32>
    %267 = vector.extract_strided_slice %262 {offsets = [0, 128], sizes = [2, 128], strides = [1, 1]} : vector<2x256xf32> to vector<2x128xf32>
    %268 = arith.addf %266, %267 : vector<2x128xf32>
    %269 = vector.extract_strided_slice %265 {offsets = [0, 0], sizes = [2, 96], strides = [1, 1]} : vector<2x128xf32> to vector<2x96xf32>
    %270 = arith.negf %269 : vector<2x96xf32>
    %271 = math.exp %270 : vector<2x96xf32>
    %cst_45 = arith.constant 1.000000e+00 : f32
    %272 = vector.broadcast %cst_45 : f32 to vector<2x96xf32>
    %273 = arith.addf %272, %271 : vector<2x96xf32>
    %274 = arith.divf %272, %273 : vector<2x96xf32>
    %275 = vector.extract_strided_slice %265 {offsets = [0, 96], sizes = [2, 32], strides = [1, 1]} : vector<2x128xf32> to vector<2x32xf32>
    %276 = math.tanh %275 : vector<2x32xf32>
    %277 = vector.extract_strided_slice %274 {offsets = [0, 0], sizes = [2, 32], strides = [1, 1]} : vector<2x96xf32> to vector<2x32xf32>
    %278 = vector.extract_strided_slice %274 {offsets = [0, 32], sizes = [2, 32], strides = [1, 1]} : vector<2x96xf32> to vector<2x32xf32>
    %279 = vector.extract_strided_slice %274 {offsets = [0, 64], sizes = [2, 32], strides = [1, 1]} : vector<2x96xf32> to vector<2x32xf32>
    %280 = arith.mulf %278, %240 : vector<2x32xf32>
    %281 = arith.mulf %277, %276 : vector<2x32xf32>
    %282 = arith.addf %280, %281 : vector<2x32xf32>
    %283 = math.tanh %282 : vector<2x32xf32>
    %284 = arith.mulf %279, %283 : vector<2x32xf32>
    %285 = vector.extract_strided_slice %268 {offsets = [0, 0], sizes = [2, 96], strides = [1, 1]} : vector<2x128xf32> to vector<2x96xf32>
    %286 = arith.negf %285 : vector<2x96xf32>
    %287 = math.exp %286 : vector<2x96xf32>
    %cst_46 = arith.constant 1.000000e+00 : f32
    %288 = vector.broadcast %cst_46 : f32 to vector<2x96xf32>
    %289 = arith.addf %288, %287 : vector<2x96xf32>
    %290 = arith.divf %288, %289 : vector<2x96xf32>
    %291 = vector.extract_strided_slice %268 {offsets = [0, 96], sizes = [2, 32], strides = [1, 1]} : vector<2x128xf32> to vector<2x32xf32>
    %292 = math.tanh %291 : vector<2x32xf32>
    %293 = vector.extract_strided_slice %290 {offsets = [0, 0], sizes = [2, 32], strides = [1, 1]} : vector<2x96xf32> to vector<2x32xf32>
    %294 = vector.extract_strided_slice %290 {offsets = [0, 32], sizes = [2, 32], strides = [1, 1]} : vector<2x96xf32> to vector<2x32xf32>
    %295 = vector.extract_strided_slice %290 {offsets = [0, 64], sizes = [2, 32], strides = [1, 1]} : vector<2x96xf32> to vector<2x32xf32>
    %296 = arith.mulf %294, %256 : vector<2x32xf32>
    %297 = arith.mulf %293, %292 : vector<2x32xf32>
    %298 = arith.addf %296, %297 : vector<2x32xf32>
    %299 = math.tanh %298 : vector<2x32xf32>
    %300 = arith.mulf %295, %299 : vector<2x32xf32>
    %c12_47 = arith.constant 12 : index
    %c0_48 = arith.constant 0 : index
    %301 = vector.load %arg11[%c12_47, %c0_48] : memref<16x64xf32, #tpu.memory_space<vmem>>, vector<2x32xf32>
    tpu.vector_store %arg11[%c12_47, %c0_48], %284 {strides = array<i32>} : memref<16x64xf32, #tpu.memory_space<vmem>>, vector<2x32xf32>,
    %c2_49 = arith.constant 2 : index
    %c32_50 = arith.constant 32 : index
    %302 = vector.load %arg11[%c2_49, %c32_50] : memref<16x64xf32, #tpu.memory_space<vmem>>, vector<2x32xf32>
    tpu.vector_store %arg11[%c2_49, %c32_50], %300 {strides = array<i32>} : memref<16x64xf32, #tpu.memory_space<vmem>>, vector<2x32xf32>,
    %303 = tpu.concatenate %284, %300 in 1 : vector<2x32xf32>, vector<2x32xf32> -> vector<2x64xf32>
    %cst_51 = arith.constant dense<0.000000e+00> : vector<2x256xf32>
    %304 = tpu.matmul %303, %6, %cst_51 {dimension_numbers = #tpu.dot_dimension_numbers<[1], [0], [0], [1], [0, 0, 1, 1], [], []>} : vector<2x64xf32>, vector<64x256xf32>, vector<2x256xf32> -> vector<2x256xf32>
    %305 = vector.extract_strided_slice %5 {offsets = [14, 0], sizes = [2, 128], strides = [1, 1]} : vector<16x256xf32> to vector<2x128xf32>
    %306 = vector.extract_strided_slice %304 {offsets = [0, 0], sizes = [2, 128], strides = [1, 1]} : vector<2x256xf32> to vector<2x128xf32>
    %307 = arith.addf %305, %306 : vector<2x128xf32>
    %308 = vector.extract_strided_slice %5 {offsets = [0, 128], sizes = [2, 128], strides = [1, 1]} : vector<16x256xf32> to vector<2x128xf32>
    %309 = vector.extract_strided_slice %304 {offsets = [0, 128], sizes = [2, 128], strides = [1, 1]} : vector<2x256xf32> to vector<2x128xf32>
    %310 = arith.addf %308, %309 : vector<2x128xf32>
    %311 = vector.extract_strided_slice %307 {offsets = [0, 0], sizes = [2, 96], strides = [1, 1]} : vector<2x128xf32> to vector<2x96xf32>
    %312 = arith.negf %311 : vector<2x96xf32>
    %313 = math.exp %312 : vector<2x96xf32>
    %cst_52 = arith.constant 1.000000e+00 : f32
    %314 = vector.broadcast %cst_52 : f32 to vector<2x96xf32>
    %315 = arith.addf %314, %313 : vector<2x96xf32>
    %316 = arith.divf %314, %315 : vector<2x96xf32>
    %317 = vector.extract_strided_slice %307 {offsets = [0, 96], sizes = [2, 32], strides = [1, 1]} : vector<2x128xf32> to vector<2x32xf32>
    %318 = math.tanh %317 : vector<2x32xf32>
    %319 = vector.extract_strided_slice %316 {offsets = [0, 0], sizes = [2, 32], strides = [1, 1]} : vector<2x96xf32> to vector<2x32xf32>
    %320 = vector.extract_strided_slice %316 {offsets = [0, 32], sizes = [2, 32], strides = [1, 1]} : vector<2x96xf32> to vector<2x32xf32>
    %321 = vector.extract_strided_slice %316 {offsets = [0, 64], sizes = [2, 32], strides = [1, 1]} : vector<2x96xf32> to vector<2x32xf32>
    %322 = arith.mulf %320, %282 : vector<2x32xf32>
    %323 = arith.mulf %319, %318 : vector<2x32xf32>
    %324 = arith.addf %322, %323 : vector<2x32xf32>
    %325 = math.tanh %324 : vector<2x32xf32>
    %326 = arith.mulf %321, %325 : vector<2x32xf32>
    %327 = vector.extract_strided_slice %310 {offsets = [0, 0], sizes = [2, 96], strides = [1, 1]} : vector<2x128xf32> to vector<2x96xf32>
    %328 = arith.negf %327 : vector<2x96xf32>
    %329 = math.exp %328 : vector<2x96xf32>
    %cst_53 = arith.constant 1.000000e+00 : f32
    %330 = vector.broadcast %cst_53 : f32 to vector<2x96xf32>
    %331 = arith.addf %330, %329 : vector<2x96xf32>
    %332 = arith.divf %330, %331 : vector<2x96xf32>
    %333 = vector.extract_strided_slice %310 {offsets = [0, 96], sizes = [2, 32], strides = [1, 1]} : vector<2x128xf32> to vector<2x32xf32>
    %334 = math.tanh %333 : vector<2x32xf32>
    %335 = vector.extract_strided_slice %332 {offsets = [0, 0], sizes = [2, 32], strides = [1, 1]} : vector<2x96xf32> to vector<2x32xf32>
    %336 = vector.extract_strided_slice %332 {offsets = [0, 32], sizes = [2, 32], strides = [1, 1]} : vector<2x96xf32> to vector<2x32xf32>
    %337 = vector.extract_strided_slice %332 {offsets = [0, 64], sizes = [2, 32], strides = [1, 1]} : vector<2x96xf32> to vector<2x32xf32>
    %338 = arith.mulf %336, %298 : vector<2x32xf32>
    %339 = arith.mulf %335, %334 : vector<2x32xf32>
    %340 = arith.addf %338, %339 : vector<2x32xf32>
    %341 = math.tanh %340 : vector<2x32xf32>
    %342 = arith.mulf %337, %341 : vector<2x32xf32>
    %c14_54 = arith.constant 14 : index
    %c0_55 = arith.constant 0 : index
    %343 = vector.load %arg11[%c14_54, %c0_55] : memref<16x64xf32, #tpu.memory_space<vmem>>, vector<2x32xf32>
    tpu.vector_store %arg11[%c14_54, %c0_55], %326 {strides = array<i32>} : memref<16x64xf32, #tpu.memory_space<vmem>>, vector<2x32xf32>,
    %c0_56 = arith.constant 0 : index
    %c32_57 = arith.constant 32 : index
    %344 = vector.load %arg11[%c0_56, %c32_57] : memref<16x64xf32, #tpu.memory_space<vmem>>, vector<2x32xf32>
    tpu.vector_store %arg11[%c0_56, %c32_57], %342 {strides = array<i32>} : memref<16x64xf32, #tpu.memory_space<vmem>>, vector<2x32xf32>,
    %c0_58 = arith.constant 0 : index
    %c0_59 = arith.constant 0 : index
    %345 = vector.load %arg11[%c0_58, %c0_59] : memref<16x64xf32, #tpu.memory_space<vmem>>, vector<16x64xf32>
    %c0_60 = arith.constant 0 : index
    %c0_61 = arith.constant 0 : index
    %346 = vector.load %arg5[%c0_60, %c0_61] : memref<64x256xf32, #tpu.memory_space<vmem>>, vector<64x256xf32>
    %cst_62 = arith.constant dense<0.000000e+00> : vector<16x256xf32>
    %347 = tpu.matmul %345, %346, %cst_62 {dimension_numbers = #tpu.dot_dimension_numbers<[1], [0], [0], [1], [0, 0, 1, 1], [], []>} : vector<16x64xf32>, vector<64x256xf32>, vector<16x256xf32> -> vector<16x256xf32>
    %c0_63 = arith.constant 0 : index
    %c0_64 = arith.constant 0 : index
    %348 = vector.load %arg7[%c0_63, %c0_64] : memref<1x256xf32, #tpu.memory_space<vmem>>, vector<1x256xf32>
    %349 = vector.broadcast %348 : vector<1x256xf32> to vector<16x256xf32>
    %350 = arith.addf %347, %349 : vector<16x256xf32>
    %c0_65 = arith.constant 0 : index
    %c0_66 = arith.constant 0 : index
    %351 = vector.load %arg6[%c0_65, %c0_66] : memref<64x256xf32, #tpu.memory_space<vmem>>, vector<64x256xf32>
    %cst_67 = arith.constant 0.000000e+00 : f32
    %352 = vector.broadcast %cst_67 : f32 to vector<2x64xf32>
    %cst_68 = arith.constant 0.000000e+00 : f32
    %353 = vector.broadcast %cst_68 : f32 to vector<2x32xf32>
    %cst_69 = arith.constant 0.000000e+00 : f32
    %354 = vector.broadcast %cst_69 : f32 to vector<2x32xf32>
    %cst_70 = arith.constant dense<0.000000e+00> : vector<2x256xf32>
    %355 = tpu.matmul %352, %351, %cst_70 {dimension_numbers = #tpu.dot_dimension_numbers<[1], [0], [0], [1], [0, 0, 1, 1], [], []>} : vector<2x64xf32>, vector<64x256xf32>, vector<2x256xf32> -> vector<2x256xf32>
    %356 = vector.extract_strided_slice %350 {offsets = [0, 0], sizes = [2, 128], strides = [1, 1]} : vector<16x256xf32> to vector<2x128xf32>
    %357 = vector.extract_strided_slice %355 {offsets = [0, 0], sizes = [2, 128], strides = [1, 1]} : vector<2x256xf32> to vector<2x128xf32>
    %358 = arith.addf %356, %357 : vector<2x128xf32>
    %359 = vector.extract_strided_slice %350 {offsets = [14, 128], sizes = [2, 128], strides = [1, 1]} : vector<16x256xf32> to vector<2x128xf32>
    %360 = vector.extract_strided_slice %355 {offsets = [0, 128], sizes = [2, 128], strides = [1, 1]} : vector<2x256xf32> to vector<2x128xf32>
    %361 = arith.addf %359, %360 : vector<2x128xf32>
    %362 = vector.extract_strided_slice %358 {offsets = [0, 0], sizes = [2, 96], strides = [1, 1]} : vector<2x128xf32> to vector<2x96xf32>
    %363 = arith.negf %362 : vector<2x96xf32>
    %364 = math.exp %363 : vector<2x96xf32>
    %cst_71 = arith.constant 1.000000e+00 : f32
    %365 = vector.broadcast %cst_71 : f32 to vector<2x96xf32>
    %366 = arith.addf %365, %364 : vector<2x96xf32>
    %367 = arith.divf %365, %366 : vector<2x96xf32>
    %368 = vector.extract_strided_slice %358 {offsets = [0, 96], sizes = [2, 32], strides = [1, 1]} : vector<2x128xf32> to vector<2x32xf32>
    %369 = math.tanh %368 : vector<2x32xf32>
    %370 = vector.extract_strided_slice %367 {offsets = [0, 0], sizes = [2, 32], strides = [1, 1]} : vector<2x96xf32> to vector<2x32xf32>
    %371 = vector.extract_strided_slice %367 {offsets = [0, 32], sizes = [2, 32], strides = [1, 1]} : vector<2x96xf32> to vector<2x32xf32>
    %372 = vector.extract_strided_slice %367 {offsets = [0, 64], sizes = [2, 32], strides = [1, 1]} : vector<2x96xf32> to vector<2x32xf32>
    %373 = arith.mulf %371, %353 : vector<2x32xf32>
    %374 = arith.mulf %370, %369 : vector<2x32xf32>
    %375 = arith.addf %373, %374 : vector<2x32xf32>
    %376 = math.tanh %375 : vector<2x32xf32>
    %377 = arith.mulf %372, %376 : vector<2x32xf32>
    %378 = vector.extract_strided_slice %361 {offsets = [0, 0], sizes = [2, 96], strides = [1, 1]} : vector<2x128xf32> to vector<2x96xf32>
    %379 = arith.negf %378 : vector<2x96xf32>
    %380 = math.exp %379 : vector<2x96xf32>
    %cst_72 = arith.constant 1.000000e+00 : f32
    %381 = vector.broadcast %cst_72 : f32 to vector<2x96xf32>
    %382 = arith.addf %381, %380 : vector<2x96xf32>
    %383 = arith.divf %381, %382 : vector<2x96xf32>
    %384 = vector.extract_strided_slice %361 {offsets = [0, 96], sizes = [2, 32], strides = [1, 1]} : vector<2x128xf32> to vector<2x32xf32>
    %385 = math.tanh %384 : vector<2x32xf32>
    %386 = vector.extract_strided_slice %383 {offsets = [0, 0], sizes = [2, 32], strides = [1, 1]} : vector<2x96xf32> to vector<2x32xf32>
    %387 = vector.extract_strided_slice %383 {offsets = [0, 32], sizes = [2, 32], strides = [1, 1]} : vector<2x96xf32> to vector<2x32xf32>
    %388 = vector.extract_strided_slice %383 {offsets = [0, 64], sizes = [2, 32], strides = [1, 1]} : vector<2x96xf32> to vector<2x32xf32>
    %389 = arith.mulf %387, %354 : vector<2x32xf32>
    %390 = arith.mulf %386, %385 : vector<2x32xf32>
    %391 = arith.addf %389, %390 : vector<2x32xf32>
    %392 = math.tanh %391 : vector<2x32xf32>
    %393 = arith.mulf %388, %392 : vector<2x32xf32>
    %c0_73 = arith.constant 0 : index
    %c0_74 = arith.constant 0 : index
    %394 = vector.load %arg11[%c0_73, %c0_74] : memref<16x64xf32, #tpu.memory_space<vmem>>, vector<2x32xf32>
    tpu.vector_store %arg11[%c0_73, %c0_74], %377 {strides = array<i32>} : memref<16x64xf32, #tpu.memory_space<vmem>>, vector<2x32xf32>,
    %c14_75 = arith.constant 14 : index
    %c32_76 = arith.constant 32 : index
    %395 = vector.load %arg11[%c14_75, %c32_76] : memref<16x64xf32, #tpu.memory_space<vmem>>, vector<2x32xf32>
    tpu.vector_store %arg11[%c14_75, %c32_76], %393 {strides = array<i32>} : memref<16x64xf32, #tpu.memory_space<vmem>>, vector<2x32xf32>,
    %396 = tpu.concatenate %377, %393 in 1 : vector<2x32xf32>, vector<2x32xf32> -> vector<2x64xf32>
    %cst_77 = arith.constant dense<0.000000e+00> : vector<2x256xf32>
    %397 = tpu.matmul %396, %351, %cst_77 {dimension_numbers = #tpu.dot_dimension_numbers<[1], [0], [0], [1], [0, 0, 1, 1], [], []>} : vector<2x64xf32>, vector<64x256xf32>, vector<2x256xf32> -> vector<2x256xf32>
    %398 = vector.extract_strided_slice %350 {offsets = [2, 0], sizes = [2, 128], strides = [1, 1]} : vector<16x256xf32> to vector<2x128xf32>
    %399 = vector.extract_strided_slice %397 {offsets = [0, 0], sizes = [2, 128], strides = [1, 1]} : vector<2x256xf32> to vector<2x128xf32>
    %400 = arith.addf %398, %399 : vector<2x128xf32>
    %401 = vector.extract_strided_slice %350 {offsets = [12, 128], sizes = [2, 128], strides = [1, 1]} : vector<16x256xf32> to vector<2x128xf32>
    %402 = vector.extract_strided_slice %397 {offsets = [0, 128], sizes = [2, 128], strides = [1, 1]} : vector<2x256xf32> to vector<2x128xf32>
    %403 = arith.addf %401, %402 : vector<2x128xf32>
    %404 = vector.extract_strided_slice %400 {offsets = [0, 0], sizes = [2, 96], strides = [1, 1]} : vector<2x128xf32> to vector<2x96xf32>
    %405 = arith.negf %404 : vector<2x96xf32>
    %406 = math.exp %405 : vector<2x96xf32>
    %cst_78 = arith.constant 1.000000e+00 : f32
    %407 = vector.broadcast %cst_78 : f32 to vector<2x96xf32>
    %408 = arith.addf %407, %406 : vector<2x96xf32>
    %409 = arith.divf %407, %408 : vector<2x96xf32>
    %410 = vector.extract_strided_slice %400 {offsets = [0, 96], sizes = [2, 32], strides = [1, 1]} : vector<2x128xf32> to vector<2x32xf32>
    %411 = math.tanh %410 : vector<2x32xf32>
    %412 = vector.extract_strided_slice %409 {offsets = [0, 0], sizes = [2, 32], strides = [1, 1]} : vector<2x96xf32> to vector<2x32xf32>
    %413 = vector.extract_strided_slice %409 {offsets = [0, 32], sizes = [2, 32], strides = [1, 1]} : vector<2x96xf32> to vector<2x32xf32>
    %414 = vector.extract_strided_slice %409 {offsets = [0, 64], sizes = [2, 32], strides = [1, 1]} : vector<2x96xf32> to vector<2x32xf32>
    %415 = arith.mulf %413, %375 : vector<2x32xf32>
    %416 = arith.mulf %412, %411 : vector<2x32xf32>
    %417 = arith.addf %415, %416 : vector<2x32xf32>
    %418 = math.tanh %417 : vector<2x32xf32>
    %419 = arith.mulf %414, %418 : vector<2x32xf32>
    %420 = vector.extract_strided_slice %403 {offsets = [0, 0], sizes = [2, 96], strides = [1, 1]} : vector<2x128xf32> to vector<2x96xf32>
    %421 = arith.negf %420 : vector<2x96xf32>
    %422 = math.exp %421 : vector<2x96xf32>
    %cst_79 = arith.constant 1.000000e+00 : f32
    %423 = vector.broadcast %cst_79 : f32 to vector<2x96xf32>
    %424 = arith.addf %423, %422 : vector<2x96xf32>
    %425 = arith.divf %423, %424 : vector<2x96xf32>
    %426 = vector.extract_strided_slice %403 {offsets = [0, 96], sizes = [2, 32], strides = [1, 1]} : vector<2x128xf32> to vector<2x32xf32>
    %427 = math.tanh %426 : vector<2x32xf32>
    %428 = vector.extract_strided_slice %425 {offsets = [0, 0], sizes = [2, 32], strides = [1, 1]} : vector<2x96xf32> to vector<2x32xf32>
    %429 = vector.extract_strided_slice %425 {offsets = [0, 32], sizes = [2, 32], strides = [1, 1]} : vector<2x96xf32> to vector<2x32xf32>
    %430 = vector.extract_strided_slice %425 {offsets = [0, 64], sizes = [2, 32], strides = [1, 1]} : vector<2x96xf32> to vector<2x32xf32>
    %431 = arith.mulf %429, %391 : vector<2x32xf32>
    %432 = arith.mulf %428, %427 : vector<2x32xf32>
    %433 = arith.addf %431, %432 : vector<2x32xf32>
    %434 = math.tanh %433 : vector<2x32xf32>
    %435 = arith.mulf %430, %434 : vector<2x32xf32>
    %c2_80 = arith.constant 2 : index
    %c0_81 = arith.constant 0 : index
    %436 = vector.load %arg11[%c2_80, %c0_81] : memref<16x64xf32, #tpu.memory_space<vmem>>, vector<2x32xf32>
    tpu.vector_store %arg11[%c2_80, %c0_81], %419 {strides = array<i32>} : memref<16x64xf32, #tpu.memory_space<vmem>>, vector<2x32xf32>,
    %c12_82 = arith.constant 12 : index
    %c32_83 = arith.constant 32 : index
    %437 = vector.load %arg11[%c12_82, %c32_83] : memref<16x64xf32, #tpu.memory_space<vmem>>, vector<2x32xf32>
    tpu.vector_store %arg11[%c12_82, %c32_83], %435 {strides = array<i32>} : memref<16x64xf32, #tpu.memory_space<vmem>>, vector<2x32xf32>,
    %438 = tpu.concatenate %419, %435 in 1 : vector<2x32xf32>, vector<2x32xf32> -> vector<2x64xf32>
    %cst_84 = arith.constant dense<0.000000e+00> : vector<2x256xf32>
    %439 = tpu.matmul %438, %351, %cst_84 {dimension_numbers = #tpu.dot_dimension_numbers<[1], [0], [0], [1], [0, 0, 1, 1], [], []>} : vector<2x64xf32>, vector<64x256xf32>, vector<2x256xf32> -> vector<2x256xf32>
    %440 = vector.extract_strided_slice %350 {offsets = [4, 0], sizes = [2, 128], strides = [1, 1]} : vector<16x256xf32> to vector<2x128xf32>
    %441 = vector.extract_strided_slice %439 {offsets = [0, 0], sizes = [2, 128], strides = [1, 1]} : vector<2x256xf32> to vector<2x128xf32>
    %442 = arith.addf %440, %441 : vector<2x128xf32>
    %443 = vector.extract_strided_slice %350 {offsets = [10, 128], sizes = [2, 128], strides = [1, 1]} : vector<16x256xf32> to vector<2x128xf32>
    %444 = vector.extract_strided_slice %439 {offsets = [0, 128], sizes = [2, 128], strides = [1, 1]} : vector<2x256xf32> to vector<2x128xf32>
    %445 = arith.addf %443, %444 : vector<2x128xf32>
    %446 = vector.extract_strided_slice %442 {offsets = [0, 0], sizes = [2, 96], strides = [1, 1]} : vector<2x128xf32> to vector<2x96xf32>
    %447 = arith.negf %446 : vector<2x96xf32>
    %448 = math.exp %447 : vector<2x96xf32>
    %cst_85 = arith.constant 1.000000e+00 : f32
    %449 = vector.broadcast %cst_85 : f32 to vector<2x96xf32>
    %450 = arith.addf %449, %448 : vector<2x96xf32>
    %451 = arith.divf %449, %450 : vector<2x96xf32>
    %452 = vector.extract_strided_slice %442 {offsets = [0, 96], sizes = [2, 32], strides = [1, 1]} : vector<2x128xf32> to vector<2x32xf32>
    %453 = math.tanh %452 : vector<2x32xf32>
    %454 = vector.extract_strided_slice %451 {offsets = [0, 0], sizes = [2, 32], strides = [1, 1]} : vector<2x96xf32> to vector<2x32xf32>
    %455 = vector.extract_strided_slice %451 {offsets = [0, 32], sizes = [2, 32], strides = [1, 1]} : vector<2x96xf32> to vector<2x32xf32>
    %456 = vector.extract_strided_slice %451 {offsets = [0, 64], sizes = [2, 32], strides = [1, 1]} : vector<2x96xf32> to vector<2x32xf32>
    %457 = arith.mulf %455, %417 : vector<2x32xf32>
    %458 = arith.mulf %454, %453 : vector<2x32xf32>
    %459 = arith.addf %457, %458 : vector<2x32xf32>
    %460 = math.tanh %459 : vector<2x32xf32>
    %461 = arith.mulf %456, %460 : vector<2x32xf32>
    %462 = vector.extract_strided_slice %445 {offsets = [0, 0], sizes = [2, 96], strides = [1, 1]} : vector<2x128xf32> to vector<2x96xf32>
    %463 = arith.negf %462 : vector<2x96xf32>
    %464 = math.exp %463 : vector<2x96xf32>
    %cst_86 = arith.constant 1.000000e+00 : f32
    %465 = vector.broadcast %cst_86 : f32 to vector<2x96xf32>
    %466 = arith.addf %465, %464 : vector<2x96xf32>
    %467 = arith.divf %465, %466 : vector<2x96xf32>
    %468 = vector.extract_strided_slice %445 {offsets = [0, 96], sizes = [2, 32], strides = [1, 1]} : vector<2x128xf32> to vector<2x32xf32>
    %469 = math.tanh %468 : vector<2x32xf32>
    %470 = vector.extract_strided_slice %467 {offsets = [0, 0], sizes = [2, 32], strides = [1, 1]} : vector<2x96xf32> to vector<2x32xf32>
    %471 = vector.extract_strided_slice %467 {offsets = [0, 32], sizes = [2, 32], strides = [1, 1]} : vector<2x96xf32> to vector<2x32xf32>
    %472 = vector.extract_strided_slice %467 {offsets = [0, 64], sizes = [2, 32], strides = [1, 1]} : vector<2x96xf32> to vector<2x32xf32>
    %473 = arith.mulf %471, %433 : vector<2x32xf32>
    %474 = arith.mulf %470, %469 : vector<2x32xf32>
    %475 = arith.addf %473, %474 : vector<2x32xf32>
    %476 = math.tanh %475 : vector<2x32xf32>
    %477 = arith.mulf %472, %476 : vector<2x32xf32>
    %c4_87 = arith.constant 4 : index
    %c0_88 = arith.constant 0 : index
    %478 = vector.load %arg11[%c4_87, %c0_88] : memref<16x64xf32, #tpu.memory_space<vmem>>, vector<2x32xf32>
    tpu.vector_store %arg11[%c4_87, %c0_88], %461 {strides = array<i32>} : memref<16x64xf32, #tpu.memory_space<vmem>>, vector<2x32xf32>,
    %c10_89 = arith.constant 10 : index
    %c32_90 = arith.constant 32 : index
    %479 = vector.load %arg11[%c10_89, %c32_90] : memref<16x64xf32, #tpu.memory_space<vmem>>, vector<2x32xf32>
    tpu.vector_store %arg11[%c10_89, %c32_90], %477 {strides = array<i32>} : memref<16x64xf32, #tpu.memory_space<vmem>>, vector<2x32xf32>,
    %480 = tpu.concatenate %461, %477 in 1 : vector<2x32xf32>, vector<2x32xf32> -> vector<2x64xf32>
    %cst_91 = arith.constant dense<0.000000e+00> : vector<2x256xf32>
    %481 = tpu.matmul %480, %351, %cst_91 {dimension_numbers = #tpu.dot_dimension_numbers<[1], [0], [0], [1], [0, 0, 1, 1], [], []>} : vector<2x64xf32>, vector<64x256xf32>, vector<2x256xf32> -> vector<2x256xf32>
    %482 = vector.extract_strided_slice %350 {offsets = [6, 0], sizes = [2, 128], strides = [1, 1]} : vector<16x256xf32> to vector<2x128xf32>
    %483 = vector.extract_strided_slice %481 {offsets = [0, 0], sizes = [2, 128], strides = [1, 1]} : vector<2x256xf32> to vector<2x128xf32>
    %484 = arith.addf %482, %483 : vector<2x128xf32>
    %485 = vector.extract_strided_slice %350 {offsets = [8, 128], sizes = [2, 128], strides = [1, 1]} : vector<16x256xf32> to vector<2x128xf32>
    %486 = vector.extract_strided_slice %481 {offsets = [0, 128], sizes = [2, 128], strides = [1, 1]} : vector<2x256xf32> to vector<2x128xf32>
    %487 = arith.addf %485, %486 : vector<2x128xf32>
    %488 = vector.extract_strided_slice %484 {offsets = [0, 0], sizes = [2, 96], strides = [1, 1]} : vector<2x128xf32> to vector<2x96xf32>
    %489 = arith.negf %488 : vector<2x96xf32>
    %490 = math.exp %489 : vector<2x96xf32>
    %cst_92 = arith.constant 1.000000e+00 : f32
    %491 = vector.broadcast %cst_92 : f32 to vector<2x96xf32>
    %492 = arith.addf %491, %490 : vector<2x96xf32>
    %493 = arith.divf %491, %492 : vector<2x96xf32>
    %494 = vector.extract_strided_slice %484 {offsets = [0, 96], sizes = [2, 32], strides = [1, 1]} : vector<2x128xf32> to vector<2x32xf32>
    %495 = math.tanh %494 : vector<2x32xf32>
    %496 = vector.extract_strided_slice %493 {offsets = [0, 0], sizes = [2, 32], strides = [1, 1]} : vector<2x96xf32> to vector<2x32xf32>
    %497 = vector.extract_strided_slice %493 {offsets = [0, 32], sizes = [2, 32], strides = [1, 1]} : vector<2x96xf32> to vector<2x32xf32>
    %498 = vector.extract_strided_slice %493 {offsets = [0, 64], sizes = [2, 32], strides = [1, 1]} : vector<2x96xf32> to vector<2x32xf32>
    %499 = arith.mulf %497, %459 : vector<2x32xf32>
    %500 = arith.mulf %496, %495 : vector<2x32xf32>
    %501 = arith.addf %499, %500 : vector<2x32xf32>
    %502 = math.tanh %501 : vector<2x32xf32>
    %503 = arith.mulf %498, %502 : vector<2x32xf32>
    %504 = vector.extract_strided_slice %487 {offsets = [0, 0], sizes = [2, 96], strides = [1, 1]} : vector<2x128xf32> to vector<2x96xf32>
    %505 = arith.negf %504 : vector<2x96xf32>
    %506 = math.exp %505 : vector<2x96xf32>
    %cst_93 = arith.constant 1.000000e+00 : f32
    %507 = vector.broadcast %cst_93 : f32 to vector<2x96xf32>
    %508 = arith.addf %507, %506 : vector<2x96xf32>
    %509 = arith.divf %507, %508 : vector<2x96xf32>
    %510 = vector.extract_strided_slice %487 {offsets = [0, 96], sizes = [2, 32], strides = [1, 1]} : vector<2x128xf32> to vector<2x32xf32>
    %511 = math.tanh %510 : vector<2x32xf32>
    %512 = vector.extract_strided_slice %509 {offsets = [0, 0], sizes = [2, 32], strides = [1, 1]} : vector<2x96xf32> to vector<2x32xf32>
    %513 = vector.extract_strided_slice %509 {offsets = [0, 32], sizes = [2, 32], strides = [1, 1]} : vector<2x96xf32> to vector<2x32xf32>
    %514 = vector.extract_strided_slice %509 {offsets = [0, 64], sizes = [2, 32], strides = [1, 1]} : vector<2x96xf32> to vector<2x32xf32>
    %515 = arith.mulf %513, %475 : vector<2x32xf32>
    %516 = arith.mulf %512, %511 : vector<2x32xf32>
    %517 = arith.addf %515, %516 : vector<2x32xf32>
    %518 = math.tanh %517 : vector<2x32xf32>
    %519 = arith.mulf %514, %518 : vector<2x32xf32>
    %c6_94 = arith.constant 6 : index
    %c0_95 = arith.constant 0 : index
    %520 = vector.load %arg11[%c6_94, %c0_95] : memref<16x64xf32, #tpu.memory_space<vmem>>, vector<2x32xf32>
    tpu.vector_store %arg11[%c6_94, %c0_95], %503 {strides = array<i32>} : memref<16x64xf32, #tpu.memory_space<vmem>>, vector<2x32xf32>,
    %c8_96 = arith.constant 8 : index
    %c32_97 = arith.constant 32 : index
    %521 = vector.load %arg11[%c8_96, %c32_97] : memref<16x64xf32, #tpu.memory_space<vmem>>, vector<2x32xf32>
    tpu.vector_store %arg11[%c8_96, %c32_97], %519 {strides = array<i32>} : memref<16x64xf32, #tpu.memory_space<vmem>>, vector<2x32xf32>,
    %522 = tpu.concatenate %503, %519 in 1 : vector<2x32xf32>, vector<2x32xf32> -> vector<2x64xf32>
    %cst_98 = arith.constant dense<0.000000e+00> : vector<2x256xf32>
    %523 = tpu.matmul %522, %351, %cst_98 {dimension_numbers = #tpu.dot_dimension_numbers<[1], [0], [0], [1], [0, 0, 1, 1], [], []>} : vector<2x64xf32>, vector<64x256xf32>, vector<2x256xf32> -> vector<2x256xf32>
    %524 = vector.extract_strided_slice %350 {offsets = [8, 0], sizes = [2, 128], strides = [1, 1]} : vector<16x256xf32> to vector<2x128xf32>
    %525 = vector.extract_strided_slice %523 {offsets = [0, 0], sizes = [2, 128], strides = [1, 1]} : vector<2x256xf32> to vector<2x128xf32>
    %526 = arith.addf %524, %525 : vector<2x128xf32>
    %527 = vector.extract_strided_slice %350 {offsets = [6, 128], sizes = [2, 128], strides = [1, 1]} : vector<16x256xf32> to vector<2x128xf32>
    %528 = vector.extract_strided_slice %523 {offsets = [0, 128], sizes = [2, 128], strides = [1, 1]} : vector<2x256xf32> to vector<2x128xf32>
    %529 = arith.addf %527, %528 : vector<2x128xf32>
    %530 = vector.extract_strided_slice %526 {offsets = [0, 0], sizes = [2, 96], strides = [1, 1]} : vector<2x128xf32> to vector<2x96xf32>
    %531 = arith.negf %530 : vector<2x96xf32>
    %532 = math.exp %531 : vector<2x96xf32>
    %cst_99 = arith.constant 1.000000e+00 : f32
    %533 = vector.broadcast %cst_99 : f32 to vector<2x96xf32>
    %534 = arith.addf %533, %532 : vector<2x96xf32>
    %535 = arith.divf %533, %534 : vector<2x96xf32>
    %536 = vector.extract_strided_slice %526 {offsets = [0, 96], sizes = [2, 32], strides = [1, 1]} : vector<2x128xf32> to vector<2x32xf32>
    %537 = math.tanh %536 : vector<2x32xf32>
    %538 = vector.extract_strided_slice %535 {offsets = [0, 0], sizes = [2, 32], strides = [1, 1]} : vector<2x96xf32> to vector<2x32xf32>
    %539 = vector.extract_strided_slice %535 {offsets = [0, 32], sizes = [2, 32], strides = [1, 1]} : vector<2x96xf32> to vector<2x32xf32>
    %540 = vector.extract_strided_slice %535 {offsets = [0, 64], sizes = [2, 32], strides = [1, 1]} : vector<2x96xf32> to vector<2x32xf32>
    %541 = arith.mulf %539, %501 : vector<2x32xf32>
    %542 = arith.mulf %538, %537 : vector<2x32xf32>
    %543 = arith.addf %541, %542 : vector<2x32xf32>
    %544 = math.tanh %543 : vector<2x32xf32>
    %545 = arith.mulf %540, %544 : vector<2x32xf32>
    %546 = vector.extract_strided_slice %529 {offsets = [0, 0], sizes = [2, 96], strides = [1, 1]} : vector<2x128xf32> to vector<2x96xf32>
    %547 = arith.negf %546 : vector<2x96xf32>
    %548 = math.exp %547 : vector<2x96xf32>
    %cst_100 = arith.constant 1.000000e+00 : f32
    %549 = vector.broadcast %cst_100 : f32 to vector<2x96xf32>
    %550 = arith.addf %549, %548 : vector<2x96xf32>
    %551 = arith.divf %549, %550 : vector<2x96xf32>
    %552 = vector.extract_strided_slice %529 {offsets = [0, 96], sizes = [2, 32], strides = [1, 1]} : vector<2x128xf32> to vector<2x32xf32>
    %553 = math.tanh %552 : vector<2x32xf32>
    %554 = vector.extract_strided_slice %551 {offsets = [0, 0], sizes = [2, 32], strides = [1, 1]} : vector<2x96xf32> to vector<2x32xf32>
    %555 = vector.extract_strided_slice %551 {offsets = [0, 32], sizes = [2, 32], strides = [1, 1]} : vector<2x96xf32> to vector<2x32xf32>
    %556 = vector.extract_strided_slice %551 {offsets = [0, 64], sizes = [2, 32], strides = [1, 1]} : vector<2x96xf32> to vector<2x32xf32>
    %557 = arith.mulf %555, %517 : vector<2x32xf32>
    %558 = arith.mulf %554, %553 : vector<2x32xf32>
    %559 = arith.addf %557, %558 : vector<2x32xf32>
    %560 = math.tanh %559 : vector<2x32xf32>
    %561 = arith.mulf %556, %560 : vector<2x32xf32>
    %c8_101 = arith.constant 8 : index
    %c0_102 = arith.constant 0 : index
    %562 = vector.load %arg11[%c8_101, %c0_102] : memref<16x64xf32, #tpu.memory_space<vmem>>, vector<2x32xf32>
    tpu.vector_store %arg11[%c8_101, %c0_102], %545 {strides = array<i32>} : memref<16x64xf32, #tpu.memory_space<vmem>>, vector<2x32xf32>,
    %c6_103 = arith.constant 6 : index
    %c32_104 = arith.constant 32 : index
    %563 = vector.load %arg11[%c6_103, %c32_104] : memref<16x64xf32, #tpu.memory_space<vmem>>, vector<2x32xf32>
    tpu.vector_store %arg11[%c6_103, %c32_104], %561 {strides = array<i32>} : memref<16x64xf32, #tpu.memory_space<vmem>>, vector<2x32xf32>,
    %564 = tpu.concatenate %545, %561 in 1 : vector<2x32xf32>, vector<2x32xf32> -> vector<2x64xf32>
    %cst_105 = arith.constant dense<0.000000e+00> : vector<2x256xf32>
    %565 = tpu.matmul %564, %351, %cst_105 {dimension_numbers = #tpu.dot_dimension_numbers<[1], [0], [0], [1], [0, 0, 1, 1], [], []>} : vector<2x64xf32>, vector<64x256xf32>, vector<2x256xf32> -> vector<2x256xf32>
    %566 = vector.extract_strided_slice %350 {offsets = [10, 0], sizes = [2, 128], strides = [1, 1]} : vector<16x256xf32> to vector<2x128xf32>
    %567 = vector.extract_strided_slice %565 {offsets = [0, 0], sizes = [2, 128], strides = [1, 1]} : vector<2x256xf32> to vector<2x128xf32>
    %568 = arith.addf %566, %567 : vector<2x128xf32>
    %569 = vector.extract_strided_slice %350 {offsets = [4, 128], sizes = [2, 128], strides = [1, 1]} : vector<16x256xf32> to vector<2x128xf32>
    %570 = vector.extract_strided_slice %565 {offsets = [0, 128], sizes = [2, 128], strides = [1, 1]} : vector<2x256xf32> to vector<2x128xf32>
    %571 = arith.addf %569, %570 : vector<2x128xf32>
    %572 = vector.extract_strided_slice %568 {offsets = [0, 0], sizes = [2, 96], strides = [1, 1]} : vector<2x128xf32> to vector<2x96xf32>
    %573 = arith.negf %572 : vector<2x96xf32>
    %574 = math.exp %573 : vector<2x96xf32>
    %cst_106 = arith.constant 1.000000e+00 : f32
    %575 = vector.broadcast %cst_106 : f32 to vector<2x96xf32>
    %576 = arith.addf %575, %574 : vector<2x96xf32>
    %577 = arith.divf %575, %576 : vector<2x96xf32>
    %578 = vector.extract_strided_slice %568 {offsets = [0, 96], sizes = [2, 32], strides = [1, 1]} : vector<2x128xf32> to vector<2x32xf32>
    %579 = math.tanh %578 : vector<2x32xf32>
    %580 = vector.extract_strided_slice %577 {offsets = [0, 0], sizes = [2, 32], strides = [1, 1]} : vector<2x96xf32> to vector<2x32xf32>
    %581 = vector.extract_strided_slice %577 {offsets = [0, 32], sizes = [2, 32], strides = [1, 1]} : vector<2x96xf32> to vector<2x32xf32>
    %582 = vector.extract_strided_slice %577 {offsets = [0, 64], sizes = [2, 32], strides = [1, 1]} : vector<2x96xf32> to vector<2x32xf32>
    %583 = arith.mulf %581, %543 : vector<2x32xf32>
    %584 = arith.mulf %580, %579 : vector<2x32xf32>
    %585 = arith.addf %583, %584 : vector<2x32xf32>
    %586 = math.tanh %585 : vector<2x32xf32>
    %587 = arith.mulf %582, %586 : vector<2x32xf32>
    %588 = vector.extract_strided_slice %571 {offsets = [0, 0], sizes = [2, 96], strides = [1, 1]} : vector<2x128xf32> to vector<2x96xf32>
    %589 = arith.negf %588 : vector<2x96xf32>
    %590 = math.exp %589 : vector<2x96xf32>
    %cst_107 = arith.constant 1.000000e+00 : f32
    %591 = vector.broadcast %cst_107 : f32 to vector<2x96xf32>
    %592 = arith.addf %591, %590 : vector<2x96xf32>
    %593 = arith.divf %591, %592 : vector<2x96xf32>
    %594 = vector.extract_strided_slice %571 {offsets = [0, 96], sizes = [2, 32], strides = [1, 1]} : vector<2x128xf32> to vector<2x32xf32>
    %595 = math.tanh %594 : vector<2x32xf32>
    %596 = vector.extract_strided_slice %593 {offsets = [0, 0], sizes = [2, 32], strides = [1, 1]} : vector<2x96xf32> to vector<2x32xf32>
    %597 = vector.extract_strided_slice %593 {offsets = [0, 32], sizes = [2, 32], strides = [1, 1]} : vector<2x96xf32> to vector<2x32xf32>
    %598 = vector.extract_strided_slice %593 {offsets = [0, 64], sizes = [2, 32], strides = [1, 1]} : vector<2x96xf32> to vector<2x32xf32>
    %599 = arith.mulf %597, %559 : vector<2x32xf32>
    %600 = arith.mulf %596, %595 : vector<2x32xf32>
    %601 = arith.addf %599, %600 : vector<2x32xf32>
    %602 = math.tanh %601 : vector<2x32xf32>
    %603 = arith.mulf %598, %602 : vector<2x32xf32>
    %c10_108 = arith.constant 10 : index
    %c0_109 = arith.constant 0 : index
    %604 = vector.load %arg11[%c10_108, %c0_109] : memref<16x64xf32, #tpu.memory_space<vmem>>, vector<2x32xf32>
    tpu.vector_store %arg11[%c10_108, %c0_109], %587 {strides = array<i32>} : memref<16x64xf32, #tpu.memory_space<vmem>>, vector<2x32xf32>,
    %c4_110 = arith.constant 4 : index
    %c32_111 = arith.constant 32 : index
    %605 = vector.load %arg11[%c4_110, %c32_111] : memref<16x64xf32, #tpu.memory_space<vmem>>, vector<2x32xf32>
    tpu.vector_store %arg11[%c4_110, %c32_111], %603 {strides = array<i32>} : memref<16x64xf32, #tpu.memory_space<vmem>>, vector<2x32xf32>,
    %606 = tpu.concatenate %587, %603 in 1 : vector<2x32xf32>, vector<2x32xf32> -> vector<2x64xf32>
    %cst_112 = arith.constant dense<0.000000e+00> : vector<2x256xf32>
    %607 = tpu.matmul %606, %351, %cst_112 {dimension_numbers = #tpu.dot_dimension_numbers<[1], [0], [0], [1], [0, 0, 1, 1], [], []>} : vector<2x64xf32>, vector<64x256xf32>, vector<2x256xf32> -> vector<2x256xf32>
    %608 = vector.extract_strided_slice %350 {offsets = [12, 0], sizes = [2, 128], strides = [1, 1]} : vector<16x256xf32> to vector<2x128xf32>
    %609 = vector.extract_strided_slice %607 {offsets = [0, 0], sizes = [2, 128], strides = [1, 1]} : vector<2x256xf32> to vector<2x128xf32>
    %610 = arith.addf %608, %609 : vector<2x128xf32>
    %611 = vector.extract_strided_slice %350 {offsets = [2, 128], sizes = [2, 128], strides = [1, 1]} : vector<16x256xf32> to vector<2x128xf32>
    %612 = vector.extract_strided_slice %607 {offsets = [0, 128], sizes = [2, 128], strides = [1, 1]} : vector<2x256xf32> to vector<2x128xf32>
    %613 = arith.addf %611, %612 : vector<2x128xf32>
    %614 = vector.extract_strided_slice %610 {offsets = [0, 0], sizes = [2, 96], strides = [1, 1]} : vector<2x128xf32> to vector<2x96xf32>
    %615 = arith.negf %614 : vector<2x96xf32>
    %616 = math.exp %615 : vector<2x96xf32>
    %cst_113 = arith.constant 1.000000e+00 : f32
    %617 = vector.broadcast %cst_113 : f32 to vector<2x96xf32>
    %618 = arith.addf %617, %616 : vector<2x96xf32>
    %619 = arith.divf %617, %618 : vector<2x96xf32>
    %620 = vector.extract_strided_slice %610 {offsets = [0, 96], sizes = [2, 32], strides = [1, 1]} : vector<2x128xf32> to vector<2x32xf32>
    %621 = math.tanh %620 : vector<2x32xf32>
    %622 = vector.extract_strided_slice %619 {offsets = [0, 0], sizes = [2, 32], strides = [1, 1]} : vector<2x96xf32> to vector<2x32xf32>
    %623 = vector.extract_strided_slice %619 {offsets = [0, 32], sizes = [2, 32], strides = [1, 1]} : vector<2x96xf32> to vector<2x32xf32>
    %624 = vector.extract_strided_slice %619 {offsets = [0, 64], sizes = [2, 32], strides = [1, 1]} : vector<2x96xf32> to vector<2x32xf32>
    %625 = arith.mulf %623, %585 : vector<2x32xf32>
    %626 = arith.mulf %622, %621 : vector<2x32xf32>
    %627 = arith.addf %625, %626 : vector<2x32xf32>
    %628 = math.tanh %627 : vector<2x32xf32>
    %629 = arith.mulf %624, %628 : vector<2x32xf32>
    %630 = vector.extract_strided_slice %613 {offsets = [0, 0], sizes = [2, 96], strides = [1, 1]} : vector<2x128xf32> to vector<2x96xf32>
    %631 = arith.negf %630 : vector<2x96xf32>
    %632 = math.exp %631 : vector<2x96xf32>
    %cst_114 = arith.constant 1.000000e+00 : f32
    %633 = vector.broadcast %cst_114 : f32 to vector<2x96xf32>
    %634 = arith.addf %633, %632 : vector<2x96xf32>
    %635 = arith.divf %633, %634 : vector<2x96xf32>
    %636 = vector.extract_strided_slice %613 {offsets = [0, 96], sizes = [2, 32], strides = [1, 1]} : vector<2x128xf32> to vector<2x32xf32>
    %637 = math.tanh %636 : vector<2x32xf32>
    %638 = vector.extract_strided_slice %635 {offsets = [0, 0], sizes = [2, 32], strides = [1, 1]} : vector<2x96xf32> to vector<2x32xf32>
    %639 = vector.extract_strided_slice %635 {offsets = [0, 32], sizes = [2, 32], strides = [1, 1]} : vector<2x96xf32> to vector<2x32xf32>
    %640 = vector.extract_strided_slice %635 {offsets = [0, 64], sizes = [2, 32], strides = [1, 1]} : vector<2x96xf32> to vector<2x32xf32>
    %641 = arith.mulf %639, %601 : vector<2x32xf32>
    %642 = arith.mulf %638, %637 : vector<2x32xf32>
    %643 = arith.addf %641, %642 : vector<2x32xf32>
    %644 = math.tanh %643 : vector<2x32xf32>
    %645 = arith.mulf %640, %644 : vector<2x32xf32>
    %c12_115 = arith.constant 12 : index
    %c0_116 = arith.constant 0 : index
    %646 = vector.load %arg11[%c12_115, %c0_116] : memref<16x64xf32, #tpu.memory_space<vmem>>, vector<2x32xf32>
    tpu.vector_store %arg11[%c12_115, %c0_116], %629 {strides = array<i32>} : memref<16x64xf32, #tpu.memory_space<vmem>>, vector<2x32xf32>,
    %c2_117 = arith.constant 2 : index
    %c32_118 = arith.constant 32 : index
    %647 = vector.load %arg11[%c2_117, %c32_118] : memref<16x64xf32, #tpu.memory_space<vmem>>, vector<2x32xf32>
    tpu.vector_store %arg11[%c2_117, %c32_118], %645 {strides = array<i32>} : memref<16x64xf32, #tpu.memory_space<vmem>>, vector<2x32xf32>,
    %648 = tpu.concatenate %629, %645 in 1 : vector<2x32xf32>, vector<2x32xf32> -> vector<2x64xf32>
    %cst_119 = arith.constant dense<0.000000e+00> : vector<2x256xf32>
    %649 = tpu.matmul %648, %351, %cst_119 {dimension_numbers = #tpu.dot_dimension_numbers<[1], [0], [0], [1], [0, 0, 1, 1], [], []>} : vector<2x64xf32>, vector<64x256xf32>, vector<2x256xf32> -> vector<2x256xf32>
    %650 = vector.extract_strided_slice %350 {offsets = [14, 0], sizes = [2, 128], strides = [1, 1]} : vector<16x256xf32> to vector<2x128xf32>
    %651 = vector.extract_strided_slice %649 {offsets = [0, 0], sizes = [2, 128], strides = [1, 1]} : vector<2x256xf32> to vector<2x128xf32>
    %652 = arith.addf %650, %651 : vector<2x128xf32>
    %653 = vector.extract_strided_slice %350 {offsets = [0, 128], sizes = [2, 128], strides = [1, 1]} : vector<16x256xf32> to vector<2x128xf32>
    %654 = vector.extract_strided_slice %649 {offsets = [0, 128], sizes = [2, 128], strides = [1, 1]} : vector<2x256xf32> to vector<2x128xf32>
    %655 = arith.addf %653, %654 : vector<2x128xf32>
    %656 = vector.extract_strided_slice %652 {offsets = [0, 0], sizes = [2, 96], strides = [1, 1]} : vector<2x128xf32> to vector<2x96xf32>
    %657 = arith.negf %656 : vector<2x96xf32>
    %658 = math.exp %657 : vector<2x96xf32>
    %cst_120 = arith.constant 1.000000e+00 : f32
    %659 = vector.broadcast %cst_120 : f32 to vector<2x96xf32>
    %660 = arith.addf %659, %658 : vector<2x96xf32>
    %661 = arith.divf %659, %660 : vector<2x96xf32>
    %662 = vector.extract_strided_slice %652 {offsets = [0, 96], sizes = [2, 32], strides = [1, 1]} : vector<2x128xf32> to vector<2x32xf32>
    %663 = math.tanh %662 : vector<2x32xf32>
    %664 = vector.extract_strided_slice %661 {offsets = [0, 0], sizes = [2, 32], strides = [1, 1]} : vector<2x96xf32> to vector<2x32xf32>
    %665 = vector.extract_strided_slice %661 {offsets = [0, 32], sizes = [2, 32], strides = [1, 1]} : vector<2x96xf32> to vector<2x32xf32>
    %666 = vector.extract_strided_slice %661 {offsets = [0, 64], sizes = [2, 32], strides = [1, 1]} : vector<2x96xf32> to vector<2x32xf32>
    %667 = arith.mulf %665, %627 : vector<2x32xf32>
    %668 = arith.mulf %664, %663 : vector<2x32xf32>
    %669 = arith.addf %667, %668 : vector<2x32xf32>
    %670 = math.tanh %669 : vector<2x32xf32>
    %671 = arith.mulf %666, %670 : vector<2x32xf32>
    %672 = vector.extract_strided_slice %655 {offsets = [0, 0], sizes = [2, 96], strides = [1, 1]} : vector<2x128xf32> to vector<2x96xf32>
    %673 = arith.negf %672 : vector<2x96xf32>
    %674 = math.exp %673 : vector<2x96xf32>
    %cst_121 = arith.constant 1.000000e+00 : f32
    %675 = vector.broadcast %cst_121 : f32 to vector<2x96xf32>
    %676 = arith.addf %675, %674 : vector<2x96xf32>
    %677 = arith.divf %675, %676 : vector<2x96xf32>
    %678 = vector.extract_strided_slice %655 {offsets = [0, 96], sizes = [2, 32], strides = [1, 1]} : vector<2x128xf32> to vector<2x32xf32>
    %679 = math.tanh %678 : vector<2x32xf32>
    %680 = vector.extract_strided_slice %677 {offsets = [0, 0], sizes = [2, 32], strides = [1, 1]} : vector<2x96xf32> to vector<2x32xf32>
    %681 = vector.extract_strided_slice %677 {offsets = [0, 32], sizes = [2, 32], strides = [1, 1]} : vector<2x96xf32> to vector<2x32xf32>
    %682 = vector.extract_strided_slice %677 {offsets = [0, 64], sizes = [2, 32], strides = [1, 1]} : vector<2x96xf32> to vector<2x32xf32>
    %683 = arith.mulf %681, %643 : vector<2x32xf32>
    %684 = arith.mulf %680, %679 : vector<2x32xf32>
    %685 = arith.addf %683, %684 : vector<2x32xf32>
    %686 = math.tanh %685 : vector<2x32xf32>
    %687 = arith.mulf %682, %686 : vector<2x32xf32>
    %c14_122 = arith.constant 14 : index
    %c0_123 = arith.constant 0 : index
    %688 = vector.load %arg11[%c14_122, %c0_123] : memref<16x64xf32, #tpu.memory_space<vmem>>, vector<2x32xf32>
    tpu.vector_store %arg11[%c14_122, %c0_123], %671 {strides = array<i32>} : memref<16x64xf32, #tpu.memory_space<vmem>>, vector<2x32xf32>,
    %c0_124 = arith.constant 0 : index
    %c32_125 = arith.constant 32 : index
    %689 = vector.load %arg11[%c0_124, %c32_125] : memref<16x64xf32, #tpu.memory_space<vmem>>, vector<2x32xf32>
    tpu.vector_store %arg11[%c0_124, %c32_125], %687 {strides = array<i32>} : memref<16x64xf32, #tpu.memory_space<vmem>>, vector<2x32xf32>,
    %c0_126 = arith.constant 0 : index
    %690 = memref.load %arg0[%c0_126] : memref<2xi32, #tpu.memory_space<smem>>
    %c1_i32 = arith.constant 1 : i32
    %691 = arith.subi %690, %c1_i32 : i32
    %c2_i32 = arith.constant 2 : i32
    %692 = arith.muli %691, %c2_i32 : i32
    %c0_i32 = arith.constant 0 : i32
    %693 = arith.addi %692, %c0_i32 : i32
    %694 = arith.index_cast %693 : i32 to index
    %c0_127 = arith.constant 0 : index
    %695 = vector.load %arg11[%694, %c0_127] : memref<16x64xf32, #tpu.memory_space<vmem>>, vector<1x64xf32>
    %c1 = arith.constant 1 : index
    %696 = memref.load %arg0[%c1] : memref<2xi32, #tpu.memory_space<smem>>
    %c1_i32_128 = arith.constant 1 : i32
    %697 = arith.subi %696, %c1_i32_128 : i32
    %c2_i32_129 = arith.constant 2 : i32
    %698 = arith.muli %697, %c2_i32_129 : i32
    %c1_i32_130 = arith.constant 1 : i32
    %699 = arith.addi %698, %c1_i32_130 : i32
    %700 = arith.index_cast %699 : i32 to index
    %c0_131 = arith.constant 0 : index
    %701 = vector.load %arg11[%700, %c0_131] : memref<16x64xf32, #tpu.memory_space<vmem>>, vector<1x64xf32>
    %702 = tpu.concatenate %695, %701 in 0 : vector<1x64xf32>, vector<1x64xf32> -> vector<2x64xf32>
    %c0_132 = arith.constant 0 : index
    %c0_133 = arith.constant 0 : index
    %703 = vector.load %arg8[%c0_132, %c0_133] : memref<64x4xf32, #tpu.memory_space<vmem>>, vector<64x4xf32>
    %cst_134 = arith.constant dense<0.000000e+00> : vector<2x4xf32>
    %704 = tpu.matmul %702, %703, %cst_134 {dimension_numbers = #tpu.dot_dimension_numbers<[1], [0], [0], [1], [0, 0, 1, 1], [], []>} : vector<2x64xf32>, vector<64x4xf32>, vector<2x4xf32> -> vector<2x4xf32>
    %c0_135 = arith.constant 0 : index
    %c0_136 = arith.constant 0 : index
    %705 = vector.load %arg9[%c0_135, %c0_136] : memref<1x4xf32, #tpu.memory_space<vmem>>, vector<1x4xf32>
    %706 = vector.broadcast %705 : vector<1x4xf32> to vector<2x4xf32>
    %707 = arith.addf %704, %706 : vector<2x4xf32>
    %c0_137 = arith.constant 0 : index
    %c0_138 = arith.constant 0 : index
    %708 = vector.load %arg10[%c0_137, %c0_138] : memref<2x4xf32, #tpu.memory_space<vmem>>, vector<2x4xf32>
    tpu.vector_store %arg10[%c0_137, %c0_138], %707 {strides = array<i32>} : memref<2x4xf32, #tpu.memory_space<vmem>>, vector<2x4xf32>,
    return
  }
}

</mosaic_0001>

<bundles_post_ra>
// kernel: bilstm_forward.1
= control target key start
LH: loop header
LB: loop body
LE: loop exit
PB: predicated region body
PF: predicated region fallthrough
CT: control target
= control target key end

     0   :  { %15 = vsyncpa [#allocation6], 0  ;;  %s4351_s0 = inlined_call_operand.vmem [shape: s32[2], index: 0, kind: input, shape index: {}]   ;;  %s4352_s1 = inlined_call_operand.vmem [shape: f32[16,16], index: 1, kind: input, shape index: {}]   ;;  %s4353_s2 = inlined_call_operand.vmem [shape: f32[16,256], index: 2, kind: input, shape index: {}]   ;;  %s4354_s3 = inlined_call_operand.vmem [shape: f32[64,256], index: 3, kind: input, shape index: {}]   ;;  %s4355_s4 = inlined_call_operand.vmem [shape: f32[1,256], index: 4, kind: input, shape index: {}]   ;;  %s4356_s5 = inlined_call_operand.vmem [shape: f32[64,256], index: 5, kind: input, shape index: {}]   ;;  %s4357_s6 = inlined_call_operand.hbm [shape: f32[64,256], index: 6, kind: input, shape index: {}]   ;;  %s4358_s7 = inlined_call_operand.vmem [shape: f32[1,256], index: 7, kind: input, shape index: {}]   ;;  %s4359_s8 = inlined_call_operand.vmem [shape: f32[64,4], index: 8, kind: input, shape index: {}]   ;;  %s4360_s9 = inlined_call_operand.vmem [shape: f32[1,4], index: 9, kind: input, shape index: {}]   ;;  %s4361_s10 = inlined_call_operand.hbm [shape: f32[2,4], index: 10, kind: output, shape index: {}]  }
   0x1   :  { %16 = vsyncpa [#allocation4], 0 }
   0x2   :  { %17 = vsyncpa [#allocation5], 0  ;;  %s24_s15 = sshll.u32 %s4351_s0, 4  ;;  %s25_s15 = int_to_ptr.vmem [resolvable:$true] %s24_s15 }
   0x3   :  { %s3465_s16 = scalar_lea.vmem %s25_s15, 16  ;;  %p3470_p1 = scmp.lt.s32.totalorder %s25_s15, %s25_s15 }
   0x4   :  { %p3466_p0 = scmp.ne.s32.totalorder %s25_s15, %s3465_s16  ;;  %p3471_p2 = scmp.lt.s32.totalorder %s3465_s16, %s3465_s16 }
   0x6   :  { %p3472_p3 = por %p3471_p2, %p3470_p1 }
   0x8   :  { %p3473_p4 = pnand %p3472_p3, %p3466_p0 }
   0xa   :  { %3476 = shalt.err (!%p3473_p4)
}
   0xb   :  { %s3527_s17 = smov [#allocation3]   ;;  %s3528_s18 = smov [#allocation7]  }
   0xc   :  { %27 = dma.vmem_to_smem %s25_s15, 16, %s3527_s17, [#allocation6]  }
   0xd   :  { %s43_s19 = sshll.u32 %s3528_s18, 4  ;;  %s3477_s22 = scalar_lea.hbm %s4357_s6, 2048  ;;  %s44_s19 = int_to_ptr.vmem [resolvable:$true] %s43_s19 }
   0xe   :  { %p3478_p5 = scmp.ne.s32.totalorder %s4357_s6, %s3477_s22  ;;  %p3481_p6 = scmp.lt.u32.totalorder %s3477_s22, %s4357_s6 }
  0x10   :  { %p3483_p7 = pnand %p3481_p6, %p3478_p5 }
  0x12   :  { %3486 = shalt.err (!%p3483_p7)
}
  0x13   :  { %s3487_s26 = scalar_lea.vmem %s44_s19, 2048  ;;  %p3492_p9 = scmp.lt.s32.totalorder %s44_s19, %s44_s19 }
  0x14   :  { %p3488_p8 = scmp.ne.s32.totalorder %s44_s19, %s3487_s26  ;;  %p3493_p10 = scmp.lt.s32.totalorder %s3487_s26, %s3487_s26 }
  0x16   :  { %p3494_p11 = por %p3493_p10, %p3492_p9 }
  0x18   :  { %p3495_p12 = pnand %p3494_p11, %p3488_p8 }
  0x1a   :  { %3498 = shalt.err (!%p3495_p12)
}
  0x1b   :  { %s3529_s27 = smov 256   ;;  %s3530_s28 = smov 16  }
  0x1c   :  { %49 = dma.hbm_to_vmem [thread:$0]  %s4357_s6, 2048, %s44_s19, [#allocation4], %s3529_s27, %s3529_s27, %s3530_s28  }
  0x1d   :  { %3521 = dma.done.wait [#allocation6], 16  }
  0x1e   :  { %3522 = vsyncadd [#allocation6], 4294967280 }
  0x1f   :  { %3523 = dma.done.wait [#allocation4], 2048  }
  0x20   :  { %3524 = vsyncadd [#allocation4], 4294965248 }
  0x21   :  { %62 = sfence }
  0x22   :  { %v166_v0 = vld [vmem:[%s4354_s3 + $0x8] sm:$0xff]  ;;  %v168_v1 = vld [vmem:[%s4354_s3 + $0x18] sm:$0xff]  ;;  %v165_v2 = vld [vmem:[%s4354_s3] sm:$0xff]  ;;  %v3531_v7 = vmov 0.0   ;;  %vm81_vm0 = vcmask 130048   ;;  %v71_v33 = vlaneseq  ;;  %s3533_s30 = smov 96  }
  0x23   :  { %v3617_v3 = vpack.c.bf16 %v168_v1, %v166_v0  ;;  %v167_v4 = vld [vmem:[%s4354_s3 + $0x10] sm:$0xff]  ;;  %v170_v5 = vld [vmem:[%s4354_s3 + $0x28] sm:$0xff]  ;;  %v172_v6 = vld [vmem:[%s4354_s3 + $0x38] sm:$0xff]  ;;  %152 = vmatprep.mubr.f32.mxu0 %v3531_v7  ;;  %249 = vmatprep.mubr.f32.mxu1 %v3531_v7  ;;  %s3534_s11 = smov 64   ;;  %vm313_vm1 = vcmask 254976   ;;  %vm325_vm2 = vcmask 261120  }
  0x24   :  { %v3630_v8 = vpack.c.bf16 %v167_v4, %v165_v2  ;;  %v3632_v9 = vpack.c.bf16 %v172_v6, %v170_v5  ;;  %v169_v10 = vld [vmem:[%s4354_s3 + $0x20] sm:$0xff]  ;;  %v171_v11 = vld [vmem:[%s4354_s3 + $0x30] sm:$0xff]  ;;  %v66_v12 = vld [vmem:[%s4353_s2 + $0x8] sm:$0xff]  ;;  %v3724_v34 = vshrl.u32 %v71_v33, 7  ;;  %vm181_vm3 = vcmask 523264   ;;  %s3537_s18 = smov [#allocation8]  }
  0x25   :  { %2915 = vmatprep.subr.bf16.mxu1 %v3617_v3  ;;  %v68_v13 = vld [vmem:[%s4353_s2 + $0x18] sm:$0xff]  ;;  %v65_v14 = vld [vmem:[%s4353_s2] sm:$0xff]  ;;  %v67_v15 = vld [vmem:[%s4353_s2 + $0x10] sm:$0xff]  ;;  %v3654_v16 = vpack.c.bf16 %v171_v11, %v169_v10  ;;  %vm467_vm4 = vcmask 257026   ;;  %vm621_vm5 = vcmask 259076   ;;  %vm772_vm6 = vcmask 261126  }
  0x26   :  { %2917 = vmatpush1.bf16.msra.mxu1 %v3630_v8  ;;  %v2910_v17 = vpack.c.bf16 %v68_v13, %v66_v12  ;;  %v2912_v18 = vpack.c.bf16 %v67_v15, %v65_v14  ;;  %v174_v19 = vld [vmem:[%s4354_s3 + $0x48] sm:$0xff]  ;;  %v176_v20 = vld [vmem:[%s4354_s3 + $0x58] sm:$0xff]  ;;  %v173_v22 = vld [vmem:[%s4354_s3 + $0x40] sm:$0xff]  ;;  %v77_v35 = vsub.s32 1, %v3724_v34  ;;  %v73_v38 = vsub.s32 0, %v3724_v34 }
  0x27   :  { %2919 = vmatprep.subr.bf16.mxu1 %v3632_v9  ;;  %v3663_v21 = vpack.c.bf16 %v176_v20, %v174_v19  ;;  %v175_v23 = vld [vmem:[%s4354_s3 + $0x50] sm:$0xff]  ;;  %v178_v24 = vld [vmem:[%s4354_s3 + $0x68] sm:$0xff]  ;;  %v180_v25 = vld [vmem:[%s4354_s3 + $0x78] sm:$0xff]  ;;  %vm319_vm7 = vcmask 523526   ;;  %vm473_vm8 = vcmask 521476   ;;  %vm627_vm9 = vcmask 519426  }
  0x28   :  { %2911 = vmatprep.subr.bf16.mxu0 %v2910_v17  ;;  %v63_v26 = vld [vmem:[%s4352_s1] sm:$0xff]  ;;  %v3681_v27 = vpack.c.bf16 %v175_v23, %v173_v22  ;;  %v3685_v28 = vpack.c.bf16 %v180_v25, %v178_v24  ;;  %v179_v30 = vld [vmem:[%s4354_s3 + $0x70] sm:$0xff]  ;;  %v64_v31 = vld [vmem:[%s4352_s1 + $0x8] sm:$0xff]  ;;  %vm778_vm10 = vcmask 517376   ;;  %vm3536_vm11 = vmmov 0  }
  0x29   :  { %2913 = vmatpush1.bf16.msra.mxu0 %v2912_v18  ;;  %v177_v29 = vld [vmem:[%s4354_s3 + $0x60] sm:$0xff]  ;;  %vm2711_vm12 = vcmask 1040384   ;;  %vm2801_vm13 = vcmask 25600  }
  0x2a   :  { %2921 = vmatpush1.bf16.msra.mxu1 %v3654_v16  ;;  %2931 = vmatprep.subr.bf16.mxu0 %v3617_v3  ;;  %v3700_v32 = vpack.c.bf16 %v179_v30, %v177_v29  ;;  %v69_v36 = vld [vmem:[%s4355_s4] sm:$0x3]  ;;  %s3532_s4 = smov 32  }
  0x2b   :  { %2923 = vmatprep.subr.bf16.mxu1 %v3663_v21  ;;  %v78_v37 = vrot.slane %v69_v36, %v77_v35  ;;  %v74_v42 = vrot.slane %v69_v36, %v73_v38 }
  0x2c   :  { %2824 = vmatmul.mubr.msk.f32.vlgmr.msra.gmra.mrb[0].mxu0 %vm81_vm0, %v63_v26 }
  0x2d   :  { %158 = vmatprep.mubr.f32.mxu0 %v3531_v7  ;;  %2933 = vmatpush1.bf16.msra.mxu0 %v3630_v8 }
  0x2e   :  { %2925 = vmatpush1.bf16.msra.mxu1 %v3681_v27  ;;  %2935 = vmatprep.subr.bf16.mxu0 %v3632_v9 }
  0x2f   :  { %2927 = vmatprep.subr.bf16.mxu1 %v3685_v28 }
  0x30   :  { %2825 = vmatmul.mubr.msk.f32.gmra.mrb[2].mxu0 %vm81_vm0, %v64_v31 }
  0x31   :  { %2937 = vmatpush1.bf16.msra.mxu0 %v3654_v16  ;;  %394 = vmatprep.mubr.f32.mxu0 %v3531_v7 }
  0x32   :  { %2929 = vmatpush1.bf16.msra.mxu1 %v3700_v32  ;;  %2939 = vmatprep.subr.bf16.mxu0 %v3663_v21 }
  0x33   :  { %2947 = vmatprep.subr.bf16.mxu1 %v3617_v3 }
  0x35   :  { %250 = vmatmul.mubr.f32.vlgmr.msra.gmra.mrb[0].mxu1 %v3531_v7  ;;  %2941 = vmatpush1.bf16.msra.mxu0 %v3681_v27 }
  0x36   :  { %2943 = vmatprep.subr.bf16.mxu0 %v3685_v28  ;;  %2949 = vmatpush1.bf16.msra.mxu1 %v3630_v8 }
  0x37   :  { %2951 = vmatprep.subr.bf16.mxu1 %v3632_v9  ;;  %548 = vmatprep.mubr.f32.mxu1 %v3531_v7 }
  0x39   :  { %2945 = vmatpush1.bf16.msra.mxu0 %v3700_v32 }
  0x3a   :  { %2953 = vmatpush1.bf16.msra.mxu1 %v3654_v16  ;;  %2963 = vmatprep.subr.bf16.mxu0 %v3617_v3 }
  0x3b   :  { %2955 = vmatprep.subr.bf16.mxu1 %v3663_v21 }
  0x3e   :  { %2957 = vmatpush1.bf16.msra.mxu1 %v3681_v27 }
  0x3f   :  { %2959 = vmatprep.subr.bf16.mxu1 %v3685_v28 }
  0x42   :  { %2961 = vmatpush1.bf16.msra.mxu1 %v3700_v32 }
  0x43   :  { %2979 = vmatprep.subr.bf16.mxu1 %v3617_v3 }
  0xff   :  { %v154_v39 = vpop.f32.mrb[0].mxu0 }
 0x100   :  { %v156_v40 = vpop.f32.mrb[1].mxu0  ;;  %v3741_v50 = vadd.f32 %v154_v39, %v74_v42 }
 0x101   :  { %v3733_v41 = vadd.f32 %v156_v40, %v78_v37 }
 0x103   :  { %v160_v43 = vpop.f32.mrb[2].mxu0 }
 0x104   :  { %v3737_v44 = vadd.f32 %v160_v43, %v74_v42  ;;  %v162_v45 = vpop.f32.mrb[3].mxu0 }
 0x105   :  { %v3739_v46 = vadd.f32 %v162_v45, %v78_v37 }
 0x108   :  { %v251_v47 = vpop.f32.mrb[0].mxu1 }
 0x109   :  { %v253_v48 = vpop.f32.mrb[1].mxu1  ;;  %v256_v52 = vadd.f32 %v251_v47, %v3741_v50 }
 0x10a   :  { %v258_v49 = vrot.slane %v253_v48, 2 }
 0x10b   :  { %v2826_v56 = vmul.f32 -1.442695, %v256_v52 }
 0x10c   :  { %v260_v51 = vadd.f32 %v258_v49, %v3739_v46 }
 0x10e   :  { %3209 = vtanh.f32 %v260_v51  ;;  %v2827_v55 = vmul.f32 -1.442695, %v260_v51 }
 0x10f   :  { %3211 = vtanh.f32 %v256_v52 }
 0x110   :  { %3213 = vpow2.f32 %v2827_v55 }
 0x111   :  { %3215 = vpow2.f32 %v2826_v56 }
 0x118   :  { %v3210_v53 = vpop.eup %3209 }
 0x119   :  { %294 = vrot.lane.b32.xlu0 %v3210_v53, %s3532_s4  ;;  %v3212_v54 = vpop.eup %3211 }
 0x11a   :  { %v3214_v57 = vpop.eup %3213 }
 0x11b   :  { %v288_v58 = vadd.f32 1.0, %v3214_v57  ;;  %v3216_v59 = vpop.eup %3215 }
 0x11c   :  { %v264_v60 = vadd.f32 1.0, %v3216_v59 }
 0x11d   :  { %270 = vrot.lane.b32.xlu0 %v3212_v54, %s3532_s4  ;;  %3217 = vrcp.f32 %v288_v58 }
 0x11e   :  { %3219 = vrcp.f32 %v264_v60 }
 0x127   :  { %v3218_v61 = vpop.eup %3217 }
 0x128   :  { %v3220_v0 = vpop.eup %3219  ;;  %v292_v4 = vmul.f32 0.0, %v3218_v61 }
 0x129   :  { %v268_v10 = vmul.f32 0.0, %v3220_v0 }
 0x18b   :  { %v295_v62 = vpop.permute.xlu0 %294 }
 0x18c   :  { %v297_v63 = vmul.f32 %v3218_v61, %v295_v62 }
 0x18e   :  { %299 = vrot.lane.b32.xlu1 %v297_v63, %s3532_s4 }
 0x18f   :  { %v271_v1 = vpop.permute.xlu0 %270 }
 0x190   :  { %v273_v2 = vmul.f32 %v3220_v0, %v271_v1 }
 0x192   :  { %275 = vrot.lane.b32.xlu1 %v273_v2, %s3532_s4 }
 0x200   :  { %v300_v5 = vpop.permute.xlu1 %299 }
 0x201   :  { %v3749_v6 = vadd.f32 %v300_v5, %v292_v4 }
 0x203   :  { %3221 = vtanh.f32 %v3749_v6  ;;  %v444_v56 = vrot.slane %v3749_v6, 2 }
 0x204   :  { %v276_v11 = vpop.permute.xlu1 %275 }
 0x205   :  { %v3752_v12 = vadd.f32 %v276_v11, %v268_v10 }
 0x207   :  { %3223 = vtanh.f32 %v3752_v12  ;;  %v417_v55 = vrot.slane %v3752_v12, 6 }
 0x20d   :  { %v3222_v13 = vpop.eup %3221 }
 0x20e   :  { %305 = vrot.lane.b32.xlu0 %v3222_v13, %s3532_s4 }
 0x211   :  { %v3224_v14 = vpop.eup %3223 }
 0x212   :  { %281 = vrot.lane.b32.xlu1 %v3224_v14, %s3532_s4 }
 0x280   :  { %v306_v15 = vpop.permute.xlu0 %305 }
 0x281   :  { %v3757_v17 = vmul.f32 %v3218_v61, %v306_v15 }
 0x283   :  { %v321_v18 = vrot.slane %v3757_v17, 6 }
 0x284   :  { %v282_v19 = vpop.permute.xlu1 %281 }
 0x285   :  { %v284_v20 = vmul.f32 %v3220_v0, %v282_v19  ;;  %322 = vrot.lane.b32.xlu1 %v321_v18, %s3533_s30 }
 0x287   :  { %310 = vrot.lane.b32.xlu0 %v284_v20, %s3534_s11 }
 0x2f7   :  { %v323_v22 = vpop.permute.xlu1 %322 }
 0x2f9   :  { %v311_v23 = vpop.permute.xlu0 %310 }
 0x2fa   :  { %314 = vst.msk [vmem:[#allocation2] sm:$0x3] %vm313_vm1, %v311_v23  ;;  %v326_v24 = vsel %vm325_vm2, %v311_v23, %v323_v22 }
 0x2fb   :  { %2828 = vmatmul.mubr.msk.f32.vlgmr.msra.gmra.mrb[4].mxu0 %vm181_vm3, %v326_v24 }
 0x2fc   :  { %2965 = vmatpush1.bf16.msra.mxu0 %v3630_v8  ;;  %702 = vmatprep.mubr.f32.mxu0 %v3531_v7 }
 0x2fd   :  { %2967 = vmatprep.subr.bf16.mxu0 %v3632_v9 }
 0x300   :  { %2969 = vmatpush1.bf16.msra.mxu0 %v3654_v16 }
 0x301   :  { %2971 = vmatprep.subr.bf16.mxu0 %v3663_v21 }
 0x304   :  { %2973 = vmatpush1.bf16.msra.mxu0 %v3681_v27 }
 0x305   :  { %2975 = vmatprep.subr.bf16.mxu0 %v3685_v28 }
 0x308   :  { %2977 = vmatpush1.bf16.msra.mxu0 %v3700_v32 }
 0x309   :  { %2995 = vmatprep.subr.bf16.mxu0 %v3617_v3 }
 0x3ce   :  { %v396_v25 = vpop.f32.mrb[4].mxu0 }
 0x3cf   :  { %v402_v26 = vrot.slane %v396_v25, 6  ;;  %v398_v29 = vpop.f32.mrb[5].mxu0 }
 0x3d0   :  { %v406_v30 = vrot.slane %v398_v29, 4 }
 0x3d1   :  { %v404_v31 = vadd.f32 %v402_v26, %v3741_v50 }
 0x3d2   :  { %v408_v33 = vadd.f32 %v406_v30, %v3739_v46 }
 0x3d3   :  { %3225 = vtanh.f32 %v404_v31  ;;  %v2829_v39 = vmul.f32 -1.442695, %v404_v31 }
 0x3d4   :  { %3227 = vtanh.f32 %v408_v33  ;;  %v2830_v40 = vmul.f32 -1.442695, %v408_v33 }
 0x3d5   :  { %3229 = vpow2.f32 %v2829_v39 }
 0x3d6   :  { %3231 = vpow2.f32 %v2830_v40 }
 0x3dd   :  { %v3226_v36 = vpop.eup %3225 }
 0x3de   :  { %v3228_v37 = vpop.eup %3227  ;;  %421 = vrot.lane.b32.xlu1 %v3226_v36, %s3532_s4 }
 0x3df   :  { %448 = vrot.lane.b32.xlu0 %v3228_v37, %s3532_s4  ;;  %v3230_v42 = vpop.eup %3229 }
 0x3e0   :  { %v3232_v43 = vpop.eup %3231  ;;  %v412_v45 = vadd.f32 1.0, %v3230_v42 }
 0x3e1   :  { %v439_v47 = vadd.f32 1.0, %v3232_v43 }
 0x3e2   :  { %3233 = vrcp.f32 %v412_v45 }
 0x3e3   :  { %3235 = vrcp.f32 %v439_v47 }
 0x3ec   :  { %v3234_v48 = vpop.eup %3233 }
 0x3ed   :  { %v3236_v51 = vpop.eup %3235  ;;  %v419_v57 = vmul.f32 %v3234_v48, %v417_v55 }
 0x3ee   :  { %v446_v59 = vmul.f32 %v3236_v51, %v444_v56 }
 0x450   :  { %v422_v49 = vpop.permute.xlu1 %421 }
 0x451   :  { %v424_v52 = vmul.f32 %v3234_v48, %v422_v49  ;;  %v449_v53 = vpop.permute.xlu0 %448 }
 0x452   :  { %v451_v54 = vmul.f32 %v3236_v51, %v449_v53 }
 0x453   :  { %426 = vrot.lane.b32.xlu1 %v424_v52, %s3532_s4 }
 0x454   :  { %453 = vrot.lane.b32.xlu0 %v451_v54, %s3532_s4 }
 0x4c5   :  { %v427_v58 = vpop.permute.xlu1 %426 }
 0x4c6   :  { %v3782_v60 = vadd.f32 %v427_v58, %v419_v57  ;;  %v454_v61 = vpop.permute.xlu0 %453 }
 0x4c7   :  { %v3784_v62 = vadd.f32 %v454_v61, %v446_v59 }
 0x4c8   :  { %3237 = vtanh.f32 %v3782_v60  ;;  %v571_v45 = vrot.slane %v3782_v60, 6 }
 0x4c9   :  { %3239 = vtanh.f32 %v3784_v62  ;;  %v598_v47 = vrot.slane %v3784_v62, 2 }
 0x4d2   :  { %v3238_v63 = vpop.eup %3237 }
 0x4d3   :  { %v3240_v0 = vpop.eup %3239  ;;  %432 = vrot.lane.b32.xlu1 %v3238_v63, %s3532_s4 }
 0x4d4   :  { %459 = vrot.lane.b32.xlu0 %v3240_v0, %s3532_s4 }
 0x545   :  { %v433_v1 = vpop.permute.xlu1 %432 }
 0x546   :  { %v435_v2 = vmul.f32 %v3234_v48, %v433_v1  ;;  %v460_v4 = vpop.permute.xlu0 %459 }
 0x547   :  { %v3790_v5 = vmul.f32 %v3236_v51, %v460_v4 }
 0x548   :  { %464 = vrot.lane.b32.xlu0 %v435_v2, %s3534_s11 }
 0x549   :  { %v475_v6 = vrot.slane %v3790_v5, 2 }
 0x54b   :  { %476 = vrot.lane.b32.xlu1 %v475_v6, %s3533_s30 }
 0x5ba   :  { %v465_v10 = vpop.permute.xlu0 %464 }
 0x5bb   :  { %468 = vst.msk [vmem:[#allocation2] sm:$0xc] %vm467_vm4, %v465_v10 }
 0x5bd   :  { %v477_v11 = vpop.permute.xlu1 %476 }
 0x5be   :  { %v479_v12 = vsel %vm325_vm2, %v465_v10, %v477_v11 }
 0x5bf   :  { %v481_v13 = vrot.slane %v479_v12, 2 }
 0x5c1   :  { %2831 = vmatmul.mubr.msk.f32.vlgmr.msra.gmra.mrb[2].mxu1 %vm181_vm3, %v481_v13 }
 0x5c2   :  { %2981 = vmatpush1.bf16.msra.mxu1 %v3630_v8  ;;  %853 = vmatprep.mubr.f32.mxu1 %v3531_v7 }
 0x5c3   :  { %2983 = vmatprep.subr.bf16.mxu1 %v3632_v9 }
 0x5c6   :  { %2985 = vmatpush1.bf16.msra.mxu1 %v3654_v16 }
 0x5c7   :  { %2987 = vmatprep.subr.bf16.mxu1 %v3663_v21 }
 0x5ca   :  { %2989 = vmatpush1.bf16.msra.mxu1 %v3681_v27 }
 0x5cb   :  { %2991 = vmatprep.subr.bf16.mxu1 %v3685_v28 }
 0x5ce   :  { %2993 = vmatpush1.bf16.msra.mxu1 %v3700_v32 }
 0x5cf   :  { %3011 = vmatprep.subr.bf16.mxu1 %v3617_v3 }
 0x694   :  { %v550_v14 = vpop.f32.mrb[2].mxu1 }
 0x695   :  { %v556_v15 = vrot.slane %v550_v14, 4  ;;  %v552_v18 = vpop.f32.mrb[3].mxu1 }
 0x696   :  { %v560_v19 = vrot.slane %v552_v18, 6 }
 0x697   :  { %v558_v20 = vadd.f32 %v556_v15, %v3741_v50 }
 0x698   :  { %v562_v22 = vadd.f32 %v560_v19, %v3739_v46 }
 0x699   :  { %3241 = vtanh.f32 %v558_v20  ;;  %v2832_v25 = vmul.f32 -1.442695, %v558_v20 }
 0x69a   :  { %3243 = vtanh.f32 %v562_v22  ;;  %v2833_v26 = vmul.f32 -1.442695, %v562_v22 }
 0x69b   :  { %3245 = vpow2.f32 %v2832_v25 }
 0x69c   :  { %3247 = vpow2.f32 %v2833_v26 }
 0x6a3   :  { %v3242_v23 = vpop.eup %3241 }
 0x6a4   :  { %v3244_v24 = vpop.eup %3243  ;;  %575 = vrot.lane.b32.xlu1 %v3242_v23, %s3532_s4 }
 0x6a5   :  { %602 = vrot.lane.b32.xlu0 %v3244_v24, %s3532_s4  ;;  %v3246_v29 = vpop.eup %3245 }
 0x6a6   :  { %v3248_v30 = vpop.eup %3247  ;;  %v566_v31 = vadd.f32 1.0, %v3246_v29 }
 0x6a7   :  { %v593_v33 = vadd.f32 1.0, %v3248_v30 }
 0x6a8   :  { %3249 = vrcp.f32 %v566_v31 }
 0x6a9   :  { %3251 = vrcp.f32 %v593_v33 }
 0x6b2   :  { %v3250_v36 = vpop.eup %3249 }
 0x6b3   :  { %v3252_v39 = vpop.eup %3251  ;;  %v573_v48 = vmul.f32 %v3250_v36, %v571_v45 }
 0x6b4   :  { %v600_v51 = vmul.f32 %v3252_v39, %v598_v47 }
 0x716   :  { %v576_v37 = vpop.permute.xlu1 %575 }
 0x717   :  { %v578_v40 = vmul.f32 %v3250_v36, %v576_v37  ;;  %v603_v42 = vpop.permute.xlu0 %602 }
 0x718   :  { %v605_v43 = vmul.f32 %v3252_v39, %v603_v42 }
 0x719   :  { %580 = vrot.lane.b32.xlu1 %v578_v40, %s3532_s4 }
 0x71a   :  { %607 = vrot.lane.b32.xlu0 %v605_v43, %s3532_s4 }
 0x78b   :  { %v581_v49 = vpop.permute.xlu1 %580 }
 0x78c   :  { %v3815_v52 = vadd.f32 %v581_v49, %v573_v48  ;;  %v608_v53 = vpop.permute.xlu0 %607 }
 0x78d   :  { %v610_v54 = vadd.f32 %v608_v53, %v600_v51 }
 0x78e   :  { %3253 = vtanh.f32 %v3815_v52  ;;  %v722_v29 = vrot.slane %v3815_v52, 6 }
 0x78f   :  { %3255 = vtanh.f32 %v610_v54  ;;  %v749_v26 = vrot.slane %v610_v54, 2 }
 0x798   :  { %v3254_v55 = vpop.eup %3253 }
 0x799   :  { %v3256_v56 = vpop.eup %3255  ;;  %586 = vrot.lane.b32.xlu1 %v3254_v55, %s3532_s4 }
 0x79a   :  { %613 = vrot.lane.b32.xlu0 %v3256_v56, %s3532_s4 }
 0x80b   :  { %v587_v57 = vpop.permute.xlu1 %586 }
 0x80c   :  { %v589_v58 = vmul.f32 %v3250_v36, %v587_v57  ;;  %v614_v59 = vpop.permute.xlu0 %613 }
 0x80d   :  { %v3820_v60 = vmul.f32 %v3252_v39, %v614_v59 }
 0x80e   :  { %618 = vrot.lane.b32.xlu0 %v589_v58, %s3534_s11 }
 0x80f   :  { %v629_v61 = vrot.slane %v3820_v60, 6 }
 0x811   :  { %630 = vrot.lane.b32.xlu1 %v629_v61, %s3533_s30 }
 0x880   :  { %v619_v62 = vpop.permute.xlu0 %618 }
 0x881   :  { %622 = vst.msk [vmem:[#allocation2] sm:$0x30] %vm621_vm5, %v619_v62 }
 0x883   :  { %v631_v63 = vpop.permute.xlu1 %630 }
 0x884   :  { %v633_v0 = vsel %vm325_vm2, %v619_v62, %v631_v63 }
 0x885   :  { %v635_v1 = vrot.slane %v633_v0, 4 }
 0x887   :  { %2834 = vmatmul.mubr.msk.f32.vlgmr.msra.gmra.mrb[6].mxu0 %vm181_vm3, %v635_v1 }
 0x888   :  { %2997 = vmatpush1.bf16.msra.mxu0 %v3630_v8  ;;  %1001 = vmatprep.mubr.f32.mxu0 %v3531_v7 }
 0x889   :  { %2999 = vmatprep.subr.bf16.mxu0 %v3632_v9 }
 0x88c   :  { %3001 = vmatpush1.bf16.msra.mxu0 %v3654_v16 }
 0x88d   :  { %3003 = vmatprep.subr.bf16.mxu0 %v3663_v21 }
 0x890   :  { %3005 = vmatpush1.bf16.msra.mxu0 %v3681_v27 }
 0x891   :  { %3007 = vmatprep.subr.bf16.mxu0 %v3685_v28 }
 0x894   :  { %3009 = vmatpush1.bf16.msra.mxu0 %v3700_v32 }
 0x895   :  { %3027 = vmatprep.subr.bf16.mxu0 %v3617_v3 }
 0x95a   :  { %v704_v2 = vpop.f32.mrb[6].mxu0 }
 0x95b   :  { %v710_v4 = vrot.slane %v704_v2, 2  ;;  %v706_v6 = vpop.f32.mrb[7].mxu0 }
 0x95c   :  { %v713_v10 = vadd.f32 %v706_v6, %v3739_v46 }
 0x95d   :  { %v712_v11 = vadd.f32 %v710_v4, %v3741_v50 }
 0x95e   :  { %3257 = vtanh.f32 %v713_v10  ;;  %v2836_v14 = vmul.f32 -1.442695, %v713_v10 }
 0x95f   :  { %3259 = vtanh.f32 %v712_v11  ;;  %v2835_v15 = vmul.f32 -1.442695, %v712_v11 }
 0x960   :  { %3261 = vpow2.f32 %v2836_v14 }
 0x961   :  { %3263 = vpow2.f32 %v2835_v15 }
 0x968   :  { %v3258_v12 = vpop.eup %3257 }
 0x969   :  { %v3260_v13 = vpop.eup %3259  ;;  %753 = vrot.lane.b32.xlu0 %v3258_v12, %s3532_s4 }
 0x96a   :  { %726 = vrot.lane.b32.xlu1 %v3260_v13, %s3532_s4  ;;  %v3262_v3 = vpop.eup %3261 }
 0x96b   :  { %v3264_v18 = vpop.eup %3263  ;;  %v744_v19 = vadd.f32 1.0, %v3262_v3 }
 0x96c   :  { %v717_v20 = vadd.f32 1.0, %v3264_v18 }
 0x96d   :  { %3265 = vrcp.f32 %v744_v19 }
 0x96e   :  { %3267 = vrcp.f32 %v717_v20 }
 0x977   :  { %v3266_v46 = vpop.eup %3265 }
 0x978   :  { %v3268_v22 = vpop.eup %3267  ;;  %v751_v30 = vmul.f32 %v3266_v46, %v749_v26 }
 0x979   :  { %v724_v33 = vmul.f32 %v3268_v22, %v722_v29 }
 0x9db   :  { %v754_v50 = vpop.permute.xlu0 %753 }
 0x9dc   :  { %v756_v23 = vmul.f32 %v3266_v46, %v754_v50  ;;  %v727_v24 = vpop.permute.xlu1 %726 }
 0x9dd   :  { %v729_v25 = vmul.f32 %v3268_v22, %v727_v24 }
 0x9de   :  { %758 = vrot.lane.b32.xlu0 %v756_v23, %s3532_s4 }
 0x9df   :  { %731 = vrot.lane.b32.xlu1 %v729_v25, %s3532_s4 }
 0xa50   :  { %v759_v31 = vpop.permute.xlu0 %758 }
 0xa51   :  { %v3844_v36 = vadd.f32 %v759_v31, %v751_v30  ;;  %v732_v37 = vpop.permute.xlu1 %731 }
 0xa52   :  { %v734_v39 = vadd.f32 %v732_v37, %v724_v33 }
 0xa53   :  { %3269 = vtanh.f32 %v3844_v36  ;;  %v900_v19 = vrot.slane %v3844_v36, 2 }
 0xa54   :  { %3271 = vtanh.f32 %v734_v39  ;;  %v873_v3 = vrot.slane %v734_v39, 6 }
 0xa5d   :  { %v3270_v40 = vpop.eup %3269 }
 0xa5e   :  { %v3272_v42 = vpop.eup %3271  ;;  %764 = vrot.lane.b32.xlu0 %v3270_v40, %s3532_s4 }
 0xa5f   :  { %737 = vrot.lane.b32.xlu1 %v3272_v42, %s3532_s4 }
 0xad0   :  { %v765_v43 = vpop.permute.xlu0 %764 }
 0xad1   :  { %v3849_v45 = vmul.f32 %v3266_v46, %v765_v43  ;;  %v738_v47 = vpop.permute.xlu1 %737 }
 0xad2   :  { %v740_v48 = vmul.f32 %v3268_v22, %v738_v47 }
 0xad3   :  { %v780_v49 = vrot.slane %v3849_v45, 2 }
 0xad4   :  { %769 = vrot.lane.b32.xlu0 %v740_v48, %s3534_s11 }
 0xad5   :  { %781 = vrot.lane.b32.xlu1 %v780_v49, %s3533_s30 }
 0xb46   :  { %v770_v51 = vpop.permute.xlu0 %769 }
 0xb47   :  { %773 = vst.msk [vmem:[#allocation2] sm:$0xc0] %vm772_vm6, %v770_v51  ;;  %v782_v52 = vpop.permute.xlu1 %781 }
 0xb48   :  { %v784_v53 = vsel %vm325_vm2, %v770_v51, %v782_v52 }
 0xb49   :  { %v786_v54 = vrot.slane %v784_v53, 6 }
 0xb4b   :  { %2837 = vmatmul.mubr.msk.f32.vlgmr.msra.gmra.mrb[4].mxu1 %vm181_vm3, %v786_v54 }
 0xb4c   :  { %3013 = vmatpush1.bf16.msra.mxu1 %v3630_v8  ;;  %1153 = vmatprep.mubr.f32.mxu1 %v3531_v7 }
 0xb4d   :  { %3015 = vmatprep.subr.bf16.mxu1 %v3632_v9 }
 0xb50   :  { %3017 = vmatpush1.bf16.msra.mxu1 %v3654_v16 }
 0xb51   :  { %3019 = vmatprep.subr.bf16.mxu1 %v3663_v21 }
 0xb54   :  { %3021 = vmatpush1.bf16.msra.mxu1 %v3681_v27 }
 0xb55   :  { %3023 = vmatprep.subr.bf16.mxu1 %v3685_v28 }
 0xb58   :  { %3025 = vmatpush1.bf16.msra.mxu1 %v3700_v32 }
 0xc1e   :  { %v855_v55 = vpop.f32.mrb[4].mxu1 }
 0xc1f   :  { %v860_v56 = vadd.f32 %v855_v55, %v3737_v44  ;;  %v857_v57 = vpop.f32.mrb[5].mxu1 }
 0xc20   :  { %v862_v58 = vrot.slane %v857_v57, 2 }
 0xc21   :  { %3273 = vtanh.f32 %v860_v56  ;;  %v2838_v63 = vmul.f32 -1.442695, %v860_v56 }
 0xc22   :  { %v864_v59 = vadd.f32 %v862_v58, %v3733_v41 }
 0xc24   :  { %3275 = vtanh.f32 %v864_v59  ;;  %v2839_v0 = vmul.f32 -1.442695, %v864_v59 }
 0xc25   :  { %3277 = vpow2.f32 %v2838_v63 }
 0xc26   :  { %3279 = vpow2.f32 %v2839_v0 }
 0xc2b   :  { %v3274_v61 = vpop.eup %3273 }
 0xc2c   :  { %877 = vrot.lane.b32.xlu1 %v3274_v61, %s3532_s4 }
 0xc2e   :  { %v3276_v62 = vpop.eup %3275 }
 0xc2f   :  { %904 = vrot.lane.b32.xlu0 %v3276_v62, %s3532_s4  ;;  %v3278_v1 = vpop.eup %3277 }
 0xc30   :  { %v3280_v2 = vpop.eup %3279  ;;  %v868_v4 = vadd.f32 1.0, %v3278_v1 }
 0xc31   :  { %v895_v6 = vadd.f32 1.0, %v3280_v2 }
 0xc32   :  { %3281 = vrcp.f32 %v868_v4 }
 0xc33   :  { %3283 = vrcp.f32 %v895_v6 }
 0xc3c   :  { %v3282_v10 = vpop.eup %3281 }
 0xc3d   :  { %v3284_v13 = vpop.eup %3283  ;;  %v875_v18 = vmul.f32 %v3282_v10, %v873_v3 }
 0xc3e   :  { %v902_v50 = vmul.f32 %v3284_v13, %v900_v19 }
 0xc9e   :  { %v878_v11 = vpop.permute.xlu1 %877 }
 0xc9f   :  { %v880_v12 = vmul.f32 %v3282_v10, %v878_v11 }
 0xca1   :  { %882 = vrot.lane.b32.xlu1 %v880_v12, %s3532_s4  ;;  %v905_v14 = vpop.permute.xlu0 %904 }
 0xca2   :  { %v907_v15 = vmul.f32 %v3284_v13, %v905_v14 }
 0xca4   :  { %909 = vrot.lane.b32.xlu0 %v907_v15, %s3532_s4 }
 0xd13   :  { %v883_v20 = vpop.permute.xlu1 %882 }
 0xd14   :  { %v885_v46 = vadd.f32 %v883_v20, %v875_v18 }
 0xd16   :  { %3285 = vtanh.f32 %v885_v46  ;;  %v910_v22 = vpop.permute.xlu0 %909  ;;  %v1024_v58 = vrot.slane %v885_v46, 6 }
 0xd17   :  { %v912_v23 = vadd.f32 %v910_v22, %v902_v50 }
 0xd19   :  { %3287 = vtanh.f32 %v912_v23  ;;  %v1051_v59 = vrot.slane %v912_v23, 2 }
 0xd20   :  { %v3286_v24 = vpop.eup %3285 }
 0xd21   :  { %888 = vrot.lane.b32.xlu1 %v3286_v24, %s3532_s4 }
 0xd23   :  { %v3288_v25 = vpop.eup %3287 }
 0xd24   :  { %915 = vrot.lane.b32.xlu0 %v3288_v25, %s3532_s4 }
 0xd93   :  { %v889_v26 = vpop.permute.xlu1 %888 }
 0xd94   :  { %v891_v29 = vmul.f32 %v3282_v10, %v889_v26 }
 0xd96   :  { %920 = vrot.lane.b32.xlu0 %v891_v29, %s3534_s11  ;;  %v916_v30 = vpop.permute.xlu0 %915 }
 0xd97   :  { %v3875_v31 = vmul.f32 %v3284_v13, %v916_v30 }
 0xd99   :  { %v929_v33 = vrot.slane %v3875_v31, 6 }
 0xd9b   :  { %930 = vrot.lane.b32.xlu1 %v929_v33, %s3533_s30 }
 0xe08   :  { %v3879_v36 = vpop.permute.xlu0 %920 }
 0xe0d   :  { %v931_v37 = vpop.permute.xlu1 %930 }
 0xe0e   :  { %v933_v39 = vsel %vm325_vm2, %v3879_v36, %v931_v37 }
 0xe0f   :  { %2840 = vmatmul.mubr.msk.f32.vlgmr.msra.gmra.mrb[8].mxu0 %vm181_vm3, %v933_v39 }
 0xe10   :  { %3029 = vmatpush1.bf16.msra.mxu0 %v3630_v8  ;;  %1305 = vmatprep.mubr.f32.mxu0 %v3531_v7 }
 0xe11   :  { %3031 = vmatprep.subr.bf16.mxu0 %v3632_v9 }
 0xe14   :  { %3033 = vmatpush1.bf16.msra.mxu0 %v3654_v16 }
 0xe15   :  { %3035 = vmatprep.subr.bf16.mxu0 %v3663_v21 }
 0xe18   :  { %3037 = vmatpush1.bf16.msra.mxu0 %v3681_v27 }
 0xe19   :  { %3039 = vmatprep.subr.bf16.mxu0 %v3685_v28 }
 0xe1c   :  { %3041 = vmatpush1.bf16.msra.mxu0 %v3700_v32 }
 0xee2   :  { %v1003_v40 = vpop.f32.mrb[8].mxu0 }
 0xee3   :  { %v1009_v42 = vrot.slane %v1003_v40, 6  ;;  %v1005_v43 = vpop.f32.mrb[9].mxu0 }
 0xee4   :  { %v1013_v47 = vrot.slane %v1005_v43, 4 }
 0xee5   :  { %v1011_v8 = vadd.f32 %v1009_v42, %v3737_v44 }
 0xee6   :  { %v1015_v48 = vadd.f32 %v1013_v47, %v3733_v41 }
 0xee7   :  { %3289 = vtanh.f32 %v1011_v8  ;;  %v2841_v21 = vmul.f32 -1.442695, %v1011_v8 }
 0xee8   :  { %3291 = vtanh.f32 %v1015_v48  ;;  %v2842_v27 = vmul.f32 -1.442695, %v1015_v48 }
 0xee9   :  { %3293 = vpow2.f32 %v2841_v21 }
 0xeea   :  { %3295 = vpow2.f32 %v2842_v27 }
 0xef1   :  { %v3290_v9 = vpop.eup %3289 }
 0xef2   :  { %v3292_v16 = vpop.eup %3291  ;;  %1028 = vrot.lane.b32.xlu1 %v3290_v9, %s3532_s4 }
 0xef3   :  { %1055 = vrot.lane.b32.xlu0 %v3292_v16, %s3532_s4  ;;  %v3294_v28 = vpop.eup %3293 }
 0xef4   :  { %v3296_v32 = vpop.eup %3295  ;;  %v1019_v49 = vadd.f32 1.0, %v3294_v28 }
 0xef5   :  { %v1046_v51 = vadd.f32 1.0, %v3296_v32 }
 0xef6   :  { %3297 = vrcp.f32 %v1019_v49 }
 0xef7   :  { %3299 = vrcp.f32 %v1046_v51 }
 0xf00   :  { %v3298_v52 = vpop.eup %3297 }
 0xf01   :  { %v3300_v54 = vpop.eup %3299  ;;  %v1026_v61 = vmul.f32 %v3298_v52, %v1024_v58 }
 0xf02   :  { %v1053_v63 = vmul.f32 %v3300_v54, %v1051_v59 }
 0xf64   :  { %v1029_v53 = vpop.permute.xlu1 %1028 }
 0xf65   :  { %v1031_v55 = vmul.f32 %v3298_v52, %v1029_v53  ;;  %v1056_v56 = vpop.permute.xlu0 %1055 }
 0xf66   :  { %v1058_v57 = vmul.f32 %v3300_v54, %v1056_v56 }
 0xf67   :  { %1033 = vrot.lane.b32.xlu1 %v1031_v55, %s3532_s4 }
 0xf68   :  { %1060 = vrot.lane.b32.xlu0 %v1058_v57, %s3532_s4 }
 0xfd9   :  { %v1034_v62 = vpop.permute.xlu1 %1033 }
 0xfda   :  { %v1036_v0 = vadd.f32 %v1034_v62, %v1026_v61  ;;  %v1061_v1 = vpop.permute.xlu0 %1060 }
 0xfdb   :  { %v1063_v2 = vadd.f32 %v1061_v1, %v1053_v63 }
 0xfdc   :  { %3301 = vtanh.f32 %v1036_v0  ;;  %v1176_v16 = vrot.slane %v1036_v0, 6 }
 0xfdd   :  { %3303 = vtanh.f32 %v1063_v2  ;;  %v1203_v21 = vrot.slane %v1063_v2, 2 }
 0xfe6   :  { %v3302_v4 = vpop.eup %3301 }
 0xfe7   :  { %v3304_v6 = vpop.eup %3303  ;;  %1039 = vrot.lane.b32.xlu1 %v3302_v4, %s3532_s4 }
 0xfe8   :  { %1066 = vrot.lane.b32.xlu0 %v3304_v6, %s3532_s4 }
0x1059   :  { %v1040_v10 = vpop.permute.xlu1 %1039 }
0x105a   :  { %v1042_v11 = vmul.f32 %v3298_v52, %v1040_v10  ;;  %v1067_v12 = vpop.permute.xlu0 %1066 }
0x105b   :  { %v3900_v13 = vmul.f32 %v3300_v54, %v1067_v12 }
0x105c   :  { %1071 = vrot.lane.b32.xlu0 %v1042_v11, %s3534_s11 }
0x105d   :  { %v1080_v14 = vrot.slane %v3900_v13, 2 }
0x105f   :  { %1081 = vrot.lane.b32.xlu1 %v1080_v14, %s3533_s30 }
0x10ce   :  { %v3905_v15 = vpop.permute.xlu0 %1071 }
0x10d1   :  { %v1082_v3 = vpop.permute.xlu1 %1081 }
0x10d2   :  { %v1084_v18 = vsel %vm325_vm2, %v3905_v15, %v1082_v3 }
0x10d3   :  { %v1086_v19 = vrot.slane %v1084_v18, 2 }
0x10d5   :  { %2843 = vmatmul.mubr.msk.f32.vlgmr.msra.gmra.mrb[6].mxu1 %vm181_vm3, %v1086_v19 }
0x10d6   :  { %1481 = vmatprep.mubr.f32.mxu1 %v3531_v7 }
0x11a8   :  { %v1155_v20 = vpop.f32.mrb[6].mxu1 }
0x11a9   :  { %v1161_v46 = vrot.slane %v1155_v20, 4  ;;  %v1157_v50 = vpop.f32.mrb[7].mxu1 }
0x11aa   :  { %v1165_v22 = vrot.slane %v1157_v50, 6 }
0x11ab   :  { %v1163_v23 = vadd.f32 %v1161_v46, %v3737_v44 }
0x11ac   :  { %v1167_v24 = vadd.f32 %v1165_v22, %v3733_v41 }
0x11ad   :  { %3305 = vtanh.f32 %v1163_v23  ;;  %v2844_v29 = vmul.f32 -1.442695, %v1163_v23 }
0x11ae   :  { %3307 = vtanh.f32 %v1167_v24  ;;  %v2845_v30 = vmul.f32 -1.442695, %v1167_v24 }
0x11af   :  { %3309 = vpow2.f32 %v2844_v29 }
0x11b0   :  { %3311 = vpow2.f32 %v2845_v30 }
0x11b7   :  { %v3306_v25 = vpop.eup %3305 }
0x11b8   :  { %v3308_v26 = vpop.eup %3307  ;;  %1180 = vrot.lane.b32.xlu1 %v3306_v25, %s3532_s4 }
0x11b9   :  { %1207 = vrot.lane.b32.xlu0 %v3308_v26, %s3532_s4  ;;  %v3310_v33 = vpop.eup %3309 }
0x11ba   :  { %v3312_v37 = vpop.eup %3311  ;;  %v1171_v39 = vadd.f32 1.0, %v3310_v33 }
0x11bb   :  { %v1198_v40 = vadd.f32 1.0, %v3312_v37 }
0x11bc   :  { %3313 = vrcp.f32 %v1171_v39 }
0x11bd   :  { %3315 = vrcp.f32 %v1198_v40 }
0x11c6   :  { %v3314_v42 = vpop.eup %3313 }
0x11c7   :  { %v3316_v47 = vpop.eup %3315  ;;  %v1178_v27 = vmul.f32 %v3314_v42, %v1176_v16  ;;  %v1495_v16 = vld [vmem:[#allocation7 + $0x8] sm:$0xff] }
0x11c8   :  { %v1205_v32 = vmul.f32 %v3316_v47, %v1203_v21  ;;  %v1497_v21 = vld [vmem:[#allocation7 + $0x18] sm:$0xff] }
0x122a   :  { %v1181_v43 = vpop.permute.xlu1 %1180 }
0x122b   :  { %v1183_v8 = vmul.f32 %v3314_v42, %v1181_v43  ;;  %v1208_v48 = vpop.permute.xlu0 %1207 }
0x122c   :  { %v1210_v9 = vmul.f32 %v3316_v47, %v1208_v48  ;;  %v1383_v48 = vld [vmem:[%s4356_s5] sm:$0xff] }
0x122d   :  { %1185 = vrot.lane.b32.xlu1 %v1183_v8, %s3532_s4  ;;  %v1386_v8 = vld [vmem:[%s4356_s5 + $0x18] sm:$0xff] }
0x122e   :  { %1212 = vrot.lane.b32.xlu0 %v1210_v9, %s3532_s4 }
0x129f   :  { %v1186_v28 = vpop.permute.xlu1 %1185 }
0x12a0   :  { %v1188_v49 = vadd.f32 %v1186_v28, %v1178_v27  ;;  %v1213_v51 = vpop.permute.xlu0 %1212  ;;  %v3962_v28 = vpack.c.bf16 %v1497_v21, %v1495_v16  ;;  %v1399_v16 = vld [vmem:[%s4358_s7] sm:$0x3] }
0x12a1   :  { %v1215_v52 = vadd.f32 %v1213_v51, %v1205_v32  ;;  %v1494_v32 = vld [vmem:[#allocation7] sm:$0xff]  ;;  %v1388_v51 = vld [vmem:[%s4356_s5 + $0x28] sm:$0xff]  ;;  %v1404_v21 = vrot.slane %v1399_v16, %v73_v38 }
0x12a2   :  { %3317 = vtanh.f32 %v1188_v49  ;;  %v1325_v26 = vrot.slane %v1188_v49, 6  ;;  %v1496_v49 = vld [vmem:[#allocation7 + $0x10] sm:$0xff]  ;;  %3059 = vmatprep.subr.bf16.mxu0 %v3962_v28 }
0x12a3   :  { %3319 = vtanh.f32 %v1215_v52  ;;  %v1352_v25 = vrot.slane %v1215_v52, 2  ;;  %v3967_v52 = vpack.c.bf16 %v1496_v49, %v1494_v32 }
0x12ac   :  { %v3318_v53 = vpop.eup %3317 }
0x12ad   :  { %v3320_v54 = vpop.eup %3319  ;;  %1191 = vrot.lane.b32.xlu1 %v3318_v53, %s3532_s4  ;;  %v1387_v53 = vld [vmem:[%s4356_s5 + $0x20] sm:$0xff] }
0x12ae   :  { %1218 = vrot.lane.b32.xlu0 %v3320_v54, %s3532_s4  ;;  %v1389_v54 = vld [vmem:[%s4356_s5 + $0x30] sm:$0xff] }
0x131f   :  { %v1192_v55 = vpop.permute.xlu1 %1191 }
0x1320   :  { %v1194_v56 = vmul.f32 %v3314_v42, %v1192_v55  ;;  %v1219_v57 = vpop.permute.xlu0 %1218 }
0x1321   :  { %v3919_v58 = vmul.f32 %v3316_v47, %v1219_v57  ;;  %v1384_v47 = vld [vmem:[%s4356_s5 + $0x8] sm:$0xff]  ;;  %v1499_v57 = vld [vmem:[#allocation7 + $0x28] sm:$0xff] }
0x1322   :  { %1223 = vrot.lane.b32.xlu0 %v1194_v56, %s3534_s11  ;;  %v3042_v9 = vpack.c.bf16 %v1386_v8, %v1384_v47  ;;  %v3048_v56 = vpack.c.bf16 %v1389_v54, %v1387_v53 }
0x1323   :  { %v1232_v59 = vrot.slane %v3919_v58, 6 }
0x1324   :  { %3043 = vmatprep.subr.bf16.mxu1 %v3042_v9 }
0x1325   :  { %1233 = vrot.lane.b32.xlu1 %v1232_v59, %s3533_s30  ;;  %v1501_v59 = vld [vmem:[#allocation7 + $0x38] sm:$0xff] }
0x1394   :  { %v3924_v61 = vpop.permute.xlu0 %1223 }
0x1397   :  { %v1234_v62 = vpop.permute.xlu1 %1233 }
0x1398   :  { %v1236_v63 = vsel %vm325_vm2, %v3924_v61, %v1234_v62  ;;  %v1498_v62 = vld [vmem:[#allocation7 + $0x20] sm:$0xff] }
0x1399   :  { %v1238_v0 = vrot.slane %v1236_v63, 4  ;;  %v3983_v63 = vpack.c.bf16 %v1501_v59, %v1499_v57 }
0x139b   :  { %2846 = vmatmul.mubr.msk.f32.vlgmr.msra.gmra.mrb[10].mxu0 %vm181_vm3, %v1238_v0  ;;  %v1500_v0 = vld [vmem:[#allocation7 + $0x30] sm:$0xff] }
0x139c   :  { %1574 = vmatprep.mubr.f32.mxu0 %v3531_v7  ;;  %3061 = vmatpush1.bf16.msra.mxu0 %v3967_v52 }
0x139d   :  { %3063 = vmatprep.subr.bf16.mxu0 %v3983_v63 }
0x146e   :  { %v1307_v1 = vpop.f32.mrb[10].mxu0 }
0x146f   :  { %v1313_v2 = vrot.slane %v1307_v1, 2  ;;  %v1309_v4 = vpop.f32.mrb[11].mxu0  ;;  %v3986_v1 = vpack.c.bf16 %v1500_v0, %v1498_v62 }
0x1470   :  { %v1316_v6 = vadd.f32 %v1309_v4, %v3733_v41  ;;  %v1391_v4 = vld [vmem:[%s4356_s5 + $0x40] sm:$0xff] }
0x1471   :  { %v1315_v10 = vadd.f32 %v1313_v2, %v3737_v44  ;;  %3065 = vmatpush1.bf16.msra.mxu0 %v3986_v1 }
0x1472   :  { %3321 = vtanh.f32 %v1316_v6  ;;  %v2848_v14 = vmul.f32 -1.442695, %v1316_v6 }
0x1473   :  { %3323 = vtanh.f32 %v1315_v10  ;;  %v2847_v3 = vmul.f32 -1.442695, %v1315_v10  ;;  %v1503_v10 = vld [vmem:[#allocation7 + $0x48] sm:$0xff] }
0x1474   :  { %3325 = vpow2.f32 %v2848_v14  ;;  %v1504_v14 = vld [vmem:[#allocation7 + $0x50] sm:$0xff] }
0x1475   :  { %3327 = vpow2.f32 %v2847_v3 }
0x147c   :  { %v3322_v11 = vpop.eup %3321 }
0x147d   :  { %v3324_v12 = vpop.eup %3323  ;;  %1356 = vrot.lane.b32.xlu0 %v3322_v11, %s3532_s4 }
0x147e   :  { %1329 = vrot.lane.b32.xlu1 %v3324_v12, %s3532_s4  ;;  %v3326_v18 = vpop.eup %3325  ;;  %v1502_v12 = vld [vmem:[#allocation7 + $0x40] sm:$0xff] }
0x147f   :  { %v3328_v19 = vpop.eup %3327  ;;  %v1347_v20 = vadd.f32 1.0, %v3326_v18  ;;  %v4008_v3 = vpack.c.bf16 %v1504_v14, %v1502_v12  ;;  %v1396_v18 = vld [vmem:[%s4356_s5 + $0x68] sm:$0xff] }
0x1480   :  { %v1320_v46 = vadd.f32 1.0, %v3328_v19  ;;  %v1398_v19 = vld [vmem:[%s4356_s5 + $0x78] sm:$0xff] }
0x1481   :  { %3329 = vrcp.f32 %v1347_v20  ;;  %v3054_v20 = vpack.c.bf16 %v1398_v19, %v1396_v18 }
0x1482   :  { %3331 = vrcp.f32 %v1320_v46  ;;  %v1395_v46 = vld [vmem:[%s4356_s5 + $0x60] sm:$0xff] }
0x148b   :  { %v3934_v41 = vpop.eup %3329 }
0x148c   :  { %v3936_v50 = vpop.eup %3331  ;;  %v1354_v29 = vmul.f32 %v3934_v41, %v1352_v25 }
0x148d   :  { %v1327_v33 = vmul.f32 %v3936_v50, %v1325_v26  ;;  %v1506_v26 = vld [vmem:[#allocation7 + $0x60] sm:$0xff] }
0x14ef   :  { %v1357_v44 = vpop.permute.xlu0 %1356 }
0x14f0   :  { %v1359_v22 = vmul.f32 %v3934_v41, %v1357_v44  ;;  %v1330_v23 = vpop.permute.xlu1 %1329  ;;  %v1397_v44 = vld [vmem:[%s4356_s5 + $0x70] sm:$0xff] }
0x14f1   :  { %v1332_v24 = vmul.f32 %v3936_v50, %v1330_v23  ;;  %v1507_v23 = vld [vmem:[#allocation7 + $0x68] sm:$0xff] }
0x14f2   :  { %1361 = vrot.lane.b32.xlu0 %v1359_v22, %s3532_s4  ;;  %v3056_v22 = vpack.c.bf16 %v1397_v44, %v1395_v46 }
0x14f3   :  { %1334 = vrot.lane.b32.xlu1 %v1332_v24, %s3532_s4  ;;  %v1509_v24 = vld [vmem:[#allocation7 + $0x78] sm:$0xff] }
0x14f4   :  { %v4024_v25 = vpack.c.bf16 %v1509_v24, %v1507_v23 }
0x1564   :  { %v1362_v30 = vpop.permute.xlu0 %1361 }
0x1565   :  { %v1364_v37 = vadd.f32 %v1362_v30, %v1354_v29  ;;  %v1335_v39 = vpop.permute.xlu1 %1334  ;;  %v1508_v29 = vld [vmem:[#allocation7 + $0x70] sm:$0xff] }
0x1566   :  { %v1337_v40 = vadd.f32 %v1335_v39, %v1327_v33  ;;  %v4026_v30 = vpack.c.bf16 %v1508_v29, %v1506_v26 }
0x1567   :  { %3333 = vtanh.f32 %v1364_v37 }
0x1568   :  { %3335 = vtanh.f32 %v1337_v40 }
0x1571   :  { %v3334_v42 = vpop.eup %3333 }
0x1572   :  { %v3336_v43 = vpop.eup %3335  ;;  %1367 = vrot.lane.b32.xlu0 %v3334_v42, %s3532_s4 }
0x1573   :  { %1340 = vrot.lane.b32.xlu1 %v3336_v43, %s3532_s4 }
0x1576   :  { %925 = vrot.lane.b32.xlu0 %v3875_v31, %s3533_s30  ;;  %v1385_v31 = vld [vmem:[%s4356_s5 + $0x10] sm:$0xff] }
0x1577   :  { %1076 = vrot.lane.b32.xlu1 %v3900_v13, %s3533_s30  ;;  %v3044_v27 = vpack.c.bf16 %v1385_v31, %v1383_v48  ;;  %v1390_v13 = vld [vmem:[%s4356_s5 + $0x38] sm:$0xff] }
0x1578   :  { %v3046_v55 = vpack.c.bf16 %v1390_v13, %v1388_v51 }
0x1579   :  { %3045 = vmatpush1.bf16.msra.mxu1 %v3044_v27  ;;  %v1408_v27 = vrot.slane %v1399_v16, %v77_v35 }
0x157a   :  { %1228 = vrot.lane.b32.xlu0 %v3919_v58, %s3533_s30  ;;  %3047 = vmatprep.subr.bf16.mxu1 %v3046_v55  ;;  %v1394_v58 = vld [vmem:[%s4356_s5 + $0x58] sm:$0xff] }
0x157b   :  { %470 = vrot.lane.b32.xlu1 %v3790_v5, %s3533_s30  ;;  %v1392_v5 = vld [vmem:[%s4356_s5 + $0x48] sm:$0xff] }
0x157c   :  { %v3050_v2 = vpack.c.bf16 %v1394_v58, %v1392_v5 }
0x157d   :  { %3049 = vmatpush1.bf16.msra.mxu1 %v3048_v56 }
0x157e   :  { %316 = vrot.lane.b32.xlu0 %v3757_v17, %s3533_s30  ;;  %v1393_v17 = vld [vmem:[%s4356_s5 + $0x50] sm:$0xff]  ;;  %3051 = vmatprep.subr.bf16.mxu1 %v3050_v2  ;;  %s2809_s5 = sshll.u32 %s3537_s18, 4  ;;  %s2810_s5 = int_to_ptr.vmem [resolvable:$true] %s2809_s5 }
0x157f   :  { %v3052_v6 = vpack.c.bf16 %v1393_v17, %v1391_v4  ;;  %s3499_s19 = scalar_lea.vmem %s2810_s5, 32  ;;  %p3504_p0 = scmp.lt.s32.totalorder %s2810_s5, %s2810_s5 }
0x1580   :  { %p3500_p13 = scmp.ne.s32.totalorder %s2810_s5, %s3499_s19  ;;  %p3505_p1 = scmp.lt.s32.totalorder %s3499_s19, %s3499_s19 }
0x1581   :  { %3053 = vmatpush1.bf16.msra.mxu1 %v3052_v6 }
0x1582   :  { %624 = vrot.lane.b32.xlu0 %v3820_v60, %s3533_s30  ;;  %v1505_v60 = vld [vmem:[#allocation7 + $0x58] sm:$0xff]  ;;  %3055 = vmatprep.subr.bf16.mxu1 %v3054_v20  ;;  %p3506_p2 = por %p3505_p1, %p3504_p0 }
0x1583   :  { %v4006_v11 = vpack.c.bf16 %v1505_v60, %v1503_v10 }
0x1584   :  { %p3507_p3 = pnand %p3506_p2, %p3500_p13 }
0x1585   :  { %3067 = vmatprep.subr.bf16.mxu0 %v4006_v11  ;;  %3057 = vmatpush1.bf16.msra.mxu1 %v3056_v22 }
0x1586   :  { %3069 = vmatpush1.bf16.msra.mxu0 %v4008_v3  ;;  %3075 = vmatprep.subr.bf16.mxu1 %v3962_v28 }
0x1587   :  { %3071 = vmatprep.subr.bf16.mxu0 %v4024_v25 }
0x158a   :  { %3073 = vmatpush1.bf16.msra.mxu0 %v4026_v30 }
0x158b   :  { %3091 = vmatprep.subr.bf16.mxu0 %v3962_v28 }
0x158d   :  { %1575 = vmatmul.mubr.f32.vlgmr.msra.gmra.mrb[12].mxu0 %v3531_v7 }
0x158e   :  { %3093 = vmatpush1.bf16.msra.mxu0 %v3967_v52  ;;  %1868 = vmatprep.mubr.f32.mxu0 %v3531_v7 }
0x158f   :  { %3095 = vmatprep.subr.bf16.mxu0 %v3983_v63 }
0x1592   :  { %3097 = vmatpush1.bf16.msra.mxu0 %v3986_v1 }
0x1593   :  { %3099 = vmatprep.subr.bf16.mxu0 %v4006_v11 }
0x1596   :  { %3101 = vmatpush1.bf16.msra.mxu0 %v4008_v3 }
0x1597   :  { %3103 = vmatprep.subr.bf16.mxu0 %v4024_v25 }
0x159a   :  { %3105 = vmatpush1.bf16.msra.mxu0 %v4026_v30 }
0x159b   :  { %3123 = vmatprep.subr.bf16.mxu0 %v3962_v28 }
0x15e4   :  { %v1368_v33 = vpop.permute.xlu0 %1367 }
0x15e5   :  { %v1370_v37 = vmul.f32 %v3934_v41, %v1368_v33  ;;  %v1341_v39 = vpop.permute.xlu1 %1340 }
0x15e6   :  { %v1343_v40 = vmul.f32 %v3936_v50, %v1341_v39 }
0x15e7   :  { %1377 = vrot.lane.b32.xlu1 %v1370_v37, %s3533_s30 }
0x15e8   :  { %1372 = vrot.lane.b32.xlu0 %v1343_v40, %s3534_s11  ;;  %v926_v42 = vpop.permute.xlu0 %925 }
0x15e9   :  { %928 = vst.msk [vmem:[#allocation2] sm:$0xc0] %vm319_vm7, %v926_v42  ;;  %v1077_v43 = vpop.permute.xlu1 %1076 }
0x15ea   :  { %1079 = vst.msk [vmem:[#allocation2] sm:$0x30] %vm473_vm8, %v1077_v43 }
0x15eb   :  { %775 = vrot.lane.b32.xlu1 %v3849_v45, %s3533_s30 }
0x15ec   :  { %v1229_v41 = vpop.permute.xlu0 %1228 }
0x15ed   :  { %1231 = vst.msk [vmem:[#allocation2] sm:$0xc] %vm627_vm9, %v1229_v41  ;;  %v471_v50 = vpop.permute.xlu1 %470 }
0x15ee   :  { %474 = vst.msk [vmem:[#allocation2 + $0x8] sm:$0x30] %vm473_vm8, %v471_v50 }
0x15ef   :  { %1226 = vst.msk [vmem:[#allocation2 + $0x8] sm:$0x30] %vm621_vm5, %v3924_v61 }
0x15f0   :  { %v317_v47 = vpop.permute.xlu0 %316 }
0x15f1   :  { %320 = vst.msk [vmem:[#allocation2 + $0x8] sm:$0xc0] %vm319_vm7, %v317_v47 }
0x15f4   :  { %v625_v45 = vpop.permute.xlu0 %624 }
0x15f5   :  { %628 = vst.msk [vmem:[#allocation2 + $0x8] sm:$0xc] %vm627_vm9, %v625_v45 }
0x15f6   :  { %1074 = vst.msk [vmem:[#allocation2 + $0x8] sm:$0xc] %vm467_vm4, %v3905_v15 }
0x1659   :  { %v1378_v8 = vpop.permute.xlu1 %1377 }
0x165a   :  { %1380 = vst.msk [vmem:[#allocation2] sm:$0x3] %vm778_vm10, %v1378_v8  ;;  %v1373_v48 = vpop.permute.xlu0 %1372 }
0x165b   :  { %1375 = vst.msk [vmem:[#allocation2 + $0x8] sm:$0xc0] %vm772_vm6, %v1373_v48 }
0x165d   :  { %v776_v61 = vpop.permute.xlu1 %775 }
0x165e   :  { %779 = vst.msk [vmem:[#allocation2 + $0x8] sm:$0x3] %vm778_vm10, %v776_v61 }
0x165f   :  { %923 = vst.msk [vmem:[#allocation2 + $0x8] sm:$0x3] %vm313_vm1, %v3879_v36 }
0x1660   :  { %v1576_v36 = vpop.f32.mrb[12].mxu0 }
0x1661   :  { %v1381_v9 = vld [vmem:[#allocation2] sm:$0xff]  ;;  %v1578_v31 = vpop.f32.mrb[13].mxu0 }
0x1662   :  { %2849 = vmatmul.mubr.msk.f32.vlgmr.msra.gmra.mrb[8].mxu1 %vm181_vm3, %v1381_v9  ;;  %v1583_v55 = vrot.slane %v1578_v31, 2 }
0x1663   :  { %1487 = vmatprep.mubr.f32.mxu1 %v3531_v7  ;;  %3077 = vmatpush1.bf16.msra.mxu1 %v3967_v52 }
0x1664   :  { %3079 = vmatprep.subr.bf16.mxu1 %v3983_v63 }
0x1666   :  { %v1382_v15 = vld [vmem:[#allocation2 + $0x8] sm:$0xff] }
0x1667   :  { %2850 = vmatmul.mubr.msk.f32.gmra.mrb[10].mxu1 %vm181_vm3, %v1382_v15 }
0x1668   :  { %3081 = vmatpush1.bf16.msra.mxu1 %v3986_v1  ;;  %1716 = vmatprep.mubr.f32.mxu1 %v3531_v7 }
0x1669   :  { %3083 = vmatprep.subr.bf16.mxu1 %v4006_v11 }
0x166c   :  { %3085 = vmatpush1.bf16.msra.mxu1 %v4008_v3 }
0x166d   :  { %3087 = vmatprep.subr.bf16.mxu1 %v4024_v25 }
0x1670   :  { %3089 = vmatpush1.bf16.msra.mxu1 %v4026_v30 }
0x1671   :  { %3107 = vmatprep.subr.bf16.mxu1 %v3962_v28 }
0x1735   :  { %v1483_v32 = vpop.f32.mrb[8].mxu1 }
0x1736   :  { %v4082_v49 = vadd.f32 %v1483_v32, %v1404_v21  ;;  %v1485_v51 = vpop.f32.mrb[9].mxu1 }
0x1737   :  { %v4084_v13 = vadd.f32 %v1485_v51, %v1408_v27 }
0x1738   :  { %v1581_v53 = vadd.f32 %v1576_v36, %v4082_v49 }
0x173a   :  { %3337 = vtanh.f32 %v1581_v53  ;;  %v1489_v54 = vpop.f32.mrb[10].mxu1  ;;  %v2851_v62 = vmul.f32 -1.442695, %v1581_v53 }
0x173b   :  { %v4087_v56 = vadd.f32 %v1489_v54, %v1404_v21  ;;  %v1491_v57 = vpop.f32.mrb[11].mxu1 }
0x173c   :  { %v4089_v59 = vadd.f32 %v1491_v57, %v1408_v27 }
0x173e   :  { %v1585_v38 = vadd.f32 %v1583_v55, %v4089_v59 }
0x1740   :  { %3339 = vtanh.f32 %v1585_v38  ;;  %v2852_v0 = vmul.f32 -1.442695, %v1585_v38 }
0x1741   :  { %3341 = vpow2.f32 %v2851_v62 }
0x1742   :  { %3343 = vpow2.f32 %v2852_v0 }
0x1744   :  { %v3338_v34 = vpop.eup %3337 }
0x1745   :  { %1595 = vrot.lane.b32.xlu0 %v3338_v34, %s3532_s4 }
0x174a   :  { %v3340_v35 = vpop.eup %3339 }
0x174b   :  { %1619 = vrot.lane.b32.xlu1 %v3340_v35, %s3532_s4  ;;  %v3342_v5 = vpop.eup %3341 }
0x174c   :  { %v1589_v58 = vadd.f32 1.0, %v3342_v5  ;;  %v3344_v2 = vpop.eup %3343 }
0x174d   :  { %v1613_v4 = vadd.f32 1.0, %v3344_v2 }
0x174e   :  { %3345 = vrcp.f32 %v1589_v58 }
0x174f   :  { %3347 = vrcp.f32 %v1613_v4 }
0x1758   :  { %v3346_v17 = vpop.eup %3345 }
0x1759   :  { %v3348_v60 = vpop.eup %3347  ;;  %v1593_v18 = vmul.f32 0.0, %v3346_v17 }
0x175a   :  { %v1617_v46 = vmul.f32 0.0, %v3348_v60 }
0x17b7   :  { %v1596_v6 = vpop.permute.xlu0 %1595 }
0x17b8   :  { %v1598_v10 = vmul.f32 %v3346_v17, %v1596_v6 }
0x17ba   :  { %1600 = vrot.lane.b32.xlu0 %v1598_v10, %s3532_s4 }
0x17bd   :  { %v1620_v12 = vpop.permute.xlu1 %1619 }
0x17be   :  { %v1622_v14 = vmul.f32 %v3348_v60, %v1620_v12 }
0x17c0   :  { %1624 = vrot.lane.b32.xlu1 %v1622_v14, %s3532_s4 }
0x182c   :  { %v1601_v19 = vpop.permute.xlu0 %1600 }
0x182d   :  { %v4096_v20 = vadd.f32 %v1601_v19, %v1593_v18 }
0x182f   :  { %3349 = vtanh.f32 %v4096_v20  ;;  %v1739_v38 = vrot.slane %v4096_v20, 6 }
0x1832   :  { %v1625_v44 = vpop.permute.xlu1 %1624 }
0x1833   :  { %v1627_v22 = vadd.f32 %v1625_v44, %v1617_v46 }
0x1835   :  { %3351 = vtanh.f32 %v1627_v22  ;;  %v1766_v34 = vrot.slane %v1627_v22, 2 }
0x1839   :  { %v3350_v23 = vpop.eup %3349 }
0x183a   :  { %1606 = vrot.lane.b32.xlu0 %v3350_v23, %s3532_s4 }
0x183f   :  { %v3352_v24 = vpop.eup %3351 }
0x1840   :  { %1630 = vrot.lane.b32.xlu1 %v3352_v24, %s3532_s4 }
0x18ac   :  { %v1607_v26 = vpop.permute.xlu0 %1606 }
0x18ad   :  { %v1609_v29 = vmul.f32 %v3346_v17, %v1607_v26 }
0x18af   :  { %1635 = vrot.lane.b32.xlu1 %v1609_v29, %s3534_s11 }
0x18b2   :  { %v1631_v33 = vpop.permute.xlu1 %1630 }
0x18b3   :  { %v4102_v37 = vmul.f32 %v3348_v60, %v1631_v33 }
0x18b5   :  { %v1644_v39 = vrot.slane %v4102_v37, 6 }
0x18b7   :  { %1645 = vrot.lane.b32.xlu0 %v1644_v39, %s3533_s30 }
0x1921   :  { %v1636_v40 = vpop.permute.xlu1 %1635 }
0x1922   :  { %1638 = vst.msk [vmem:[#allocation2] sm:$0x3] %vm313_vm1, %v1636_v40 }
0x1929   :  { %v1646_v42 = vpop.permute.xlu0 %1645 }
0x192a   :  { %v1648_v43 = vsel %vm325_vm2, %v1636_v40, %v1646_v42 }
0x192b   :  { %2853 = vmatmul.mubr.msk.f32.vlgmr.msra.gmra.mrb[12].mxu1 %vm181_vm3, %v1648_v43 }
0x192c   :  { %3109 = vmatpush1.bf16.msra.mxu1 %v3967_v52  ;;  %2020 = vmatprep.mubr.f32.mxu1 %v3531_v7 }
0x192d   :  { %3111 = vmatprep.subr.bf16.mxu1 %v3983_v63 }
0x1930   :  { %3113 = vmatpush1.bf16.msra.mxu1 %v3986_v1 }
0x1931   :  { %3115 = vmatprep.subr.bf16.mxu1 %v4006_v11 }
0x1934   :  { %3117 = vmatpush1.bf16.msra.mxu1 %v4008_v3 }
0x1935   :  { %3119 = vmatprep.subr.bf16.mxu1 %v4024_v25 }
0x1938   :  { %3121 = vmatpush1.bf16.msra.mxu1 %v4026_v30 }
0x1939   :  { %3139 = vmatprep.subr.bf16.mxu1 %v3962_v28 }
0x19fe   :  { %v1718_v41 = vpop.f32.mrb[12].mxu1 }
0x19ff   :  { %v1724_v50 = vrot.slane %v1718_v41, 6  ;;  %v1720_v47 = vpop.f32.mrb[13].mxu1 }
0x1a00   :  { %v1728_v45 = vrot.slane %v1720_v47, 4 }
0x1a01   :  { %v1726_v8 = vadd.f32 %v1724_v50, %v4082_v49 }
0x1a02   :  { %v1730_v48 = vadd.f32 %v1728_v45, %v4089_v59 }
0x1a03   :  { %3353 = vtanh.f32 %v1726_v8  ;;  %v2854_v15 = vmul.f32 -1.442695, %v1726_v8 }
0x1a04   :  { %3355 = vtanh.f32 %v1730_v48  ;;  %v2855_v36 = vmul.f32 -1.442695, %v1730_v48 }
0x1a05   :  { %3357 = vpow2.f32 %v2854_v15 }
0x1a06   :  { %3359 = vpow2.f32 %v2855_v36 }
0x1a0d   :  { %v3354_v61 = vpop.eup %3353 }
0x1a0e   :  { %v3356_v9 = vpop.eup %3355  ;;  %1743 = vrot.lane.b32.xlu0 %v3354_v61, %s3532_s4 }
0x1a0f   :  { %1770 = vrot.lane.b32.xlu1 %v3356_v9, %s3532_s4  ;;  %v3358_v31 = vpop.eup %3357 }
0x1a10   :  { %v3360_v16 = vpop.eup %3359  ;;  %v1734_v21 = vadd.f32 1.0, %v3358_v31 }
0x1a11   :  { %v1761_v27 = vadd.f32 1.0, %v3360_v16 }
0x1a12   :  { %3361 = vrcp.f32 %v1734_v21 }
0x1a13   :  { %3363 = vrcp.f32 %v1761_v27 }
0x1a1c   :  { %v3362_v32 = vpop.eup %3361 }
0x1a1d   :  { %v3364_v53 = vpop.eup %3363  ;;  %v1741_v35 = vmul.f32 %v3362_v32, %v1739_v38 }
0x1a1e   :  { %v1768_v0 = vmul.f32 %v3364_v53, %v1766_v34 }
0x1a80   :  { %v1744_v51 = vpop.permute.xlu0 %1743 }
0x1a81   :  { %v1746_v54 = vmul.f32 %v3362_v32, %v1744_v51  ;;  %v1771_v55 = vpop.permute.xlu1 %1770 }
0x1a82   :  { %v1773_v57 = vmul.f32 %v3364_v53, %v1771_v55 }
0x1a83   :  { %1748 = vrot.lane.b32.xlu0 %v1746_v54, %s3532_s4 }
0x1a84   :  { %1775 = vrot.lane.b32.xlu1 %v1773_v57, %s3532_s4 }
0x1af5   :  { %v1749_v62 = vpop.permute.xlu0 %1748 }
0x1af6   :  { %v4125_v5 = vadd.f32 %v1749_v62, %v1741_v35  ;;  %v1776_v58 = vpop.permute.xlu1 %1775 }
0x1af7   :  { %v4127_v2 = vadd.f32 %v1776_v58, %v1768_v0 }
0x1af8   :  { %3365 = vtanh.f32 %v4125_v5  ;;  %v1891_v36 = vrot.slane %v4125_v5, 6 }
0x1af9   :  { %3367 = vtanh.f32 %v4127_v2  ;;  %v1918_v31 = vrot.slane %v4127_v2, 2 }
0x1b02   :  { %v3366_v4 = vpop.eup %3365 }
0x1b03   :  { %v3368_v17 = vpop.eup %3367  ;;  %1754 = vrot.lane.b32.xlu0 %v3366_v4, %s3532_s4 }
0x1b04   :  { %1781 = vrot.lane.b32.xlu1 %v3368_v17, %s3532_s4 }
0x1b75   :  { %v1755_v6 = vpop.permute.xlu0 %1754 }
0x1b76   :  { %v1757_v10 = vmul.f32 %v3362_v32, %v1755_v6  ;;  %v1782_v60 = vpop.permute.xlu1 %1781 }
0x1b77   :  { %v4133_v12 = vmul.f32 %v3364_v53, %v1782_v60 }
0x1b78   :  { %1786 = vrot.lane.b32.xlu1 %v1757_v10, %s3534_s11 }
0x1b79   :  { %v1795_v14 = vrot.slane %v4133_v12, 2 }
0x1b7b   :  { %1796 = vrot.lane.b32.xlu0 %v1795_v14, %s3533_s30 }
0x1bea   :  { %v1787_v18 = vpop.permute.xlu1 %1786 }
0x1beb   :  { %1789 = vst.msk [vmem:[#allocation2] sm:$0xc] %vm467_vm4, %v1787_v18 }
0x1bed   :  { %v1797_v19 = vpop.permute.xlu0 %1796 }
0x1bee   :  { %v1799_v20 = vsel %vm325_vm2, %v1787_v18, %v1797_v19 }
0x1bef   :  { %v1801_v46 = vrot.slane %v1799_v20, 2 }
0x1bf1   :  { %2856 = vmatmul.mubr.msk.f32.vlgmr.msra.gmra.mrb[14].mxu0 %vm181_vm3, %v1801_v46 }
0x1bf2   :  { %3125 = vmatpush1.bf16.msra.mxu0 %v3967_v52  ;;  %2169 = vmatprep.mubr.f32.mxu0 %v3531_v7 }
0x1bf3   :  { %3127 = vmatprep.subr.bf16.mxu0 %v3983_v63 }
0x1bf6   :  { %3129 = vmatpush1.bf16.msra.mxu0 %v3986_v1 }
0x1bf7   :  { %3131 = vmatprep.subr.bf16.mxu0 %v4006_v11 }
0x1bfa   :  { %3133 = vmatpush1.bf16.msra.mxu0 %v4008_v3 }
0x1bfb   :  { %3135 = vmatprep.subr.bf16.mxu0 %v4024_v25 }
0x1bfe   :  { %3137 = vmatpush1.bf16.msra.mxu0 %v4026_v30 }
0x1bff   :  { %3155 = vmatprep.subr.bf16.mxu0 %v3962_v28 }
0x1cc4   :  { %v1870_v44 = vpop.f32.mrb[14].mxu0 }
0x1cc5   :  { %v1876_v22 = vrot.slane %v1870_v44, 4  ;;  %v1872_v23 = vpop.f32.mrb[15].mxu0 }
0x1cc6   :  { %v1880_v24 = vrot.slane %v1872_v23, 6 }
0x1cc7   :  { %v1878_v26 = vadd.f32 %v1876_v22, %v4082_v49 }
0x1cc8   :  { %v1882_v29 = vadd.f32 %v1880_v24, %v4089_v59 }
0x1cc9   :  { %3369 = vtanh.f32 %v1878_v26  ;;  %v2857_v40 = vmul.f32 -1.442695, %v1878_v26 }
0x1cca   :  { %3371 = vtanh.f32 %v1882_v29  ;;  %v2858_v42 = vmul.f32 -1.442695, %v1882_v29 }
0x1ccb   :  { %3373 = vpow2.f32 %v2857_v40 }
0x1ccc   :  { %3375 = vpow2.f32 %v2858_v42 }
0x1cd3   :  { %v3370_v33 = vpop.eup %3369 }
0x1cd4   :  { %v3372_v39 = vpop.eup %3371  ;;  %1895 = vrot.lane.b32.xlu0 %v3370_v33, %s3532_s4 }
0x1cd5   :  { %1922 = vrot.lane.b32.xlu1 %v3372_v39, %s3532_s4  ;;  %v3374_v43 = vpop.eup %3373 }
0x1cd6   :  { %v3376_v41 = vpop.eup %3375  ;;  %v1886_v50 = vadd.f32 1.0, %v3374_v43 }
0x1cd7   :  { %v1913_v47 = vadd.f32 1.0, %v3376_v41 }
0x1cd8   :  { %3377 = vrcp.f32 %v1886_v50 }
0x1cd9   :  { %3379 = vrcp.f32 %v1913_v47 }
0x1ce2   :  { %v3378_v45 = vpop.eup %3377 }
0x1ce3   :  { %v3380_v48 = vpop.eup %3379  ;;  %v1893_v16 = vmul.f32 %v3378_v45, %v1891_v36 }
0x1ce4   :  { %v1920_v27 = vmul.f32 %v3380_v48, %v1918_v31 }
0x1d46   :  { %v1896_v8 = vpop.permute.xlu0 %1895 }
0x1d47   :  { %v1898_v61 = vmul.f32 %v3378_v45, %v1896_v8  ;;  %v1923_v9 = vpop.permute.xlu1 %1922 }
0x1d48   :  { %v1925_v15 = vmul.f32 %v3380_v48, %v1923_v9 }
0x1d49   :  { %1900 = vrot.lane.b32.xlu0 %v1898_v61, %s3532_s4 }
0x1d4a   :  { %1927 = vrot.lane.b32.xlu1 %v1925_v15, %s3532_s4 }
0x1dbb   :  { %v1901_v21 = vpop.permute.xlu0 %1900 }
0x1dbc   :  { %v4158_v32 = vadd.f32 %v1901_v21, %v1893_v16  ;;  %v1928_v51 = vpop.permute.xlu1 %1927 }
0x1dbd   :  { %v1930_v53 = vadd.f32 %v1928_v51, %v1920_v27 }
0x1dbe   :  { %3381 = vtanh.f32 %v4158_v32  ;;  %v2040_v39 = vrot.slane %v4158_v32, 6 }
0x1dbf   :  { %3383 = vtanh.f32 %v1930_v53  ;;  %v2067_v33 = vrot.slane %v1930_v53, 2 }
0x1dc8   :  { %v3382_v54 = vpop.eup %3381 }
0x1dc9   :  { %v3384_v55 = vpop.eup %3383  ;;  %1906 = vrot.lane.b32.xlu0 %v3382_v54, %s3532_s4 }
0x1dca   :  { %1933 = vrot.lane.b32.xlu1 %v3384_v55, %s3532_s4 }
0x1e3b   :  { %v1907_v57 = vpop.permute.xlu0 %1906 }
0x1e3c   :  { %v1909_v38 = vmul.f32 %v3378_v45, %v1907_v57  ;;  %v1934_v34 = vpop.permute.xlu1 %1933 }
0x1e3d   :  { %v4163_v35 = vmul.f32 %v3380_v48, %v1934_v34 }
0x1e3e   :  { %1938 = vrot.lane.b32.xlu1 %v1909_v38, %s3534_s11 }
0x1e3f   :  { %v1947_v62 = vrot.slane %v4163_v35, 6 }
0x1e41   :  { %1948 = vrot.lane.b32.xlu0 %v1947_v62, %s3533_s30 }
0x1eb0   :  { %v1939_v0 = vpop.permute.xlu1 %1938 }
0x1eb1   :  { %1941 = vst.msk [vmem:[#allocation2] sm:$0x30] %vm621_vm5, %v1939_v0 }
0x1eb3   :  { %v1949_v5 = vpop.permute.xlu0 %1948 }
0x1eb4   :  { %v1951_v58 = vsel %vm325_vm2, %v1939_v0, %v1949_v5 }
0x1eb5   :  { %v1953_v2 = vrot.slane %v1951_v58, 4 }
0x1eb7   :  { %2859 = vmatmul.mubr.msk.f32.vlgmr.msra.gmra.mrb[14].mxu1 %vm181_vm3, %v1953_v2 }
0x1eb8   :  { %3141 = vmatpush1.bf16.msra.mxu1 %v3967_v52  ;;  %2317 = vmatprep.mubr.f32.mxu1 %v3531_v7 }
0x1eb9   :  { %3143 = vmatprep.subr.bf16.mxu1 %v3983_v63 }
0x1ebc   :  { %3145 = vmatpush1.bf16.msra.mxu1 %v3986_v1 }
0x1ebd   :  { %3147 = vmatprep.subr.bf16.mxu1 %v4006_v11 }
0x1ec0   :  { %3149 = vmatpush1.bf16.msra.mxu1 %v4008_v3 }
0x1ec1   :  { %3151 = vmatprep.subr.bf16.mxu1 %v4024_v25 }
0x1ec4   :  { %3153 = vmatpush1.bf16.msra.mxu1 %v4026_v30 }
0x1ec5   :  { %3171 = vmatprep.subr.bf16.mxu1 %v3962_v28 }
0x1f8a   :  { %v2022_v4 = vpop.f32.mrb[14].mxu1 }
0x1f8b   :  { %v2028_v17 = vrot.slane %v2022_v4, 2  ;;  %v2024_v6 = vpop.f32.mrb[15].mxu1 }
0x1f8c   :  { %v2031_v10 = vadd.f32 %v2024_v6, %v4089_v59 }
0x1f8d   :  { %v2030_v60 = vadd.f32 %v2028_v17, %v4082_v49 }
0x1f8e   :  { %3385 = vtanh.f32 %v2031_v10  ;;  %v2861_v19 = vmul.f32 -1.442695, %v2031_v10 }
0x1f8f   :  { %3387 = vtanh.f32 %v2030_v60  ;;  %v2860_v20 = vmul.f32 -1.442695, %v2030_v60 }
0x1f90   :  { %3389 = vpow2.f32 %v2861_v19 }
0x1f91   :  { %3391 = vpow2.f32 %v2860_v20 }
0x1f98   :  { %v3386_v14 = vpop.eup %3385 }
0x1f99   :  { %v3388_v18 = vpop.eup %3387  ;;  %2071 = vrot.lane.b32.xlu1 %v3386_v14, %s3532_s4 }
0x1f9a   :  { %2044 = vrot.lane.b32.xlu0 %v3388_v18, %s3532_s4  ;;  %v3390_v28 = vpop.eup %3389 }
0x1f9b   :  { %v3392_v46 = vpop.eup %3391  ;;  %v2062_v44 = vadd.f32 1.0, %v3390_v28 }
0x1f9c   :  { %v2035_v22 = vadd.f32 1.0, %v3392_v46 }
0x1f9d   :  { %3393 = vrcp.f32 %v2062_v44 }
0x1f9e   :  { %3395 = vrcp.f32 %v2035_v22 }
0x1fa7   :  { %v3394_v59 = vpop.eup %3393 }
0x1fa8   :  { %v3396_v23 = vpop.eup %3395  ;;  %v2069_v40 = vmul.f32 %v3394_v59, %v2067_v33 }
0x1fa9   :  { %v2042_v43 = vmul.f32 %v3396_v23, %v2040_v39 }
0x200b   :  { %v2072_v49 = vpop.permute.xlu1 %2071 }
0x200c   :  { %v2074_v24 = vmul.f32 %v3394_v59, %v2072_v49  ;;  %v2045_v26 = vpop.permute.xlu0 %2044 }
0x200d   :  { %v2047_v29 = vmul.f32 %v3396_v23, %v2045_v26 }
0x200e   :  { %2076 = vrot.lane.b32.xlu1 %v2074_v24, %s3532_s4 }
0x200f   :  { %2049 = vrot.lane.b32.xlu0 %v2047_v29, %s3532_s4 }
0x2080   :  { %v2077_v42 = vpop.permute.xlu1 %2076 }
0x2081   :  { %v4187_v41 = vadd.f32 %v2077_v42, %v2069_v40  ;;  %v2050_v50 = vpop.permute.xlu0 %2049 }
0x2082   :  { %v2052_v47 = vadd.f32 %v2050_v50, %v2042_v43 }
0x2083   :  { %3397 = vtanh.f32 %v4187_v41  ;;  %v2216_v20 = vrot.slane %v4187_v41, 2 }
0x2084   :  { %3399 = vtanh.f32 %v2052_v47  ;;  %v2189_v18 = vrot.slane %v2052_v47, 6 }
0x208d   :  { %v3398_v45 = vpop.eup %3397 }
0x208e   :  { %v3400_v8 = vpop.eup %3399  ;;  %2082 = vrot.lane.b32.xlu1 %v3398_v45, %s3532_s4 }
0x208f   :  { %2055 = vrot.lane.b32.xlu0 %v3400_v8, %s3532_s4 }
0x2100   :  { %v2083_v48 = vpop.permute.xlu1 %2082 }
0x2101   :  { %v4192_v61 = vmul.f32 %v3394_v59, %v2083_v48  ;;  %v2056_v9 = vpop.permute.xlu0 %2055 }
0x2102   :  { %v2058_v15 = vmul.f32 %v3396_v23, %v2056_v9 }
0x2103   :  { %v2096_v36 = vrot.slane %v4192_v61, 2 }
0x2104   :  { %2087 = vrot.lane.b32.xlu1 %v2058_v15, %s3534_s11 }
0x2105   :  { %2097 = vrot.lane.b32.xlu0 %v2096_v36, %s3533_s30 }
0x2176   :  { %v2088_v31 = vpop.permute.xlu1 %2087 }
0x2177   :  { %2090 = vst.msk [vmem:[#allocation2] sm:$0xc0] %vm772_vm6, %v2088_v31  ;;  %v2098_v16 = vpop.permute.xlu0 %2097 }
0x2178   :  { %v2100_v21 = vsel %vm325_vm2, %v2088_v31, %v2098_v16 }
0x2179   :  { %v2102_v27 = vrot.slane %v2100_v21, 6 }
0x217b   :  { %2862 = vmatmul.mubr.msk.f32.vlgmr.msra.gmra.mrb[16].mxu0 %vm181_vm3, %v2102_v27 }
0x217c   :  { %3157 = vmatpush1.bf16.msra.mxu0 %v3967_v52  ;;  %2469 = vmatprep.mubr.f32.mxu0 %v3531_v7 }
0x217d   :  { %3159 = vmatprep.subr.bf16.mxu0 %v3983_v63 }
0x2180   :  { %3161 = vmatpush1.bf16.msra.mxu0 %v3986_v1 }
0x2181   :  { %3163 = vmatprep.subr.bf16.mxu0 %v4006_v11 }
0x2184   :  { %3165 = vmatpush1.bf16.msra.mxu0 %v4008_v3 }
0x2185   :  { %3167 = vmatprep.subr.bf16.mxu0 %v4024_v25 }
0x2188   :  { %3169 = vmatpush1.bf16.msra.mxu0 %v4026_v30 }
0x224e   :  { %v2171_v32 = vpop.f32.mrb[16].mxu0 }
0x224f   :  { %v2176_v51 = vadd.f32 %v2171_v32, %v4087_v56  ;;  %v2173_v53 = vpop.f32.mrb[17].mxu0 }
0x2250   :  { %v2178_v54 = vrot.slane %v2173_v53, 2 }
0x2251   :  { %3401 = vtanh.f32 %v2176_v51  ;;  %v2863_v34 = vmul.f32 -1.442695, %v2176_v51 }
0x2252   :  { %v2180_v55 = vadd.f32 %v2178_v54, %v4084_v13 }
0x2254   :  { %3403 = vtanh.f32 %v2180_v55  ;;  %v2864_v62 = vmul.f32 -1.442695, %v2180_v55 }
0x2255   :  { %3405 = vpow2.f32 %v2863_v34 }
0x2256   :  { %3407 = vpow2.f32 %v2864_v62 }
0x225b   :  { %v3402_v57 = vpop.eup %3401 }
0x225c   :  { %2193 = vrot.lane.b32.xlu0 %v3402_v57, %s3532_s4 }
0x225e   :  { %v3404_v38 = vpop.eup %3403 }
0x225f   :  { %2220 = vrot.lane.b32.xlu1 %v3404_v38, %s3532_s4  ;;  %v3406_v0 = vpop.eup %3405 }
0x2260   :  { %v3408_v5 = vpop.eup %3407  ;;  %v2184_v58 = vadd.f32 1.0, %v3406_v0 }
0x2261   :  { %v2211_v2 = vadd.f32 1.0, %v3408_v5 }
0x2262   :  { %3409 = vrcp.f32 %v2184_v58 }
0x2263   :  { %3411 = vrcp.f32 %v2211_v2 }
0x226c   :  { %v3410_v4 = vpop.eup %3409 }
0x226d   :  { %v3412_v10 = vpop.eup %3411  ;;  %v2191_v19 = vmul.f32 %v3410_v4, %v2189_v18 }
0x226e   :  { %v2218_v44 = vmul.f32 %v3412_v10, %v2216_v20 }
0x22ce   :  { %v2194_v17 = vpop.permute.xlu0 %2193 }
0x22cf   :  { %v2196_v6 = vmul.f32 %v3410_v4, %v2194_v17 }
0x22d1   :  { %2198 = vrot.lane.b32.xlu0 %v2196_v6, %s3532_s4  ;;  %v2221_v60 = vpop.permute.xlu1 %2220 }
0x22d2   :  { %v2223_v14 = vmul.f32 %v3412_v10, %v2221_v60 }
0x22d4   :  { %2225 = vrot.lane.b32.xlu1 %v2223_v14, %s3532_s4 }
0x2343   :  { %v2199_v28 = vpop.permute.xlu0 %2198 }
0x2344   :  { %v2201_v46 = vadd.f32 %v2199_v28, %v2191_v19 }
0x2346   :  { %3413 = vtanh.f32 %v2201_v46  ;;  %v2226_v22 = vpop.permute.xlu1 %2225  ;;  %v2340_v32 = vrot.slane %v2201_v46, 6 }
0x2347   :  { %v2228_v59 = vadd.f32 %v2226_v22, %v2218_v44 }
0x2349   :  { %3415 = vtanh.f32 %v2228_v59  ;;  %v2367_v51 = vrot.slane %v2228_v59, 2 }
0x2350   :  { %v3414_v49 = vpop.eup %3413 }
0x2351   :  { %2204 = vrot.lane.b32.xlu0 %v3414_v49, %s3532_s4 }
0x2353   :  { %v3416_v23 = vpop.eup %3415 }
0x2354   :  { %2231 = vrot.lane.b32.xlu1 %v3416_v23, %s3532_s4 }
0x23c3   :  { %v2205_v24 = vpop.permute.xlu0 %2204 }
0x23c4   :  { %v2207_v26 = vmul.f32 %v3410_v4, %v2205_v24 }
0x23c6   :  { %2236 = vrot.lane.b32.xlu1 %v2207_v26, %s3534_s11  ;;  %v2232_v29 = vpop.permute.xlu1 %2231 }
0x23c7   :  { %v4218_v33 = vmul.f32 %v3412_v10, %v2232_v29 }
0x23c9   :  { %v2245_v39 = vrot.slane %v4218_v33, 6 }
0x23cb   :  { %2246 = vrot.lane.b32.xlu0 %v2245_v39, %s3533_s30 }
0x2438   :  { %v4222_v40 = vpop.permute.xlu1 %2236 }
0x243d   :  { %v2247_v42 = vpop.permute.xlu0 %2246 }
0x243e   :  { %v2249_v43 = vsel %vm325_vm2, %v4222_v40, %v2247_v42 }
0x243f   :  { %2865 = vmatmul.mubr.msk.f32.vlgmr.msra.gmra.mrb[16].mxu1 %vm181_vm3, %v2249_v43 }
0x2440   :  { %3173 = vmatpush1.bf16.msra.mxu1 %v3967_v52  ;;  %2621 = vmatprep.mubr.f32.mxu1 %v3531_v7 }
0x2441   :  { %3175 = vmatprep.subr.bf16.mxu1 %v3983_v63 }
0x2444   :  { %3177 = vmatpush1.bf16.msra.mxu1 %v3986_v1 }
0x2445   :  { %3179 = vmatprep.subr.bf16.mxu1 %v4006_v11 }
0x2448   :  { %3181 = vmatpush1.bf16.msra.mxu1 %v4008_v3 }
0x2449   :  { %3183 = vmatprep.subr.bf16.mxu1 %v4024_v25 }
0x244c   :  { %3185 = vmatpush1.bf16.msra.mxu1 %v4026_v30 }
0x2512   :  { %v2319_v41 = vpop.f32.mrb[16].mxu1 }
0x2513   :  { %v2325_v50 = vrot.slane %v2319_v41, 6  ;;  %v2321_v47 = vpop.f32.mrb[17].mxu1 }
0x2514   :  { %v2329_v45 = vrot.slane %v2321_v47, 4 }
0x2515   :  { %v2327_v52 = vadd.f32 %v2325_v50, %v4087_v56 }
0x2516   :  { %v2331_v8 = vadd.f32 %v2329_v45, %v4084_v13 }
0x2517   :  { %3417 = vtanh.f32 %v2327_v52  ;;  %v2866_v11 = vmul.f32 -1.442695, %v2327_v52 }
0x2518   :  { %3419 = vtanh.f32 %v2331_v8  ;;  %v2867_v3 = vmul.f32 -1.442695, %v2331_v8 }
0x2519   :  { %3421 = vpow2.f32 %v2866_v11 }
0x251a   :  { %3423 = vpow2.f32 %v2867_v3 }
0x2521   :  { %v3418_v63 = vpop.eup %3417 }
0x2522   :  { %v3420_v1 = vpop.eup %3419  ;;  %2344 = vrot.lane.b32.xlu0 %v3418_v63, %s3532_s4 }
0x2523   :  { %2371 = vrot.lane.b32.xlu1 %v3420_v1, %s3532_s4  ;;  %v3422_v25 = vpop.eup %3421 }
0x2524   :  { %v3424_v30 = vpop.eup %3423  ;;  %v2335_v48 = vadd.f32 1.0, %v3422_v25 }
0x2525   :  { %v2362_v9 = vadd.f32 1.0, %v3424_v30 }
0x2526   :  { %3425 = vrcp.f32 %v2335_v48 }
0x2527   :  { %3427 = vrcp.f32 %v2362_v9 }
0x2530   :  { %v3426_v15 = vpop.eup %3425 }
0x2531   :  { %v3428_v31 = vpop.eup %3427  ;;  %v2342_v53 = vmul.f32 %v3426_v15, %v2340_v32 }
0x2532   :  { %v2369_v55 = vmul.f32 %v3428_v31, %v2367_v51 }
0x2594   :  { %v2345_v36 = vpop.permute.xlu0 %2344 }
0x2595   :  { %v2347_v16 = vmul.f32 %v3426_v15, %v2345_v36  ;;  %v2372_v21 = vpop.permute.xlu1 %2371 }
0x2596   :  { %v2374_v27 = vmul.f32 %v3428_v31, %v2372_v21 }
0x2597   :  { %2349 = vrot.lane.b32.xlu0 %v2347_v16, %s3532_s4 }
0x2598   :  { %2376 = vrot.lane.b32.xlu1 %v2374_v27, %s3532_s4 }
0x2609   :  { %v2350_v54 = vpop.permute.xlu0 %2349 }
0x260a   :  { %v2352_v57 = vadd.f32 %v2350_v54, %v2342_v53  ;;  %v2377_v38 = vpop.permute.xlu1 %2376 }
0x260b   :  { %v2379_v34 = vadd.f32 %v2377_v38, %v2369_v55 }
0x260c   :  { %3429 = vtanh.f32 %v2352_v57  ;;  %v2492_v52 = vrot.slane %v2352_v57, 6 }
0x260d   :  { %3431 = vtanh.f32 %v2379_v34  ;;  %v2519_v8 = vrot.slane %v2379_v34, 2 }
0x2616   :  { %v3430_v62 = vpop.eup %3429 }
0x2617   :  { %v3432_v0 = vpop.eup %3431  ;;  %2355 = vrot.lane.b32.xlu0 %v3430_v62, %s3532_s4 }
0x2618   :  { %2382 = vrot.lane.b32.xlu1 %v3432_v0, %s3532_s4 }
0x2689   :  { %v2356_v5 = vpop.permute.xlu0 %2355 }
0x268a   :  { %v2358_v58 = vmul.f32 %v3426_v15, %v2356_v5  ;;  %v2383_v2 = vpop.permute.xlu1 %2382 }
0x268b   :  { %v4243_v4 = vmul.f32 %v3428_v31, %v2383_v2 }
0x268c   :  { %2387 = vrot.lane.b32.xlu1 %v2358_v58, %s3534_s11 }
0x268d   :  { %v2396_v17 = vrot.slane %v4243_v4, 2 }
0x268f   :  { %2397 = vrot.lane.b32.xlu0 %v2396_v17, %s3533_s30 }
0x26fe   :  { %v4248_v6 = vpop.permute.xlu1 %2387 }
0x2701   :  { %v2398_v10 = vpop.permute.xlu0 %2397 }
0x2702   :  { %v2400_v60 = vsel %vm325_vm2, %v4248_v6, %v2398_v10 }
0x2703   :  { %v2402_v14 = vrot.slane %v2400_v60, 2 }
0x2705   :  { %2868 = vmatmul.mubr.msk.f32.vlgmr.msra.gmra.mrb[18].mxu0 %vm181_vm3, %v2402_v14 }
0x2706   :  { %2907 = vmatprep.mubr.msk.f32.mxu0 %vm3536_vm11, %v3531_v7 }
0x27d8   :  { %v2471_v18 = vpop.f32.mrb[18].mxu0 }
0x27d9   :  { %v2477_v19 = vrot.slane %v2471_v18, 4  ;;  %v2473_v20 = vpop.f32.mrb[19].mxu0 }
0x27da   :  { %v2481_v28 = vrot.slane %v2473_v20, 6 }
0x27db   :  { %v2479_v46 = vadd.f32 %v2477_v19, %v4087_v56 }
0x27dc   :  { %v2483_v44 = vadd.f32 %v2481_v28, %v4084_v13 }
0x27dd   :  { %3433 = vtanh.f32 %v2479_v46  ;;  %v2869_v49 = vmul.f32 -1.442695, %v2479_v46 }
0x27de   :  { %3435 = vtanh.f32 %v2483_v44  ;;  %v2870_v23 = vmul.f32 -1.442695, %v2483_v44 }
0x27df   :  { %3437 = vpow2.f32 %v2869_v49 }
0x27e0   :  { %3439 = vpow2.f32 %v2870_v23 }
0x27e7   :  { %v3434_v22 = vpop.eup %3433 }
0x27e8   :  { %v3436_v59 = vpop.eup %3435  ;;  %2496 = vrot.lane.b32.xlu0 %v3434_v22, %s3532_s4 }
0x27e9   :  { %2523 = vrot.lane.b32.xlu1 %v3436_v59, %s3532_s4  ;;  %v3438_v24 = vpop.eup %3437 }
0x27ea   :  { %v3440_v26 = vpop.eup %3439  ;;  %v2487_v29 = vadd.f32 1.0, %v3438_v24 }
0x27eb   :  { %v2514_v39 = vadd.f32 1.0, %v3440_v26 }
0x27ec   :  { %3441 = vrcp.f32 %v2487_v29 }
0x27ed   :  { %3443 = vrcp.f32 %v2514_v39  ;;  %v2713_v39 = vld [vmem:[%s4359_s8] sm:$0xff] }
0x27f6   :  { %v3442_v42 = vpop.eup %3441 }
0x27f7   :  { %v3444_v41 = vpop.eup %3443  ;;  %v2494_v63 = vmul.f32 %v3442_v42, %v2492_v52 }
0x27f8   :  { %v2521_v11 = vmul.f32 %v3444_v41, %v2519_v8 }
0x285a   :  { %v2497_v43 = vpop.permute.xlu0 %2496 }
0x285b   :  { %v2499_v50 = vmul.f32 %v3442_v42, %v2497_v43  ;;  %v2524_v47 = vpop.permute.xlu1 %2523  ;;  %v3535_v43 = vmov 0.0|0.0  }
0x285c   :  { %v2526_v45 = vmul.f32 %v3444_v41, %v2524_v47  ;;  %3186 = vmatprep.subr.bf16.mxu0 %v3535_v43  ;;  %v2720_v47 = vld [vmem:[%s4359_s8 + $0x38] sm:$0xff] }
0x285d   :  { %2501 = vrot.lane.b32.xlu0 %v2499_v50, %s3532_s4  ;;  %v2719_v50 = vld [vmem:[%s4359_s8 + $0x30] sm:$0xff] }
0x285e   :  { %2528 = vrot.lane.b32.xlu1 %v2526_v45, %s3532_s4  ;;  %v3196_v45 = vpack.c.bf16 %v2720_v47, %v2719_v50 }
0x28cf   :  { %v2502_v1 = vpop.permute.xlu0 %2501 }
0x28d0   :  { %v2504_v3 = vadd.f32 %v2502_v1, %v2494_v63  ;;  %v2529_v25 = vpop.permute.xlu1 %2528 }
0x28d1   :  { %v2531_v30 = vadd.f32 %v2529_v25, %v2521_v11 }
0x28d2   :  { %3445 = vtanh.f32 %v2504_v3  ;;  %v2641_v46 = vrot.slane %v2504_v3, 6 }
0x28d3   :  { %3447 = vtanh.f32 %v2531_v30  ;;  %v2668_v28 = vrot.slane %v2531_v30, 2 }
0x28dc   :  { %v3446_v48 = vpop.eup %3445 }
0x28dd   :  { %v3448_v9 = vpop.eup %3447  ;;  %2507 = vrot.lane.b32.xlu0 %v3446_v48, %s3532_s4 }
0x28de   :  { %2534 = vrot.lane.b32.xlu1 %v3448_v9, %s3532_s4 }
0x294f   :  { %v2508_v15 = vpop.permute.xlu0 %2507 }
0x2950   :  { %v2510_v36 = vmul.f32 %v3442_v42, %v2508_v15  ;;  %v2535_v31 = vpop.permute.xlu1 %2534  ;;  %v2714_v42 = vld [vmem:[%s4359_s8 + $0x8] sm:$0xff] }
0x2951   :  { %v4261_v16 = vmul.f32 %v3444_v41, %v2535_v31  ;;  %v3187_v41 = vpack.c.bf16 %v2714_v42, %v2713_v39 }
0x2952   :  { %2539 = vrot.lane.b32.xlu1 %v2510_v36, %s3534_s11 }
0x2953   :  { %v2548_v21 = vrot.slane %v4261_v16, 6  ;;  %3188 = vmatpush3.bf16.msra.mxu0 %v3187_v41 }
0x2954   :  { %3189 = vmatprep.subr.bf16.mxu0 %v3535_v43 }
0x2955   :  { %2549 = vrot.lane.b32.xlu0 %v2548_v21, %s3533_s30  ;;  %v2880_v21 = vld [vmem:[%s4360_s9] ss:$0 sm:$0xff] }
0x29c4   :  { %v4266_v27 = vpop.permute.xlu1 %2539 }
0x29c7   :  { %v2550_v32 = vpop.permute.xlu0 %2549 }
0x29c8   :  { %v2552_v51 = vsel %vm325_vm2, %v4266_v27, %v2550_v32 }
0x29c9   :  { %v2554_v53 = vrot.slane %v2552_v51, 4 }
0x29cb   :  { %2871 = vmatmul.mubr.msk.f32.vlgmr.msra.gmra.mrb[18].mxu1 %vm181_vm3, %v2554_v53 }
0x2a9e   :  { %v2623_v54 = vpop.f32.mrb[18].mxu1 }
0x2a9f   :  { %v2629_v55 = vrot.slane %v2623_v54, 2  ;;  %v2625_v57 = vpop.f32.mrb[19].mxu1 }
0x2aa0   :  { %v2632_v38 = vadd.f32 %v2625_v57, %v4084_v13 }
0x2aa1   :  { %v2631_v34 = vadd.f32 %v2629_v55, %v4087_v56 }
0x2aa2   :  { %3449 = vtanh.f32 %v2632_v38  ;;  %v2873_v5 = vmul.f32 -1.442695, %v2632_v38 }
0x2aa3   :  { %3451 = vtanh.f32 %v2631_v34  ;;  %v2872_v58 = vmul.f32 -1.442695, %v2631_v34 }
0x2aa4   :  { %3453 = vpow2.f32 %v2873_v5 }
0x2aa5   :  { %3455 = vpow2.f32 %v2872_v58 }
0x2aac   :  { %v3450_v62 = vpop.eup %3449 }
0x2aad   :  { %v3452_v0 = vpop.eup %3451  ;;  %2672 = vrot.lane.b32.xlu0 %v3450_v62, %s3532_s4 }
0x2aae   :  { %2645 = vrot.lane.b32.xlu1 %v3452_v0, %s3532_s4  ;;  %v3454_v2 = vpop.eup %3453 }
0x2aaf   :  { %v3456_v17 = vpop.eup %3455  ;;  %v2663_v10 = vadd.f32 1.0, %v3454_v2 }
0x2ab0   :  { %v2636_v60 = vadd.f32 1.0, %v3456_v17 }
0x2ab1   :  { %3457 = vrcp.f32 %v2663_v10 }
0x2ab2   :  { %3459 = vrcp.f32 %v2636_v60 }
0x2abb   :  { %v3458_v13 = vpop.eup %3457 }
0x2abc   :  { %v3460_v14 = vpop.eup %3459  ;;  %v2670_v44 = vmul.f32 %v3458_v13, %v2668_v28 }
0x2abd   :  { %v2643_v59 = vmul.f32 %v3460_v14, %v2641_v46 }
0x2b1f   :  { %v2673_v56 = vpop.permute.xlu0 %2672 }
0x2b20   :  { %v2675_v18 = vmul.f32 %v3458_v13, %v2673_v56  ;;  %v2646_v19 = vpop.permute.xlu1 %2645 }
0x2b21   :  { %v2648_v20 = vmul.f32 %v3460_v14, %v2646_v19 }
0x2b22   :  { %2677 = vrot.lane.b32.xlu0 %v2675_v18, %s3532_s4 }
0x2b23   :  { %2650 = vrot.lane.b32.xlu1 %v2648_v20, %s3532_s4 }
0x2b94   :  { %v2678_v22 = vpop.permute.xlu0 %2677 }
0x2b95   :  { %v2680_v49 = vadd.f32 %v2678_v22, %v2670_v44  ;;  %v2651_v23 = vpop.permute.xlu1 %2650 }
0x2b96   :  { %v2653_v24 = vadd.f32 %v2651_v23, %v2643_v59 }
0x2b97   :  { %3461 = vtanh.f32 %v2680_v49 }
0x2b98   :  { %3463 = vtanh.f32 %v2653_v24 }
0x2ba1   :  { %v3462_v26 = vpop.eup %3461 }
0x2ba2   :  { %v3464_v29 = vpop.eup %3463  ;;  %2683 = vrot.lane.b32.xlu0 %v3462_v26, %s3532_s4 }
0x2ba3   :  { %2656 = vrot.lane.b32.xlu1 %v3464_v29, %s3532_s4 }
0x2ba6   :  { %1791 = vrot.lane.b32.xlu0 %v4133_v12, %s3533_s30  ;;  %v2716_v12 = vld [vmem:[%s4359_s8 + $0x18] sm:$0xff] }
0x2ba7   :  { %1640 = vrot.lane.b32.xlu1 %v4102_v37, %s3533_s30  ;;  %v2715_v37 = vld [vmem:[%s4359_s8 + $0x10] sm:$0xff] }
0x2baa   :  { %2092 = vrot.lane.b32.xlu0 %v4192_v61, %s3533_s30  ;;  %v3190_v61 = vpack.c.bf16 %v2716_v12, %v2715_v37 }
0x2bab   :  { %1943 = vrot.lane.b32.xlu1 %v4163_v35, %s3533_s30  ;;  %v2717_v35 = vld [vmem:[%s4359_s8 + $0x20] sm:$0xff] }
0x2bac   :  { %3191 = vmatpush3.bf16.msra.mxu0 %v3190_v61 }
0x2bad   :  { %3192 = vmatprep.subr.bf16.mxu0 %v3535_v43 }
0x2bae   :  { %2392 = vrot.lane.b32.xlu0 %v4243_v4, %s3533_s30 }
0x2baf   :  { %2241 = vrot.lane.b32.xlu1 %v4218_v33, %s3533_s30  ;;  %v2718_v33 = vld [vmem:[%s4359_s8 + $0x28] sm:$0xff]  ;;  %s2876_s8 = sld [smem:[#allocation3 + $0x1]] }
0x2bb0   :  { %v3193_v4 = vpack.c.bf16 %v2718_v33, %v2717_v35 }
0x2bb2   :  { %3194 = vmatpush3.bf16.msra.mxu0 %v3193_v4 }
0x2bb3   :  { %2544 = vrot.lane.b32.xlu1 %v4261_v16, %s3533_s30  ;;  %3195 = vmatprep.subr.bf16.mxu0 %v3535_v43 }
0x2bb6   :  { %3197 = vmatpush3.bf16.msra.mxu0 %v3196_v45 }
0x2c14   :  { %v2684_v52 = vpop.permute.xlu0 %2683 }
0x2c15   :  { %v2686_v8 = vmul.f32 %v3458_v13, %v2684_v52  ;;  %v2657_v63 = vpop.permute.xlu1 %2656 }
0x2c16   :  { %v2659_v1 = vmul.f32 %v3460_v14, %v2657_v63 }
0x2c17   :  { %2693 = vrot.lane.b32.xlu1 %v2686_v8, %s3533_s30  ;;  %s2697_s30 = sld [smem:[#allocation3]] }
0x2c18   :  { %2688 = vrot.lane.b32.xlu0 %v2659_v1, %s3534_s11  ;;  %v1792_v11 = vpop.permute.xlu0 %1791  ;;  %s2877_s11 = sadd.s32 4294967295, %s2876_s8 }
0x2c19   :  { %1794 = vst.msk [vmem:[#allocation2 + $0x8] sm:$0x30] %vm473_vm8, %v1792_v11  ;;  %v1641_v3 = vpop.permute.xlu1 %1640  ;;  %s2878_s14 = sshll.u32 %s2877_s11, 1 }
0x2c1a   :  { %2542 = vst.msk [vmem:[#allocation2 + $0x8] sm:$0x30] %vm621_vm5, %v4266_v27  ;;  %s2822_s16 = scalar_lea.vmem [#allocation2], %s2878_s14 }
0x2c1b   :  { %1643 = vst.msk [vmem:[#allocation2 + $0x8] sm:$0xc0] %vm319_vm7, %v1641_v3 }
0x2c1c   :  { %v2093_v7 = vpop.permute.xlu0 %2092 }
0x2c1d   :  { %2095 = vst.msk [vmem:[#allocation2 + $0x8] sm:$0x3] %vm778_vm10, %v2093_v7  ;;  %v1944_v25 = vpop.permute.xlu1 %1943  ;;  %s2874_s13 = sadd.s32 4294967295, %s2697_s30 }
0x2c1e   :  { %2239 = vst.msk [vmem:[#allocation2 + $0x8] sm:$0x3] %vm313_vm1, %v4222_v40  ;;  %s2875_s15 = sshll.u32 %s2874_s13, 1 }
0x2c1f   :  { %1946 = vst.msk [vmem:[#allocation2 + $0x8] sm:$0xc] %vm627_vm9, %v1944_v25  ;;  %s2700_s6 = scalar_lea.vmem [#allocation2], %s2875_s15 }
0x2c20   :  { %2390 = vst.msk [vmem:[#allocation2 + $0x8] sm:$0xc] %vm467_vm4, %v4248_v6  ;;  %v2393_v30 = vpop.permute.xlu0 %2392 }
0x2c21   :  { %2395 = vst.msk [vmem:[#allocation2] sm:$0x30] %vm473_vm8, %v2393_v30  ;;  %v2242_v48 = vpop.permute.xlu1 %2241 }
0x2c22   :  { %2244 = vst.msk [vmem:[#allocation2] sm:$0xc0] %vm319_vm7, %v2242_v48 }
0x2c25   :  { %v2545_v9 = vpop.permute.xlu1 %2544 }
0x2c26   :  { %2547 = vst.msk [vmem:[#allocation2] sm:$0xc] %vm627_vm9, %v2545_v9 }
0x2c89   :  { %v2694_v15 = vpop.permute.xlu1 %2693 }
0x2c8a   :  { %2696 = vst.msk [vmem:[#allocation2] sm:$0x3] %vm778_vm10, %v2694_v15  ;;  %v2689_v40 = vpop.permute.xlu0 %2688 }
0x2c8b   :  { %2691 = vst.msk [vmem:[#allocation2 + $0x8] sm:$0xc0] %vm772_vm6, %v2689_v40 }
0x2c92   :  { %v2879_v6 = vld [vmem:[%s2822_s16 + $0x1] sm:$0x1]  ;;  %v2701_v31 = vld [vmem:[%s2700_s6] sm:$0x1] }
0x2c93   :  { %v2709_v36 = vrot.slane %v2879_v6, 7 }
0x2c95   :  { %v2712_v16 = vsel %vm2711_vm12, %v2701_v31, %v2709_v36 }
0x2c96   :  { %2908 = vmatmul.mubr.msk.f32.vlgmr.msra.gmra.mrb[20].mxu0 %vm181_vm3, %v2712_v16 }
0x2d69   :  { %v2797_v27 = vpop.f32.mrb[20].mxu0 }
0x2d6a   :  { %v2798_v32 = vadd.f32 %v2880_v21, %v2797_v27  ;;  %v2909_v51 = vpop.f32.mrb[21].mxu0 }
0x2d6c   :  { %2802 = vst.msk [vmem:[#allocation8] sm:$0x3] %vm2801_vm13, %v2798_v32 }
0x2d6d   :  { %3510 = shalt.err (!%p3507_p3)
}
0x2d6e   :  { %s3511_s21 = scalar_lea.hbm %s4361_s10, 32 }
0x2d6f   :  { %p3512_p4 = scmp.ne.s32.totalorder %s4361_s10, %s3511_s21  ;;  %p3515_p5 = scmp.lt.u32.totalorder %s3511_s21, %s4361_s10 }
0x2d71   :  { %p3517_p6 = pnand %p3515_p5, %p3512_p4 }
0x2d73   :  { %3520 = shalt.err (!%p3517_p6)
}
0x2d74   :  { %2812 = dma.vmem_to_hbm [thread:$0]  %s2810_s5, 32, %s4361_s10, [#allocation5]  }
0x2d75   :  { %3525 = dma.done.wait [#allocation5], 32  }
0x2d76   :  { %3526 = vsyncadd [#allocation5], 4294967264 }
0x2d77   :  { %2816 = vsyncpa [#allocation4], 1 }
0x2d78   :  { %2817 = vsyncpa [#allocation5], 1 }
0x2d79   :  { %2818 = vsyncpa [#allocation6], 1 }

</bundles_post_ra>
